<compile_context>
chip_gen: v7x
topology: tpu7x:2x2x1
jax: 0.10.0
libtpu: 0.0.40
codegen_flags: <defaults>
</compile_context>

<pallas_src>
import functools

import jax
import jax.numpy as jnp
from jax.experimental import pallas as pl
from jax.experimental.pallas import tpu as pltpu


def _basic_block_kernel(x_ref, w1_ref, s1_ref, b1_ref, w2_ref, s2_ref, b2_ref,
                        o_ref, col, *, H, W, C):
    """One image (NHWC) per grid step.

    x_ref : (1, H, W, C)    f32   input block
    w*_ref: (9*C, C)        bf16  3x3 conv weights, rows ordered (dh, dw, cin)
    s*/b* : (1, C)          f32   folded BatchNorm scale / shift
    o_ref : (1, H, W, C)    f32
    col   : ((H+2)*W, 3*C)  bf16  scratch: dw-blocked im2col slab with one
                                  W-row zero pad band at top and bottom
                                  (reused for both convs)
    """
    M = H * W
    MP = (H + 2) * W

    # Zero the top/bottom pad bands (2*W rows).  The interior is fully
    # overwritten every fill; these bands never are.  Cheap and megacore-safe.
    zpad = jnp.zeros((W, 3 * C), jnp.bfloat16)
    col[0:W, :] = zpad
    col[MP - W:MP, :] = zpad

    # Row-edge masks for the dw=0 / dw=2 taps (left / right halo pixels).
    ridx = jax.lax.broadcasted_iota(jnp.int32, (M, 1), 0)
    left_edge = (ridx % W) == 0
    right_edge = (ridx % W) == (W - 1)

    def fill_col(act_f32):
        """act_f32: (M, C) f32 activation; (re)builds the slab interior."""
        # dw = 1 (center tap): straight copy at the aligned row offset W.
        col[W:W + M, C:2 * C] = act_f32.astype(jnp.bfloat16)
        # dw = 0 (left neighbour): shift down one pixel (XLU roll), zero the
        # left image edge, aligned write.
        sh_dn = jnp.where(left_edge, 0.0, pltpu.roll(act_f32, 1, 0))
        col[W:W + M, 0:C] = sh_dn.astype(jnp.bfloat16)
        # dw = 2 (right neighbour): shift up one pixel, zero the right edge.
        sh_up = jnp.where(right_edge, 0.0, pltpu.roll(act_f32, M - 1, 0))
        col[W:W + M, 2 * C:3 * C] = sh_up.astype(jnp.bfloat16)

    def conv3x3(w_ref):
        # 3 accumulating MXU dots; LHS row offsets 0 / W / 2W are 16-sublane
        # aligned, so reads need no relayout.  K = 3*C per dot, f32 accumulate.
        acc = None
        for dh in range(3):
            part = jnp.dot(col[dh * W:dh * W + M, :],
                           w_ref[dh * 3 * C:(dh + 1) * 3 * C, :],
                           preferred_element_type=jnp.float32)
            acc = part if acc is None else acc + part
        return acc                                            # (M, C) f32

    # conv1 -> bn1 -> relu
    fill_col(x_ref[0].reshape(M, C))
    y1 = jnp.maximum(conv3x3(w1_ref) * s1_ref[...] + b1_ref[...], 0.0)

    # conv2 -> bn2 -> identity shortcut -> relu
    fill_col(y1)
    y2 = conv3x3(w2_ref) * s2_ref[...] + b2_ref[...]
    y2 = jnp.maximum(y2 + x_ref[0].reshape(M, C), 0.0)
    o_ref[0] = y2.reshape(H, W, C).astype(o_ref.dtype)


def basic_block_forward(x_nhwc, params):
    """Fused BasicBlock forward.  x_nhwc: (N, H, W, C) float32 (NHWC)."""
    N, H, W, C = x_nhwc.shape

    # (3,3,Cin,Cout) HWIO -> (9*Cin, Cout) bf16 for the MXU; tap order (dh,dw).
    w1 = params["w1"].reshape(9 * C, C).astype(jnp.bfloat16)
    w2 = params["w2"].reshape(9 * C, C).astype(jnp.bfloat16)
    s1 = params["scale1"].reshape(1, C).astype(jnp.float32)
    b1 = params["shift1"].reshape(1, C).astype(jnp.float32)
    s2 = params["scale2"].reshape(1, C).astype(jnp.float32)
    b2 = params["shift2"].reshape(1, C).astype(jnp.float32)

    kernel = functools.partial(_basic_block_kernel, H=H, W=W, C=C)

    flops = 4 * N * H * W * 9 * C * C                 # 2 convs, 2 flops/MAC
    bytes_accessed = (2 * N * H * W * C * 4           # activation in + out (f32)
                      + 2 * 9 * C * C * 2             # both weight tensors (bf16)
                      + 4 * C * 4)                    # folded BN params

    # TODO(synk): for large batches fold several images per grid step (bigger
    # M per dot); with the test's N=2 one image per step keeps two grid steps,
    # which is what v7x's two TensorCores want.
    return pl.pallas_call(
        kernel,
        out_shape=jax.ShapeDtypeStruct((N, H, W, C), jnp.float32),
        grid=(N,),
        in_specs=[
            pl.BlockSpec((1, H, W, C), lambda n: (n, 0, 0, 0)),
            pl.BlockSpec((9 * C, C), lambda n: (0, 0)),
            pl.BlockSpec((1, C), lambda n: (0, 0)),
            pl.BlockSpec((1, C), lambda n: (0, 0)),
            pl.BlockSpec((9 * C, C), lambda n: (0, 0)),
            pl.BlockSpec((1, C), lambda n: (0, 0)),
            pl.BlockSpec((1, C), lambda n: (0, 0)),
        ],
        out_specs=pl.BlockSpec((1, H, W, C), lambda n: (n, 0, 0, 0)),
        scratch_shapes=[
            pltpu.VMEM(((H + 2) * W, 3 * C), jnp.bfloat16),   # im2col slab
        ],
        compiler_params=pltpu.CompilerParams(
            dimension_semantics=("parallel",),
            vmem_limit_bytes=32 * 1024 * 1024),
        cost_estimate=pl.CostEstimate(
            flops=flops, transcendentals=0, bytes_accessed=bytes_accessed),
    )(x_nhwc, w1, s1, b1, w2, s2, b2)


def basic_block_forward_nchw(x_nchw, params):
    """Drop-in PyTorch-layout adapter (prefer the NHWC path end-to-end)."""
    out = basic_block_forward(jnp.transpose(x_nchw, (0, 2, 3, 1)), params)
    return jnp.transpose(out, (0, 3, 1, 2))


def _reference(x_nhwc, params):
    """Pure-JAX reference with matching bf16-operand / f32-accumulate convs."""
    dn = ("NHWC", "HWIO", "NHWC")
    conv = lambda a, w: jax.lax.conv_general_dilated(
        a.astype(jnp.bfloat16), w.astype(jnp.bfloat16), (1, 1), "SAME",
        dimension_numbers=dn, preferred_element_type=jnp.float32)
    out = conv(x_nhwc, params["w1"]) * params["scale1"] + params["shift1"]
    out = jnp.maximum(out, 0.0)
    out = conv(out, params["w2"]) * params["scale2"] + params["shift2"]
    out = jnp.maximum(out + x_nhwc, 0.0)
    return out


def make_params(key, C):
    """Deterministic synthetic parameters for BasicBlock(C, C, stride=1)."""
    k1, k2 = jax.random.split(key)
    fan_in = C * 3 * 3
    bound = 1.0 / jnp.sqrt(fan_in)
    # conv weights in HWIO layout (3, 3, Cin, Cout)
    w1 = jax.random.uniform(k1, (3, 3, C, C), jnp.float32, -bound, bound)
    w2 = jax.random.uniform(k2, (3, 3, C, C), jnp.float32, -bound, bound)
    eps = 1e-5
    idx = jnp.arange(C, dtype=jnp.float32) / C
    gamma1, beta1 = 1.0 + 0.10 * idx, 0.05 * idx
    mean1, var1 = 0.01 * idx, 1.0 + 0.02 * idx
    gamma2, beta2 = 1.0 - 0.05 * idx, -0.03 * idx
    mean2, var2 = -0.02 * idx, 1.0 + 0.01 * idx
    scale1 = gamma1 / jnp.sqrt(var1 + eps)
    shift1 = beta1 - mean1 * scale1
    scale2 = gamma2 / jnp.sqrt(var2 + eps)
    shift2 = beta2 - mean2 * scale2
    return {"w1": w1, "w2": w2,
            "scale1": scale1, "shift1": shift1,
            "scale2": scale2, "shift2": shift2}


if __name__ == "__main__":
    key = jax.random.PRNGKey(0)
    kx, kp = jax.random.split(key)

    # BasicBlock(in_planes=128, planes=128, stride=1) — real ResNet width so
    # the channel (lane) axis is fully dense; spatial 16x16, batch 2.
    N, C, H, W = 2, 128, 16, 16
    x_nchw = jax.random.normal(kx, (N, C, H, W), jnp.float32)   # PyTorch layout
    params = make_params(kp, C)

    x_nhwc = jnp.transpose(x_nchw, (0, 2, 3, 1))                # NHWC main path
    out = basic_block_forward(x_nhwc, params)
    out = jax.block_until_ready(out)

    ref = _reference(x_nhwc, params)
    assert out.shape == (N, H, W, C)
    max_err = float(jnp.max(jnp.abs(out - ref)))
    assert jnp.allclose(out, ref, atol=3e-3, rtol=3e-3), (
        f"mismatch vs reference (max abs err {max_err})")

    print("KERNEL_OK")
</pallas_src>

<mosaic_0001>
module attributes {stable_mosaic.version = 11 : i64} {
  func.func @_basic_block_kernel(%arg0: i32, %arg1: memref<1x16x16x128xf32, #tpu.memory_space<vmem>>, %arg2: memref<1152x128xbf16, #tpu.memory_space<vmem>>, %arg3: memref<1x128xf32, #tpu.memory_space<vmem>>, %arg4: memref<1x128xf32, #tpu.memory_space<vmem>>, %arg5: memref<1152x128xbf16, #tpu.memory_space<vmem>>, %arg6: memref<1x128xf32, #tpu.memory_space<vmem>>, %arg7: memref<1x128xf32, #tpu.memory_space<vmem>>, %arg8: memref<1x16x16x128xf32, #tpu.memory_space<vmem>>, %arg9: memref<288x384xbf16, #tpu.memory_space<vmem>>) attributes {dimension_semantics = [#tpu.dimension_semantics<parallel>], iteration_bounds = array<i64: 2>, scalar_prefetch = 0 : i64, scratch_operands = 1 : i64, tpu.core_type = #tpu.core_type<tc>, window_params = [{transform_indices = @transform_0, window_bounds = array<i64: 1, 16, 16, 128>}, {pipeline_mode = #tpu.pipeline_mode<synchronous>, transform_indices = @transform_1, window_bounds = array<i64: 1152, 128>}, {pipeline_mode = #tpu.pipeline_mode<synchronous>, transform_indices = @transform_2, window_bounds = array<i64: 1, 128>}, {pipeline_mode = #tpu.pipeline_mode<synchronous>, transform_indices = @transform_3, window_bounds = array<i64: 1, 128>}, {pipeline_mode = #tpu.pipeline_mode<synchronous>, transform_indices = @transform_4, window_bounds = array<i64: 1152, 128>}, {pipeline_mode = #tpu.pipeline_mode<synchronous>, transform_indices = @transform_5, window_bounds = array<i64: 1, 128>}, {pipeline_mode = #tpu.pipeline_mode<synchronous>, transform_indices = @transform_6, window_bounds = array<i64: 1, 128>}, {transform_indices = @transform_7, window_bounds = array<i64: 1, 16, 16, 128>}]} {
    %cst = arith.constant 0.000000e+00 : bf16
    %0 = vector.broadcast %cst : bf16 to vector<16x384xbf16>
    %c0 = arith.constant 0 : index
    %c0_0 = arith.constant 0 : index
    %1 = vector.load %arg9[%c0, %c0_0] : memref<288x384xbf16, #tpu.memory_space<vmem>>, vector<16x384xbf16>
    tpu.vector_store %arg9[%c0, %c0_0], %0 {strides = array<i32>} : memref<288x384xbf16, #tpu.memory_space<vmem>>, vector<16x384xbf16>,
    %c272 = arith.constant 272 : index
    %c0_1 = arith.constant 0 : index
    %2 = vector.load %arg9[%c272, %c0_1] : memref<288x384xbf16, #tpu.memory_space<vmem>>, vector<16x384xbf16>
    tpu.vector_store %arg9[%c272, %c0_1], %0 {strides = array<i32>} : memref<288x384xbf16, #tpu.memory_space<vmem>>, vector<16x384xbf16>,
    %3 = tpu.iota {dimensions = array<i32: 0>} : vector<256x1xi32>
    %c16_i32 = arith.constant 16 : i32
    %c0_i32 = arith.constant 0 : i32
    %4 = arith.cmpi eq, %c16_i32, %c0_i32 : i32
    %c1_i32 = arith.constant 1 : i32
    %5 = arith.select %4, %c1_i32, %c16_i32 : i32
    %6 = vector.broadcast %5 : i32 to vector<256x1xi32>
    %7 = arith.remsi %3, %6 : vector<256x1xi32>
    %c0_i32_2 = arith.constant 0 : i32
    %8 = vector.broadcast %c0_i32_2 : i32 to vector<256x1xi32>
    %9 = arith.cmpi ne, %7, %8 : vector<256x1xi32>
    %c0_i32_3 = arith.constant 0 : i32
    %10 = vector.broadcast %c0_i32_3 : i32 to vector<256x1xi32>
    %11 = arith.cmpi slt, %7, %10 : vector<256x1xi32>
    %c0_i32_4 = arith.constant 0 : i32
    %12 = arith.cmpi slt, %5, %c0_i32_4 : i32
    %13 = vector.broadcast %12 : i1 to vector<256x1xi1>
    %14 = vector.broadcast %13 : vector<256x1xi1> to vector<256x1xi1>
    %15 = arith.xori %11, %14 : vector<256x1xi1>
    %16 = arith.andi %15, %9 : vector<256x1xi1>
    %17 = vector.broadcast %5 : i32 to vector<256x1xi32>
    %18 = arith.addi %7, %17 : vector<256x1xi32>
    %19 = arith.select %16, %18, %7 : vector<256x1xi1>, vector<256x1xi32>
    %c0_i32_5 = arith.constant 0 : i32
    %20 = vector.broadcast %c0_i32_5 : i32 to vector<256x1xi32>
    %21 = arith.cmpi eq, %19, %20 : vector<256x1xi32>
    %c16_i32_6 = arith.constant 16 : i32
    %c0_i32_7 = arith.constant 0 : i32
    %22 = arith.cmpi eq, %c16_i32_6, %c0_i32_7 : i32
    %c1_i32_8 = arith.constant 1 : i32
    %23 = arith.select %22, %c1_i32_8, %c16_i32_6 : i32
    %24 = vector.broadcast %23 : i32 to vector<256x1xi32>
    %25 = arith.remsi %3, %24 : vector<256x1xi32>
    %c0_i32_9 = arith.constant 0 : i32
    %26 = vector.broadcast %c0_i32_9 : i32 to vector<256x1xi32>
    %27 = arith.cmpi ne, %25, %26 : vector<256x1xi32>
    %c0_i32_10 = arith.constant 0 : i32
    %28 = vector.broadcast %c0_i32_10 : i32 to vector<256x1xi32>
    %29 = arith.cmpi slt, %25, %28 : vector<256x1xi32>
    %c0_i32_11 = arith.constant 0 : i32
    %30 = arith.cmpi slt, %23, %c0_i32_11 : i32
    %31 = vector.broadcast %30 : i1 to vector<256x1xi1>
    %32 = vector.broadcast %31 : vector<256x1xi1> to vector<256x1xi1>
    %33 = arith.xori %29, %32 : vector<256x1xi1>
    %34 = arith.andi %33, %27 : vector<256x1xi1>
    %35 = vector.broadcast %23 : i32 to vector<256x1xi32>
    %36 = arith.addi %25, %35 : vector<256x1xi32>
    %37 = arith.select %34, %36, %25 : vector<256x1xi1>, vector<256x1xi32>
    %c15_i32 = arith.constant 15 : i32
    %38 = vector.broadcast %c15_i32 : i32 to vector<256x1xi32>
    %39 = arith.cmpi eq, %37, %38 : vector<256x1xi32>
    %c0_12 = arith.constant 0 : index
    %c0_13 = arith.constant 0 : index
    %c0_14 = arith.constant 0 : index
    %c0_15 = arith.constant 0 : index
    %40 = vector.load %arg1[%c0_12, %c0_13, %c0_14, %c0_15] : memref<1x16x16x128xf32, #tpu.memory_space<vmem>>, vector<1x16x16x128xf32>
    %41 = vector.shape_cast %40 : vector<1x16x16x128xf32> to vector<16x16x128xf32>
    %42 = vector.shape_cast %41 : vector<16x16x128xf32> to vector<256x128xf32>
    %43 = arith.truncf %42 : vector<256x128xf32> to vector<256x128xbf16>
    %c16 = arith.constant 16 : index
    %c128 = arith.constant 128 : index
    %44 = vector.load %arg9[%c16, %c128] : memref<288x384xbf16, #tpu.memory_space<vmem>>, vector<256x128xbf16>
    tpu.vector_store %arg9[%c16, %c128], %43 {strides = array<i32>} : memref<288x384xbf16, #tpu.memory_space<vmem>>, vector<256x128xbf16>,
    %c1_i32_16 = arith.constant 1 : i32
    %45 = tpu.dynamic_rotate %42 by %c1_i32_16 dim 0 : vector<256x128xf32>, i32 -> vector<256x128xf32>
    %cst_17 = arith.constant 0.000000e+00 : f32
    %46 = vector.shape_cast %21 : vector<256x1xi1> to vector<256x1xi1>
    %47 = vector.broadcast %46 : vector<256x1xi1> to vector<256x128xi1>
    %48 = vector.broadcast %cst_17 : f32 to vector<256x128xf32>
    %49 = arith.select %47, %48, %45 : vector<256x128xi1>, vector<256x128xf32>
    %50 = arith.truncf %49 : vector<256x128xf32> to vector<256x128xbf16>
    %c16_18 = arith.constant 16 : index
    %c0_19 = arith.constant 0 : index
    %51 = vector.load %arg9[%c16_18, %c0_19] : memref<288x384xbf16, #tpu.memory_space<vmem>>, vector<256x128xbf16>
    tpu.vector_store %arg9[%c16_18, %c0_19], %50 {strides = array<i32>} : memref<288x384xbf16, #tpu.memory_space<vmem>>, vector<256x128xbf16>,
    %c255_i32 = arith.constant 255 : i32
    %52 = tpu.dynamic_rotate %42 by %c255_i32 dim 0 : vector<256x128xf32>, i32 -> vector<256x128xf32>
    %cst_20 = arith.constant 0.000000e+00 : f32
    %53 = vector.shape_cast %39 : vector<256x1xi1> to vector<256x1xi1>
    %54 = vector.broadcast %53 : vector<256x1xi1> to vector<256x128xi1>
    %55 = vector.broadcast %cst_20 : f32 to vector<256x128xf32>
    %56 = arith.select %54, %55, %52 : vector<256x128xi1>, vector<256x128xf32>
    %57 = arith.truncf %56 : vector<256x128xf32> to vector<256x128xbf16>
    %c16_21 = arith.constant 16 : index
    %c256 = arith.constant 256 : index
    %58 = vector.load %arg9[%c16_21, %c256] : memref<288x384xbf16, #tpu.memory_space<vmem>>, vector<256x128xbf16>
    tpu.vector_store %arg9[%c16_21, %c256], %57 {strides = array<i32>} : memref<288x384xbf16, #tpu.memory_space<vmem>>, vector<256x128xbf16>,
    %c0_22 = arith.constant 0 : index
    %c0_23 = arith.constant 0 : index
    %59 = vector.load %arg9[%c0_22, %c0_23] : memref<288x384xbf16, #tpu.memory_space<vmem>>, vector<256x384xbf16>
    %c0_24 = arith.constant 0 : index
    %c0_25 = arith.constant 0 : index
    %60 = vector.load %arg2[%c0_24, %c0_25] : memref<1152x128xbf16, #tpu.memory_space<vmem>>, vector<384x128xbf16>
    %cst_26 = arith.constant dense<0.000000e+00> : vector<256x128xf32>
    %61 = tpu.matmul %59, %60, %cst_26 {dimension_numbers = #tpu.dot_dimension_numbers<[1], [0], [0], [1], [0, 0, 1, 1], [], []>} : vector<256x384xbf16>, vector<384x128xbf16>, vector<256x128xf32> -> vector<256x128xf32>
    %c16_27 = arith.constant 16 : index
    %c0_28 = arith.constant 0 : index
    %62 = vector.load %arg9[%c16_27, %c0_28] : memref<288x384xbf16, #tpu.memory_space<vmem>>, vector<256x384xbf16>
    %c384 = arith.constant 384 : index
    %c0_29 = arith.constant 0 : index
    %63 = vector.load %arg2[%c384, %c0_29] : memref<1152x128xbf16, #tpu.memory_space<vmem>>, vector<384x128xbf16>
    %cst_30 = arith.constant dense<0.000000e+00> : vector<256x128xf32>
    %64 = tpu.matmul %62, %63, %cst_30 {dimension_numbers = #tpu.dot_dimension_numbers<[1], [0], [0], [1], [0, 0, 1, 1], [], []>} : vector<256x384xbf16>, vector<384x128xbf16>, vector<256x128xf32> -> vector<256x128xf32>
    %65 = arith.addf %61, %64 : vector<256x128xf32>
    %c32 = arith.constant 32 : index
    %c0_31 = arith.constant 0 : index
    %66 = vector.load %arg9[%c32, %c0_31] : memref<288x384xbf16, #tpu.memory_space<vmem>>, vector<256x384xbf16>
    %c768 = arith.constant 768 : index
    %c0_32 = arith.constant 0 : index
    %67 = vector.load %arg2[%c768, %c0_32] : memref<1152x128xbf16, #tpu.memory_space<vmem>>, vector<384x128xbf16>
    %cst_33 = arith.constant dense<0.000000e+00> : vector<256x128xf32>
    %68 = tpu.matmul %66, %67, %cst_33 {dimension_numbers = #tpu.dot_dimension_numbers<[1], [0], [0], [1], [0, 0, 1, 1], [], []>} : vector<256x384xbf16>, vector<384x128xbf16>, vector<256x128xf32> -> vector<256x128xf32>
    %69 = arith.addf %65, %68 : vector<256x128xf32>
    %c0_34 = arith.constant 0 : index
    %c0_35 = arith.constant 0 : index
    %70 = vector.load %arg3[%c0_34, %c0_35] : memref<1x128xf32, #tpu.memory_space<vmem>>, vector<1x128xf32>
    %71 = vector.broadcast %70 : vector<1x128xf32> to vector<256x128xf32>
    %72 = arith.mulf %69, %71 : vector<256x128xf32>
    %c0_36 = arith.constant 0 : index
    %c0_37 = arith.constant 0 : index
    %73 = vector.load %arg4[%c0_36, %c0_37] : memref<1x128xf32, #tpu.memory_space<vmem>>, vector<1x128xf32>
    %74 = vector.broadcast %73 : vector<1x128xf32> to vector<256x128xf32>
    %75 = arith.addf %72, %74 : vector<256x128xf32>
    %cst_38 = arith.constant 0.000000e+00 : f32
    %76 = vector.broadcast %cst_38 : f32 to vector<256x128xf32>
    %77 = arith.maximumf %75, %76 : vector<256x128xf32>
    %78 = arith.truncf %77 : vector<256x128xf32> to vector<256x128xbf16>
    %c16_39 = arith.constant 16 : index
    %c128_40 = arith.constant 128 : index
    %79 = vector.load %arg9[%c16_39, %c128_40] : memref<288x384xbf16, #tpu.memory_space<vmem>>, vector<256x128xbf16>
    tpu.vector_store %arg9[%c16_39, %c128_40], %78 {strides = array<i32>} : memref<288x384xbf16, #tpu.memory_space<vmem>>, vector<256x128xbf16>,
    %c1_i32_41 = arith.constant 1 : i32
    %80 = tpu.dynamic_rotate %77 by %c1_i32_41 dim 0 : vector<256x128xf32>, i32 -> vector<256x128xf32>
    %cst_42 = arith.constant 0.000000e+00 : f32
    %81 = vector.shape_cast %21 : vector<256x1xi1> to vector<256x1xi1>
    %82 = vector.broadcast %81 : vector<256x1xi1> to vector<256x128xi1>
    %83 = vector.broadcast %cst_42 : f32 to vector<256x128xf32>
    %84 = arith.select %82, %83, %80 : vector<256x128xi1>, vector<256x128xf32>
    %85 = arith.truncf %84 : vector<256x128xf32> to vector<256x128xbf16>
    %c16_43 = arith.constant 16 : index
    %c0_44 = arith.constant 0 : index
    %86 = vector.load %arg9[%c16_43, %c0_44] : memref<288x384xbf16, #tpu.memory_space<vmem>>, vector<256x128xbf16>
    tpu.vector_store %arg9[%c16_43, %c0_44], %85 {strides = array<i32>} : memref<288x384xbf16, #tpu.memory_space<vmem>>, vector<256x128xbf16>,
    %c255_i32_45 = arith.constant 255 : i32
    %87 = tpu.dynamic_rotate %77 by %c255_i32_45 dim 0 : vector<256x128xf32>, i32 -> vector<256x128xf32>
    %cst_46 = arith.constant 0.000000e+00 : f32
    %88 = vector.shape_cast %39 : vector<256x1xi1> to vector<256x1xi1>
    %89 = vector.broadcast %88 : vector<256x1xi1> to vector<256x128xi1>
    %90 = vector.broadcast %cst_46 : f32 to vector<256x128xf32>
    %91 = arith.select %89, %90, %87 : vector<256x128xi1>, vector<256x128xf32>
    %92 = arith.truncf %91 : vector<256x128xf32> to vector<256x128xbf16>
    %c16_47 = arith.constant 16 : index
    %c256_48 = arith.constant 256 : index
    %93 = vector.load %arg9[%c16_47, %c256_48] : memref<288x384xbf16, #tpu.memory_space<vmem>>, vector<256x128xbf16>
    tpu.vector_store %arg9[%c16_47, %c256_48], %92 {strides = array<i32>} : memref<288x384xbf16, #tpu.memory_space<vmem>>, vector<256x128xbf16>,
    %c0_49 = arith.constant 0 : index
    %c0_50 = arith.constant 0 : index
    %94 = vector.load %arg9[%c0_49, %c0_50] : memref<288x384xbf16, #tpu.memory_space<vmem>>, vector<256x384xbf16>
    %c0_51 = arith.constant 0 : index
    %c0_52 = arith.constant 0 : index
    %95 = vector.load %arg5[%c0_51, %c0_52] : memref<1152x128xbf16, #tpu.memory_space<vmem>>, vector<384x128xbf16>
    %cst_53 = arith.constant dense<0.000000e+00> : vector<256x128xf32>
    %96 = tpu.matmul %94, %95, %cst_53 {dimension_numbers = #tpu.dot_dimension_numbers<[1], [0], [0], [1], [0, 0, 1, 1], [], []>} : vector<256x384xbf16>, vector<384x128xbf16>, vector<256x128xf32> -> vector<256x128xf32>
    %c16_54 = arith.constant 16 : index
    %c0_55 = arith.constant 0 : index
    %97 = vector.load %arg9[%c16_54, %c0_55] : memref<288x384xbf16, #tpu.memory_space<vmem>>, vector<256x384xbf16>
    %c384_56 = arith.constant 384 : index
    %c0_57 = arith.constant 0 : index
    %98 = vector.load %arg5[%c384_56, %c0_57] : memref<1152x128xbf16, #tpu.memory_space<vmem>>, vector<384x128xbf16>
    %cst_58 = arith.constant dense<0.000000e+00> : vector<256x128xf32>
    %99 = tpu.matmul %97, %98, %cst_58 {dimension_numbers = #tpu.dot_dimension_numbers<[1], [0], [0], [1], [0, 0, 1, 1], [], []>} : vector<256x384xbf16>, vector<384x128xbf16>, vector<256x128xf32> -> vector<256x128xf32>
    %100 = arith.addf %96, %99 : vector<256x128xf32>
    %c32_59 = arith.constant 32 : index
    %c0_60 = arith.constant 0 : index
    %101 = vector.load %arg9[%c32_59, %c0_60] : memref<288x384xbf16, #tpu.memory_space<vmem>>, vector<256x384xbf16>
    %c768_61 = arith.constant 768 : index
    %c0_62 = arith.constant 0 : index
    %102 = vector.load %arg5[%c768_61, %c0_62] : memref<1152x128xbf16, #tpu.memory_space<vmem>>, vector<384x128xbf16>
    %cst_63 = arith.constant dense<0.000000e+00> : vector<256x128xf32>
    %103 = tpu.matmul %101, %102, %cst_63 {dimension_numbers = #tpu.dot_dimension_numbers<[1], [0], [0], [1], [0, 0, 1, 1], [], []>} : vector<256x384xbf16>, vector<384x128xbf16>, vector<256x128xf32> -> vector<256x128xf32>
    %104 = arith.addf %100, %103 : vector<256x128xf32>
    %c0_64 = arith.constant 0 : index
    %c0_65 = arith.constant 0 : index
    %105 = vector.load %arg6[%c0_64, %c0_65] : memref<1x128xf32, #tpu.memory_space<vmem>>, vector<1x128xf32>
    %106 = vector.broadcast %105 : vector<1x128xf32> to vector<256x128xf32>
    %107 = arith.mulf %104, %106 : vector<256x128xf32>
    %c0_66 = arith.constant 0 : index
    %c0_67 = arith.constant 0 : index
    %108 = vector.load %arg7[%c0_66, %c0_67] : memref<1x128xf32, #tpu.memory_space<vmem>>, vector<1x128xf32>
    %109 = vector.broadcast %108 : vector<1x128xf32> to vector<256x128xf32>
    %110 = arith.addf %107, %109 : vector<256x128xf32>
    %c0_68 = arith.constant 0 : index
    %c0_69 = arith.constant 0 : index
    %c0_70 = arith.constant 0 : index
    %c0_71 = arith.constant 0 : index
    %111 = vector.load %arg1[%c0_68, %c0_69, %c0_70, %c0_71] : memref<1x16x16x128xf32, #tpu.memory_space<vmem>>, vector<1x16x16x128xf32>
    %112 = vector.shape_cast %111 : vector<1x16x16x128xf32> to vector<16x16x128xf32>
    %113 = vector.shape_cast %112 : vector<16x16x128xf32> to vector<256x128xf32>
    %114 = arith.addf %110, %113 : vector<256x128xf32>
    %cst_72 = arith.constant 0.000000e+00 : f32
    %115 = vector.broadcast %cst_72 : f32 to vector<256x128xf32>
    %116 = arith.maximumf %114, %115 : vector<256x128xf32>
    %117 = vector.shape_cast %116 : vector<256x128xf32> to vector<16x16x128xf32>
    %c0_73 = arith.constant 0 : index
    %c0_74 = arith.constant 0 : index
    %c0_75 = arith.constant 0 : index
    %c0_76 = arith.constant 0 : index
    %118 = vector.load %arg8[%c0_73, %c0_74, %c0_75, %c0_76] : memref<1x16x16x128xf32, #tpu.memory_space<vmem>>, vector<1x16x16x128xf32>
    %119 = vector.shape_cast %118 : vector<1x16x16x128xf32> to vector<16x16x128xf32>
    %120 = vector.shape_cast %117 : vector<16x16x128xf32> to vector<1x16x16x128xf32>
    tpu.vector_store %arg8[%c0_73, %c0_74, %c0_75, %c0_76], %120 {strides = array<i32>} : memref<1x16x16x128xf32, #tpu.memory_space<vmem>>, vector<1x16x16x128xf32>,
    return
  }
  func.func @transform_0(%arg0: i32) -> (i32, i32, i32, i32) {
    %c0_i32 = arith.constant 0 : i32
    %c0_i32_0 = arith.constant 0 : i32
    %c0_i32_1 = arith.constant 0 : i32
    %c0_i32_2 = arith.constant 0 : i32
    return %arg0, %c0_i32, %c0_i32_0, %c0_i32_1 : i32, i32, i32, i32
  }
  func.func @transform_1(%arg0: i32) -> (i32, i32) {
    %c0_i32 = arith.constant 0 : i32
    %c0_i32_0 = arith.constant 0 : i32
    %c0_i32_1 = arith.constant 0 : i32
    return %c0_i32, %c0_i32_0 : i32, i32
  }
  func.func @transform_2(%arg0: i32) -> (i32, i32) {
    %c0_i32 = arith.constant 0 : i32
    %c0_i32_0 = arith.constant 0 : i32
    %c0_i32_1 = arith.constant 0 : i32
    return %c0_i32, %c0_i32_0 : i32, i32
  }
  func.func @transform_3(%arg0: i32) -> (i32, i32) {
    %c0_i32 = arith.constant 0 : i32
    %c0_i32_0 = arith.constant 0 : i32
    %c0_i32_1 = arith.constant 0 : i32
    return %c0_i32, %c0_i32_0 : i32, i32
  }
  func.func @transform_4(%arg0: i32) -> (i32, i32) {
    %c0_i32 = arith.constant 0 : i32
    %c0_i32_0 = arith.constant 0 : i32
    %c0_i32_1 = arith.constant 0 : i32
    return %c0_i32, %c0_i32_0 : i32, i32
  }
  func.func @transform_5(%arg0: i32) -> (i32, i32) {
    %c0_i32 = arith.constant 0 : i32
    %c0_i32_0 = arith.constant 0 : i32
    %c0_i32_1 = arith.constant 0 : i32
    return %c0_i32, %c0_i32_0 : i32, i32
  }
  func.func @transform_6(%arg0: i32) -> (i32, i32) {
    %c0_i32 = arith.constant 0 : i32
    %c0_i32_0 = arith.constant 0 : i32
    %c0_i32_1 = arith.constant 0 : i32
    return %c0_i32, %c0_i32_0 : i32, i32
  }
  func.func @transform_7(%arg0: i32) -> (i32, i32, i32, i32) {
    %c0_i32 = arith.constant 0 : i32
    %c0_i32_0 = arith.constant 0 : i32
    %c0_i32_1 = arith.constant 0 : i32
    %c0_i32_2 = arith.constant 0 : i32
    return %arg0, %c0_i32, %c0_i32_0, %c0_i32_1 : i32, i32, i32, i32
  }
}

</mosaic_0001>

<bundles_post_ra>
// kernel: tpu_custom_call.1
= control target key start
LH: loop header
LB: loop body
LE: loop exit
PB: predicated region body
PF: predicated region fallthrough
CT: control target
= control target key end

     0   :  { %12 = vsyncpa [#allocation4], 0  ;;  %s11024_s0 = inlined_call_operand.hbm [shape: f32[2,16,16,128], index: 0, kind: input, shape index: {}]   ;;  %s11025_s1 = inlined_call_operand.hbm [shape: bf16[1152,128], index: 1, kind: input, shape index: {}]   ;;  %s11026_s2 = inlined_call_operand.vmem [shape: f32[1,128], index: 2, kind: input, shape index: {}]   ;;  %s11027_s3 = inlined_call_operand.vmem [shape: f32[1,128], index: 3, kind: input, shape index: {}]   ;;  %s11028_s4 = inlined_call_operand.hbm [shape: bf16[1152,128], index: 4, kind: input, shape index: {}]   ;;  %s11029_s5 = inlined_call_operand.vmem [shape: f32[1,128], index: 5, kind: input, shape index: {}]   ;;  %s11030_s6 = inlined_call_operand.vmem [shape: f32[1,128], index: 6, kind: input, shape index: {}]   ;;  %s11031_s7 = inlined_call_operand.hbm [shape: f32[2,16,16,128], index: 7, kind: output, shape index: {}]  }
   0x1   :  { %14 = vsyncpa [#allocation4 + $0x1], 0 }
   0x2   :  { %15 = vsyncpa [#allocation7], 0 }
   0x3   :  { %16 = vsyncpa [#allocation5], 0 }
   0x4   :  { %18 = vsyncpa [#allocation5 + $0x1], 0  ;;  %s8110_s24 = smov 0   ;;  %s8112_s25 = smov 0  }
   0x5   :  { %s8114_s26 = smov 0   ;;  %s8116_s27 = smov 0  }
   0x6 LB: > { %s8131_s28 = sadd.s32 4294967295, %s8056_s27   ;;  %s5320_s29 = sadd.s32 4294967294, %s8056_s27   ;;  %s8056_s27 = sphi %s8116_s27, %s11733_s27   ;;  %s8052_s26 = sphi %s8114_s26, %s11732_s26   ;;  %s8048_s25 = sphi %s8112_s25, %s11731_s25   ;;  %s8044_s24 = sphi %s8110_s24, %s11730_s24  }
   0x7   : > { %p44_p0 = scmp.ne.s32.totalorder %s8048_s25, %s8044_s24  ;;  %p11032_p1 = scmp.eq.s32.totalorder %s8131_s28, 0 }
   0x8   : > { %p200_p3 = scmp.eq.s32.totalorder %s5320_s29, 1  ;;  %p5321_p5 = scmp.ge.s32.totalorder %s8056_s27, 1 }
   0x9   : > { %p8140_p4 = por %p11032_p1, %p44_p0  ;;  %p207_p7 = scmp.lt.s32.totalorder %s8056_s27, 3 }
   0xa   : > { %p8145_p6 = por %p200_p3, %p44_p0  ;;  %s8058_s10 = smov [#allocation6]  }
   0xb   : > { %s11230_s30 = scalar_select %p8140_p4, 1, 0 }
   0xc   : > { %s11231_s8 = scalar_select %p8145_p6, 1, 0 }
   0xd   : > { %p8150_p8 = pnand %p5321_p5, %p207_p7  ;;  %s219_s11 = sshll.u32 %s8058_s10, 4  ;;  %s8154_s11 = int_to_ptr.vmem [resolvable:$true] %s219_s11 }
   0xe   : > { %s8059_s13 = smov [#allocation8]   ;;  %s7900_s17 = scalar_lea.hbm %s11025_s1, 9216 }
   0xf   : > { %p7660_p9 = pneg %p8150_p8  ;;  %s238_s14 = sshll.u32 %s8059_s13, 4  ;;  %s8165_s14 = int_to_ptr.vmem [resolvable:$true] %s238_s14 }
  0x10   : > { %p7901_p12 = scmp.ne.s32.totalorder %s11025_s1, %s7900_s17  ;;  %p7907_p5 = scmp.lt.u32.totalorder %s7900_s17, %s11025_s1 }
  0x11   : > { %p8161_p11 = pnand %p7660_p9, %p11032_p1 }
  0x13   : > { %p7902_p13 = pneg %p8161_p11 }
  0x15   : > { %p7903_p0 = pnand %p7902_p13, %p7901_p12 }
  0x17   : > { %p7904_p3 = pneg %p7903_p0 }
  0x19   : > { %p7909_p7 = pnand %p7907_p5, %p7904_p3 }
  0x1b   : > { %7912 = shalt.err (!%p7909_p7)
}
  0x1c   : > { %s7913_s22 = scalar_lea.vmem %s8154_s11, 9216  ;;  %p7921_p2 = scmp.lt.s32.totalorder %s8154_s11, %s8154_s11 }
  0x1d   : > { %p7914_p9 = scmp.ne.s32.totalorder %s8154_s11, %s7913_s22  ;;  %p7922_p12 = scmp.lt.s32.totalorder %s7913_s22, %s7913_s22 }
  0x1f   : > { %p7916_p10 = pnand %p7914_p9, %p7902_p13  ;;  %p7923_p0 = por %p7922_p12, %p7921_p2 }
  0x21   : > { %p7917_p1 = pneg %p7916_p10 }
  0x23   : > { %p7924_p6 = pnand %p7923_p0, %p7917_p1 }
  0x25   : > { %7927 = shalt.err (!%p7924_p6)
}
  0x26   : > { %s8060_s23 = smov 64   ;;  %s8061_s29 = smov 4  }
  0x27   : > { %7663 = dma.hbm_to_vmem [thread:$0]  (!%p8161_p11), %s11025_s1, 9216, %s8154_s11, [#allocation7], %s8060_s23, %s8060_s23, %s8061_s29  }
  0x28   : > { %s7928_s17 = scalar_lea.hbm %s11028_s4, 9216 }
  0x29   : > { %p7929_p2 = scmp.ne.s32.totalorder %s11028_s4, %s7928_s17  ;;  %p7935_p10 = scmp.lt.u32.totalorder %s7928_s17, %s11028_s4 }
  0x2b   : > { %p7931_p1 = pnand %p7929_p2, %p7902_p13 }
  0x2d   : > { %p7932_p6 = pneg %p7931_p1 }
  0x2f   : > { %p7937_p3 = pnand %p7935_p10, %p7932_p6 }
  0x31   : > { %7940 = shalt.err (!%p7937_p3)
}
  0x32   : > { %s7941_s11 = scalar_lea.vmem %s8165_s14, 9216  ;;  %p7949_p12 = scmp.lt.s32.totalorder %s8165_s14, %s8165_s14 }
  0x33   : > { %p7942_p5 = scmp.ne.s32.totalorder %s8165_s14, %s7941_s11  ;;  %p7950_p0 = scmp.lt.s32.totalorder %s7941_s11, %s7941_s11 }
  0x35   : > { %p7944_p7 = pnand %p7942_p5, %p7902_p13  ;;  %p7951_p2 = por %p7950_p0, %p7949_p12 }
  0x37   : > { %p7945_p9 = pneg %p7944_p7 }
  0x39   : > { %p7952_p1 = pnand %p7951_p2, %p7945_p9 }
  0x3b   : > { %7955 = shalt.err (!%p7952_p1)
}
  0x3c   : > { %7666 = dma.hbm_to_vmem [thread:$0]  (!%p8161_p11), %s11028_s4, 9216, %s8165_s14, [#allocation7], %s8060_s23, %s8060_s23, %s8061_s29  }
  0x3d   : > { %s8220_s13 = sadd.s32 1, %s8056_s27   ;;  %s31_s12 = sadd.s32 1, %s8052_s26 }
  0x3e   : > { %s28_s15 = ssub.s32 %s8056_s27, %s8220_s13  ;;  %p38_p13 = scmp.ne.s32.totalorder %s8052_s26, %s8048_s25 }
  0x3f   : > { %p29_p6 = scmp.eq.s32.totalorder %s28_s15, 0  ;;  %p39_p10 = scmp.eq.s32.totalorder %s8056_s27, 0 }
  0x40   : > { %p11234_p3 = scmp.eq.s32.totalorder %s8131_s28, 1  ;;  %p7677_p7 = scmp.lt.s32.totalorder %s8056_s27, 2 }
  0x41   : > { %s8236_s17 = scalar_select %p29_p6, %s8052_s26, %s31_s12  }
  0x42   : > { %p8230_p5 = por %p11234_p3, %p38_p13  ;;  %p40_p9 = por %p39_p10, %p38_p13 }
  0x43   : > { %s258_s18 = sand.u32 1, %s8052_s26   ;;  %s5486_s14 = sshll.u32 %s8056_s27, 12 }
  0x44   : > { %s11235_s16 = scalar_select %p8230_p5, 1, 0 }
  0x45   : > { %s5325_s19 = sshll.u32 %s258_s18, 8  ;;  %s8243_s20 = scalar_lea.hbm %s11024_s0, %s5486_s14 }
  0x46   : > { %s262_s21 = scalar_lea.vmem [#allocation3], %s5325_s19  ;;  %p8247_p11 = pnand %p7677_p7, %p40_p9 }
  0x47   : > { %s269_s11 = sshll.u32 %s262_s21, 4  ;;  %s8251_s10 = scalar_lea.sflag [#allocation4], %s258_s18  ;;  %s8245_s11 = int_to_ptr.vmem [resolvable:$true] %s269_s11 }
  0x48   : > { %s7956_s12 = scalar_lea.hbm %s8243_s20, 4096  ;;  %p7958_p0 = pneg %p8247_p11 }
  0x49   : > { %p7957_p12 = scmp.ne.s32.totalorder %s8243_s20, %s7956_s12  ;;  %s7961_s14 = scalar_lea.hbm %s11024_s0, 8192 }
  0x4a   : > { %p7962_p13 = scmp.lt.u32.totalorder %s8243_s20, %s11024_s0  ;;  %p7963_p6 = scmp.lt.u32.totalorder %s7961_s14, %s7956_s12 }
  0x4b   : > { %p7959_p2 = pnand %p7958_p0, %p7957_p12  ;;  %p7965_p3 = scmp.lt.u32.totalorder %s7956_s12, %s8243_s20 }
  0x4c   : > { %p7964_p10 = por %p7963_p6, %p7962_p13 }
  0x4d   : > { %p7960_p1 = pneg %p7959_p2 }
  0x4e   : > { %p7966_p7 = por %p7965_p3, %p7964_p10 }
  0x50   : > { %p7967_p9 = pnand %p7966_p7, %p7960_p1 }
  0x52   : > { %7970 = shalt.err (!%p7967_p9)
}
  0x53   : > { %s7971_s18 = scalar_lea.vmem %s8245_s11, 4096  ;;  %s8062_s21 = smov [#allocation3]  }
  0x54   : > { %p7972_p12 = scmp.ne.s32.totalorder %s8245_s11, %s7971_s18  ;;  %s7976_s15 = sshll.u32 %s8062_s21, 4  ;;  %s7977_s15 = int_to_ptr.vmem [resolvable:$false] %s7976_s15 }
  0x55   : > { %s7978_s19 = scalar_lea.vmem %s7977_s15, 8192  ;;  %p7979_p4 = scmp.lt.s32.totalorder %s8245_s11, %s7977_s15 }
  0x56   : > { %p7974_p2 = pnand %p7972_p12, %p7958_p0  ;;  %p7980_p13 = scmp.lt.s32.totalorder %s7978_s19, %s7971_s18 }
  0x58   : > { %p7975_p5 = pneg %p7974_p2  ;;  %p7981_p6 = por %p7980_p13, %p7979_p4 }
  0x5a   : > { %p7982_p10 = pnand %p7981_p6, %p7975_p5 }
  0x5c   : > { %7985 = shalt.err (!%p7982_p10)
}
  0x5d   : > { %s8063_s12 = smov 128   ;;  %s8064_s14 = smov 8  }
  0x5e   : > { %7670 = dma.hbm_to_vmem [thread:$0]  (!%p8247_p11), %s8243_s20, 4096, %s8245_s11, %s8251_s10, %s8063_s12, %s8063_s12, %s8064_s14  }
  0x5f   : > { %281 = sbr.rel (%p8150_p8) target bundleno = 1188 (0x4a4), region = 48 }
  0x66   : > { %s8282_s23 = sand.u32 1, %s8048_s25   ;;  %p11237_p4 = scmp.ne.s32.totalorder %s11230_s30, 0 }
  0x67   : > { %s5329_s29 = sshll.u32 %s8282_s23, 8  ;;  %s284_s18 = scalar_lea.sflag [#allocation4], %s8282_s23 }
  0x68   : > { %s8288_s21 = scalar_lea.vmem [#allocation3], %s5329_s29 }
  0x69   : > { %8031 = dma.done.wait (%p11237_p4), %s284_s18, 4096  }
  0x6a   : > { %8033 = vsyncadd (%p11237_p4), %s284_s18, 4294963200  ;;  %p11238_p5 = scmp.eq.s32.totalorder %s8131_s28, 0 }
  0x6c   : > { %8035 = dma.done.wait (%p11238_p5), [#allocation7], 18432   ;;  %p11239_p8 = pmov %p11238_p5 }
  0x6d   : > { %v333_v0 = vlaneseq  ;;  %v11035_v1 = vmov 0   ;;  %v7755_v8 = vld [vmem:[#allocation6 + $0x100] sm:$0xff]   ;;  %v7759_v14 = vld [vmem:[#allocation6 + $0x108] sm:$0xff]   ;;  %v7763_v21 = vld [vmem:[#allocation6 + $0x110] sm:$0xff]   ;;  %vm11086_vm3 = vmmov 1   ;;  %s10799_s12 = scalar_lea.vmem [#allocation9], %s5329_s29 }
  0x6e   : > { %8037 = vsyncadd (%p11239_p8), [#allocation7], 4294948864  ;;  %2053 = vmatprep.mubr.bf16.mxu1 %v11035_v1  ;;  %v7756_v10 = vld [vmem:[#allocation6 + $0x40] sm:$0xff]   ;;  %6224 = vmatprep.subr.bf16.mxu0 %v7755_v8  ;;  %v7760_v16 = vld [vmem:[#allocation6 + $0x48] sm:$0xff]   ;;  %s5487_s14 = sshll.u32 %s8131_s28, 12  ;;  %s5228_s29 = sshll.u32 %s10799_s12, 4  ;;  %s10977_s29 = int_to_ptr.vmem [resolvable:$true] %s5228_s29 }
  0x6f   : > { %v8299_v2 = vshrl.u32 %v333_v0, 7  ;;  %v7757_v11 = vld [vmem:[#allocation6 + $0xc0] sm:$0xff]   ;;  %6360 = vmatprep.subr.bf16.mxu1 %v7756_v10  ;;  %v7761_v18 = vld [vmem:[#allocation6 + $0xc8] sm:$0xff]   ;;  %v7764_v23 = vld [vmem:[#allocation6 + $0x50] sm:$0xff]   ;;  %s10975_s9 = scalar_lea.hbm %s11031_s7, %s5487_s14  ;;  %s5215_s28 = scalar_lea.sflag [#allocation5], %s8282_s23 }
  0x70   : > { %v7758_v13 = vld [vmem:[#allocation6] sm:$0xff]   ;;  %6225 = vmatpush3.bf16.msra.mxu0 %v7757_v11  ;;  %v7762_v20 = vld [vmem:[#allocation6 + $0x8] sm:$0xff]   ;;  %v7765_v24 = vld [vmem:[#allocation6 + $0xd0] sm:$0xff]   ;;  %p11727_p0 = scmp.ne.s32.totalorder %s11235_s16, 0  ;;  %s8067_s20 = smov [#allocation9]  }
  0x71   : > { %11240 = vst [vmem:[#allocation13_spill] sm:$0xff] %v8299_v2  ;;  %v370_v3 = vand.u32 15, %v8299_v2  ;;  %v8303_v4 = vadd.s32 16, %v8299_v2  ;;  %v8306_v5 = vadd.s32 32, %v8299_v2  ;;  %v8310_v7 = vadd.s32 48, %v8299_v2  ;;  %6361 = vmatpush3.bf16.msra.mxu1 %v7758_v13  ;;  %6226 = vmatprep.subr.bf16.mxu0 %v7759_v14  ;;  %v7766_v25 = vld [vmem:[#allocation6 + $0x10] sm:$0xff]  }
  0x72   : > { %v8314_v12 = vadd.s32 64, %v8299_v2  ;;  %v8317_v15 = vadd.s32 80, %v8299_v2  ;;  %6362 = vmatprep.subr.bf16.mxu1 %v7760_v16  ;;  %v8322_v22 = vadd.s32 96, %v8299_v2  ;;  %v7767_v27 = vld [vmem:[#allocation6 + $0x118] sm:$0xff]   ;;  %v7771_v32 = vld [vmem:[#allocation6 + $0x120] sm:$0xff]   ;;  %v8327_v34 = vadd.s32 112, %v8299_v2 }
  0x73   : > { %v384_v6 = vand.u32 15, %v8303_v4  ;;  %v398_v9 = vand.u32 15, %v8306_v5  ;;  %v412_v17 = vand.u32 15, %v8310_v7  ;;  %v7768_v29 = vld [vmem:[#allocation6 + $0x58] sm:$0xff]   ;;  %v7772_v33 = vld [vmem:[#allocation6 + $0x60] sm:$0xff]   ;;  %v8330_v36 = vadd.s32 128, %v8299_v2 }
  0x74   : > { %v426_v19 = vand.u32 15, %v8314_v12  ;;  %6227 = vmatpush3.bf16.msra.mxu0 %v7761_v18  ;;  %v440_v26 = vand.u32 15, %v8317_v15  ;;  %v7769_v30 = vld [vmem:[#allocation6 + $0xd8] sm:$0xff]   ;;  %v7773_v35 = vld [vmem:[#allocation6 + $0xe0] sm:$0xff]   ;;  %v7775_v39 = vld [vmem:[#allocation6 + $0x128] sm:$0xff]   ;;  %v8335_v46 = vadd.s32 144, %v8299_v2 }
  0x75   : > { %6363 = vmatpush3.bf16.msra.mxu1 %v7762_v20  ;;  %6228 = vmatprep.subr.bf16.mxu0 %v7763_v21  ;;  %v7770_v31 = vld [vmem:[#allocation6 + $0x18] sm:$0xff]   ;;  %v7774_v37 = vld [vmem:[#allocation6 + $0x20] sm:$0xff]   ;;  %v7776_v41 = vld [vmem:[#allocation6 + $0x68] sm:$0xff]   ;;  %v8338_v48 = vadd.s32 160, %v8299_v2  ;;  %vm11094_vm0 = vcmp.lt.s32.totalorder %v8299_v2, 1  ;;  %vm7680_vm1 = vcmp.ne.s32.totalorder %v370_v3, 0 }
  0x76   : > { %6364 = vmatprep.subr.bf16.mxu1 %v7764_v23  ;;  %v7777_v42 = vld [vmem:[#allocation6 + $0xe8] sm:$0xff]   ;;  %v7779_v44 = vld [vmem:[#allocation6 + $0x130] sm:$0xff]   ;;  %v7783_v51 = vld [vmem:[#allocation6 + $0x138] sm:$0xff]   ;;  %vm11081_vm2 = vcmp.lt.s32.totalorder %v8299_v2, 7  ;;  %v11241_v14 = vmov 0  ;;  %vm7681_vm5 = vcmp.ne.s32.totalorder %v384_v6, 0 }
  0x77   : > { %v7778_v43 = vld [vmem:[#allocation6 + $0x28] sm:$0xff]   ;;  %v7780_v45 = vld [vmem:[#allocation6 + $0x70] sm:$0xff]   ;;  %v7784_v53 = vld [vmem:[#allocation6 + $0x78] sm:$0xff]   ;;  %vm7682_vm7 = vcmp.ne.s32.totalorder %v398_v9, 0  ;;  %vm8443_vm8 = vcmp.ne.s32.totalorder %v412_v17, 0  ;;  %v11253_v5 = vmov 0 }
  0x78   : > { %6229 = vmatpush3.bf16.msra.mxu0 %v7765_v24  ;;  %v7781_v47 = vld [vmem:[#allocation6 + $0xf0] sm:$0xff]   ;;  %v7785_v54 = vld [vmem:[#allocation6 + $0xf8] sm:$0xff]   ;;  %v8343_v56 = vld [vmem:[%s8288_s21] sm:$0xff]  ;;  %vm8512_vm10 = vcmp.ne.s32.totalorder %v426_v19, 0  ;;  %vm8579_vm12 = vcmp.ne.s32.totalorder %v440_v26, 0  ;;  %s7990_s11 = sshll.u32 %s8067_s20, 4  ;;  %s7991_s11 = int_to_ptr.vmem [resolvable:$false] %s7990_s11 }
  0x79   : > { %6365 = vmatpush3.bf16.msra.mxu1 %v7766_v25  ;;  %6230 = vmatprep.subr.bf16.mxu0 %v7767_v27  ;;  %v7782_v49 = vld [vmem:[#allocation6 + $0x30] sm:$0xff]   ;;  %v7786_v55 = vld [vmem:[#allocation6 + $0x38] sm:$0xff]   ;;  %v8346_v57 = vld [vmem:[%s8288_s21 + $0x8] sm:$0xff]  ;;  %v878_v60 = vrot.slane %v8343_v56, 7  ;;  %s7992_s22 = scalar_lea.vmem %s7991_s11, 8192  ;;  %p7993_p7 = scmp.lt.s32.totalorder %s10977_s29, %s7991_s11 }
  0x7a   : > { %6366 = vmatprep.subr.bf16.mxu1 %v7768_v29  ;;  %v8349_v58 = vld [vmem:[%s8288_s21 + $0xf8] sm:$0xff]  ;;  %v846_v59 = vpack.c.bf16 %v8346_v57, %v8343_v56  ;;  %v879_v61 = vrot.slane %v8346_v57, 7  ;;  %v7787_v62 = vld [vmem:[#allocation6 + $0x140] sm:$0xff]   ;;  %v8360_v0 = vld [vmem:[%s8288_s21 + $0x10] sm:$0xff] }
  0x7b   : > { %v11037_v63 = vrot.slane %v8349_v58, 7  ;;  %v817_v8 = vld [vmem:[%s8288_s21 + $0x18] sm:$0xff]  ;;  %v880_v11 = vrot.slane %v8360_v0, 7  ;;  %vm8372_vm4 = vmpackc.low %vm11086_vm3, %vm7680_vm1  ;;  %v11039_v18 = vrot.slane %v8360_v0, 1  ;;  %v8382_v23 = vld [vmem:[%s8288_s21 + $0x20] sm:$0xff] }
  0x7c   : > { %6231 = vmatpush3.bf16.msra.mxu0 %v7769_v30  ;;  %1587 = vmatprep.mubr.bf16.mxu0 %v846_v59  ;;  %v941_v10 = vsel %vm11094_vm0, %v878_v60, %v879_v61  ;;  %v881_v13 = vrot.slane %v817_v8, 7  ;;  %v11242_v14 = vsel %vm8372_vm4, 4294967295, %v11241_v14  ;;  %v8378_v16 = vpack.c.bf16 %v817_v8, %v8360_v0  ;;  %v7788_v24 = vld [vmem:[#allocation6 + $0x148] sm:$0xff]   ;;  %vm8410_vm6 = vmpackc.low %vm11086_vm3, %vm7681_vm5  ;;  %v7798_v28 = vld [vmem:[#allocation6 + $0x178] sm:$0xff]  }
  0x7d   : > { %6367 = vmatpush3.bf16.msra.mxu1 %v7770_v31  ;;  %6232 = vmatprep.subr.bf16.mxu0 %v7771_v32  ;;  %v942_v3 = vsel %vm11094_vm0, %v11037_v63, %v878_v60  ;;  %11243 = vst [vmem:[#allocation14_spill] sm:$0xff] %v11242_v14  ;;  %v1074_v20 = vrot.slane %v817_v8, 1  ;;  %v11038_v27 = vrot.slane %v8382_v23, 1  ;;  %v940_v30 = vsel %vm11094_vm0, %v879_v61, %v880_v11  ;;  %v8403_v32 = vld [vmem:[%s8288_s21 + $0x28] sm:$0xff]  ;;  %vm8454_vm9 = vmpackc.low %vm11086_vm3, %vm7682_vm7  ;;  %v8517_v63 = vld [vmem:[%s8288_s21 + $0x78] sm:$0xff] }
  0x7e   : > { %6368 = vmatprep.subr.bf16.mxu1 %v7772_v33  ;;  %11244 = vst [vmem:[#allocation15_spill] sm:$0xff] %v8378_v16  ;;  %v5490_v21 = vpack.c.bf16 %v941_v10, %v942_v3  ;;  %v939_v29 = vsel %vm11094_vm0, %v880_v11, %v881_v13  ;;  %v8418_v4 = vpack.c.bf16 %v8403_v32, %v8382_v23  ;;  %v882_v6 = vrot.slane %v8382_v23, 7  ;;  %v8451_v60 = vld [vmem:[%s8288_s21 + $0x48] sm:$0xff]  ;;  %v7795_v11 = vld [vmem:[#allocation6 + $0x90] sm:$0xff]   ;;  %vm8533_vm11 = vmpackc.low %vm11086_vm3, %vm8443_vm8 }
  0x7f   : > { %v1132_v25 = vsel %vm11081_vm2, %v11039_v18, %v1074_v20  ;;  %v1131_v31 = vsel %vm11081_vm2, %v1074_v20, %v11038_v27  ;;  %v11254_v5 = vsel %vm8454_vm9, 4294967295, %v11253_v5  ;;  %v7794_v8 = vld [vmem:[#allocation6 + $0x168] sm:$0xff]   ;;  %v8473_v10 = vadd.s32 176, %v8299_v2  ;;  %v7803_v27 = vld [vmem:[#allocation6 + $0x1c0] sm:$0xff]   ;;  %vm8619_vm13 = vmpackc.low %vm11086_vm3, %vm8512_vm10 }
  0x80   : > { %6233 = vmatpush3.bf16.msra.mxu0 %v7773_v35  ;;  %v8405_v33 = vpack.c.bf16 %v1131_v31, %v1132_v25  ;;  %v7789_v35 = vld [vmem:[#allocation6 + $0x150] sm:$0xff]   ;;  %11249 = vst [vmem:[#allocation18_spill] sm:$0xff] %v8418_v4  ;;  %11255 = vst [vmem:[#allocation20_spill] sm:$0xff] %v11254_v5  ;;  %v887_v20 = vrot.slane %v8451_v60, 7  ;;  %v8493_v31 = vld [vmem:[%s8288_s21 + $0x68] sm:$0xff]  ;;  %v11278_v14 = vrot.slane %v8360_v0, 1 }
  0x81   : > { %6369 = vmatpush3.bf16.msra.mxu1 %v7774_v37  ;;  %6234 = vmatprep.subr.bf16.mxu0 %v7775_v39  ;;  %v8407_v37 = vpack.c.bf16 %v939_v29, %v940_v30  ;;  %v11246_v39 = vmov 0  ;;  %v8487_v29 = vld [vmem:[%s8288_s21 + $0x58] sm:$0xff]  ;;  %v8490_v30 = vld [vmem:[%s8288_s21 + $0x60] sm:$0xff]  ;;  %v11285_v0 = vrot.slane %v8382_v23, 1  ;;  %v8703_v5 = vld [vmem:[%s8288_s21 + $0xb0] sm:$0xff] }
  0x82   : > { %6370 = vmatprep.subr.bf16.mxu1 %v7776_v41  ;;  %v11247_v39 = vsel %vm8410_vm6, 4294967295, %v11246_v39  ;;  %v883_v41 = vrot.slane %v8403_v32, 7  ;;  %v889_v12 = vrot.slane %v8487_v29, 7  ;;  %v890_v38 = vrot.slane %v8490_v30, 7  ;;  %vm8724_vm15 = vmpackc.low %vm11086_vm3, %vm8579_vm12 }
  0x83   : > { %11245 = vst [vmem:[#allocation16_spill] sm:$0xff] %v8407_v37  ;;  %11248 = vst [vmem:[#allocation17_spill] sm:$0xff] %v11247_v39  ;;  %v8821_v39 = vld [vmem:[%s8288_s21 + $0xd8] sm:$0xff] }
  0x84   : > { %6235 = vmatpush3.bf16.msra.mxu0 %v7777_v42  ;;  %v7790_v42 = vld [vmem:[#allocation6 + $0x158] sm:$0xff]  }
  0x85   : > { %6371 = vmatpush3.bf16.msra.mxu1 %v7778_v43  ;;  %6236 = vmatprep.subr.bf16.mxu0 %v7779_v44  ;;  %v7791_v43 = vld [vmem:[#allocation6 + $0x80] sm:$0xff]   ;;  %v937_v44 = vsel %vm11094_vm0, %v882_v6, %v883_v41 }
  0x86   : > { %6372 = vmatprep.subr.bf16.mxu1 %v7780_v45  ;;  %v938_v45 = vsel %vm11094_vm0, %v881_v13, %v882_v6  ;;  %v8476_v13 = vadd.s32 192, %v8299_v2 }
  0x88   : > { %6237 = vmatpush3.bf16.msra.mxu0 %v7781_v47  ;;  %v8432_v47 = vld [vmem:[%s8288_s21 + $0x30] sm:$0xff] }
  0x89   : > { %6373 = vmatpush3.bf16.msra.mxu1 %v7782_v49  ;;  %6238 = vmatprep.subr.bf16.mxu0 %v7783_v51  ;;  %v8437_v49 = vld [vmem:[%s8288_s21 + $0x38] sm:$0xff]  ;;  %v7792_v51 = vld [vmem:[#allocation6 + $0x160] sm:$0xff]   ;;  %v884_v9 = vrot.slane %v8432_v47, 7 }
  0x8a   : > { %6374 = vmatprep.subr.bf16.mxu1 %v7784_v53  ;;  %v7793_v53 = vld [vmem:[#allocation6 + $0x88] sm:$0xff]   ;;  %v8463_v7 = vpack.c.bf16 %v8437_v49, %v8432_v47  ;;  %v885_v17 = vrot.slane %v8437_v49, 7 }
  0x8c   : > { %6239 = vmatpush3.bf16.msra.mxu0 %v7785_v54  ;;  %v8439_v54 = vpack.c.bf16 %v937_v44, %v938_v45  ;;  %11256 = vst [vmem:[#allocation21_spill] sm:$0xff] %v8463_v7  ;;  %v935_v6 = vsel %vm11094_vm0, %v884_v9, %v885_v17  ;;  %v930_v45 = vsel %vm11094_vm0, %v889_v12, %v890_v38 }
  0x8d   : > { %6375 = vmatpush3.bf16.msra.mxu1 %v7786_v55  ;;  %7040 = vmatprep.subr.bf16.mxu0 %v7787_v62  ;;  %v8558_v55 = vpack.c.bf16 %v8493_v31, %v8490_v30 }
  0x8e   : > { %7088 = vmatprep.subr.bf16.mxu1 %v7791_v43  ;;  %11250 = vst [vmem:[#allocation19_spill] sm:$0xff] %v8439_v54 }
  0x8f   : > { %5491 = vmatmul.mubr.msk.bf16.vlgmr.msra.gmra.mrb[0].mxu0 %vm8372_vm4, %v5490_v21  ;;  %11266 = vst [vmem:[#allocation27_spill] sm:$0xff] %v8558_v55 }
  0x90   : > { %2054 = vmatmul.mubr.bf16.vlgmr.msra.gmra.mrb[0].mxu1 %v11035_v1  ;;  %7041 = vmatpush3.bf16.msra.mxu0 %v7787_v62  ;;  %v8470_v62 = vld [vmem:[%s8288_s21 + $0x50] sm:$0xff]  ;;  %v8634_v1 = vadd.s32 240, %v8299_v2 }
  0x91   : > { %2061 = vmatprep.mubr.bf16.mxu1 %v846_v59  ;;  %1595 = vmatprep.mubr.bf16.mxu0 %v8378_v16  ;;  %v8448_v59 = vld [vmem:[%s8288_s21 + $0x40] sm:$0xff]  ;;  %v888_v40 = vrot.slane %v8470_v62, 7 }
  0x92   : > { %7042 = vmatprep.subr.bf16.mxu0 %v7788_v24  ;;  %7089 = vmatpush3.bf16.msra.mxu1 %v7791_v43  ;;  %v886_v3 = vrot.slane %v8448_v59, 7  ;;  %v8502_v43 = vld [vmem:[%s8288_s21 + $0x70] sm:$0xff]  ;;  %v8506_v44 = vpack.c.bf16 %v8451_v60, %v8448_v59 }
  0x93   : > { %7090 = vmatprep.subr.bf16.mxu1 %v7793_v53 }
  0x94   : > { %7043 = vmatpush3.bf16.msra.mxu0 %v7788_v24  ;;  %11257 = vst [vmem:[#allocation22_spill] sm:$0xff] %v8506_v44  ;;  %v933_v52 = vsel %vm11094_vm0, %v886_v3, %v887_v20  ;;  %v934_v50 = vsel %vm11094_vm0, %v885_v17, %v886_v3  ;;  %v11040_v3 = vrot.slane %v8517_v63, 7  ;;  %v931_v17 = vsel %vm11094_vm0, %v888_v40, %v889_v12  ;;  %v7800_v24 = vld [vmem:[#allocation6 + $0xa8] sm:$0xff]  }
  0x95   : > { %7044 = vmatprep.subr.bf16.mxu0 %v7789_v35  ;;  %v8599_v12 = vadd.s32 224, %v8299_v2 }
  0x96   : > { %7091 = vmatpush3.bf16.msra.mxu1 %v7793_v53  ;;  %v891_v53 = vrot.slane %v8493_v31, 7 }
  0x97   : > { %5495 = vmatmul.mubr.msk.bf16.gmra.mrb[4].mxu0 %vm8410_vm6, %v8407_v37  ;;  %7092 = vmatprep.subr.bf16.mxu1 %v7795_v11 }
  0x98   : > { %5619 = vmatmul.mubr.msk.bf16.gmra.mrb[4].mxu1 %vm8372_vm4, %v5490_v21  ;;  %1603 = vmatprep.mubr.bf16.mxu0 %v8418_v4  ;;  %v8595_v21 = vld [vmem:[%s8288_s21 + $0x90] sm:$0xff] }
  0x99   : > { %2069 = vmatprep.mubr.bf16.mxu1 %v8378_v16  ;;  %7045 = vmatpush3.bf16.msra.mxu0 %v7789_v35  ;;  %v11261_v35 = vmov 0 }
  0x9a   : > { %7046 = vmatprep.subr.bf16.mxu0 %v7790_v42  ;;  %7093 = vmatpush3.bf16.msra.mxu1 %v7795_v11  ;;  %v11262_v35 = vsel %vm8533_vm11, 4294967295, %v11261_v35  ;;  %v892_v11 = vrot.slane %v8502_v43, 7 }
  0x9b   : > { %11263 = vst [vmem:[#allocation24_spill] sm:$0xff] %v11262_v35 }
  0x9c   : > { %v927_v25 = vsel %vm11094_vm0, %v892_v11, %v11040_v3  ;;  %v928_v61 = vsel %vm11094_vm0, %v891_v53, %v892_v11  ;;  %v8605_v3 = vpack.c.bf16 %v8517_v63, %v8502_v43  ;;  %v8610_v11 = vld [vmem:[%s8288_s21 + $0x98] sm:$0xff] }
  0x9d   : > { %7047 = vmatpush3.bf16.msra.mxu0 %v7790_v42  ;;  %v936_v42 = vsel %vm11094_vm0, %v883_v41, %v884_v9  ;;  %v7797_v9 = vld [vmem:[#allocation6 + $0x98] sm:$0xff]   ;;  %v7799_v41 = vld [vmem:[#allocation6 + $0xa0] sm:$0xff]  }
  0x9e   : > { %7048 = vmatprep.subr.bf16.mxu0 %v7792_v51  ;;  %v8526_v19 = vpack.c.bf16 %v935_v6, %v936_v42  ;;  %7094 = vmatprep.subr.bf16.mxu1 %v7797_v9  ;;  %v8545_v6 = vpack.c.bf16 %v933_v52, %v934_v50  ;;  %v8549_v42 = vpack.c.bf16 %v8487_v29, %v8470_v62  ;;  %v8561_v50 = vld [vmem:[%s8288_s21 + $0x80] sm:$0xff]  ;;  %v8564_v52 = vld [vmem:[%s8288_s21 + $0x88] sm:$0xff] }
  0x9f   : > { %5499 = vmatmul.mubr.msk.bf16.gmra.mrb[8].mxu0 %vm8454_vm9, %v8439_v54  ;;  %7095 = vmatpush3.bf16.msra.mxu1 %v7797_v9  ;;  %11270 = vst [vmem:[#allocation29_spill] sm:$0xff] %v8605_v3  ;;  %v11276_v26 = vrot.slane %v8564_v52, 7  ;;  %v11277_v15 = vrot.slane %v8561_v50, 7  ;;  %v8739_v9 = vadd.s32 72, %v8299_v2 }
  0xa0   : > { %5623 = vmatmul.mubr.msk.bf16.gmra.mrb[8].mxu1 %vm8410_vm6, %v8407_v37  ;;  %1611 = vmatprep.mubr.bf16.mxu0 %v8463_v7  ;;  %11260 = vst [vmem:[#allocation23_spill] sm:$0xff] %v8526_v19  ;;  %11264 = vst [vmem:[#allocation25_spill] sm:$0xff] %v8545_v6  ;;  %v11319_v37 = vrot.slane %v8502_v43, 1 }
  0xa1   : > { %2077 = vmatprep.mubr.bf16.mxu1 %v8418_v4  ;;  %7049 = vmatpush3.bf16.msra.mxu0 %v7792_v51  ;;  %v7796_v51 = vld [vmem:[#allocation6 + $0x170] sm:$0xff]   ;;  %11265 = vst [vmem:[#allocation26_spill] sm:$0xff] %v8549_v42  ;;  %v11312_v4 = vand.u32 15, %v8327_v34  ;;  %v1098_v34 = vrot.slane %v8821_v39, 1 }
  0xa2   : > { %7050 = vmatprep.subr.bf16.mxu0 %v7794_v8  ;;  %7096 = vmatprep.subr.bf16.mxu1 %v7799_v41 }
  0xa3   : > { %7097 = vmatpush3.bf16.msra.mxu1 %v7799_v41  ;;  %v8626_v41 = vpack.c.bf16 %v927_v25, %v928_v61  ;;  %v8643_v61 = vsel %vm11094_vm0, %v11277_v15, %v11276_v26  ;;  %v11281_v25 = vrot.slane %v8343_v56, 1  ;;  %vm8816_vm1 = vcmp.ne.s32.totalorder %v11312_v4, 0 }
  0xa4   : > { %7098 = vmatprep.subr.bf16.mxu1 %v7800_v24  ;;  %vm8976_vm10 = vmpackc.low %vm11086_vm3, %vm8816_vm1 }
  0xa5   : > { %7051 = vmatpush3.bf16.msra.mxu0 %v7794_v8  ;;  %v932_v8 = vsel %vm11094_vm0, %v887_v20, %v888_v40  ;;  %v929_v40 = vsel %vm11094_vm0, %v890_v38, %v891_v53  ;;  %v8574_v20 = vadd.s32 208, %v8299_v2  ;;  %v8647_v53 = vld [vmem:[%s8288_s21 + $0xa0] sm:$0xff] }
  0xa6   : > { %7052 = vmatprep.subr.bf16.mxu0 %v7796_v51  ;;  %v8601_v18 = vpack.c.bf16 %v931_v17, %v932_v8  ;;  %v8612_v38 = vpack.c.bf16 %v929_v40, %v930_v45  ;;  %v7801_v17 = vld [vmem:[#allocation6 + $0xb0] sm:$0xff]   ;;  %v11272_v8 = vmov 0  ;;  %v8630_v45 = vpack.c.bf16 %v8564_v52, %v8561_v50  ;;  %v7802_v40 = vld [vmem:[#allocation6 + $0xb8] sm:$0xff]  }
  0xa7   : > { %5503 = vmatmul.mubr.msk.bf16.gmra.mrb[12].mxu0 %vm8533_vm11, %v8526_v19  ;;  %v11273_v8 = vsel %vm8619_vm13, 4294967295, %v11272_v8  ;;  %7099 = vmatpush3.bf16.msra.mxu1 %v7800_v24  ;;  %v11282_v24 = vrot.slane %v8432_v47, 1 }
  0xa8   : > { %5627 = vmatmul.mubr.msk.bf16.gmra.mrb[12].mxu1 %vm8454_vm9, %v8439_v54  ;;  %1619 = vmatprep.mubr.bf16.mxu0 %v8506_v44  ;;  %11269 = vst [vmem:[#allocation28_spill] sm:$0xff] %v8601_v18  ;;  %11271 = vst [vmem:[#allocation30_spill] sm:$0xff] %v8612_v38  ;;  %v11299_v54 = vrot.slane %v8448_v59, 1 }
  0xa9   : > { %2085 = vmatprep.mubr.bf16.mxu1 %v8463_v7  ;;  %7053 = vmatpush3.bf16.msra.mxu0 %v7796_v51  ;;  %11274 = vst [vmem:[#allocation31_spill] sm:$0xff] %v11273_v8  ;;  %11275 = vst [vmem:[#allocation32_spill] sm:$0xff] %v8630_v45  ;;  %v11286_v7 = vand.u32 15, %v8322_v22  ;;  %v8713_v22 = vadd.s32 56, %v8299_v2 }
  0xaa   : > { %7054 = vmatprep.subr.bf16.mxu0 %v7798_v28  ;;  %7100 = vmatprep.subr.bf16.mxu1 %v7801_v17 }
  0xab   : > { %vm8697_vm14 = vcmp.ne.s32.totalorder %v11286_v7, 0  ;;  %7101 = vmatpush3.bf16.msra.mxu1 %v7801_v17  ;;  %v11289_v7 = vrot.slane %v8448_v59, 1  ;;  %v8730_v17 = vld [vmem:[%s8288_s21 + $0xc0] sm:$0xff] }
  0xac   : > { %7102 = vmatprep.subr.bf16.mxu1 %v7802_v40  ;;  %v1095_v59 = vrot.slane %v8730_v17, 1  ;;  %vm8864_vm5 = vmpackc.low %vm11086_vm3, %vm8697_vm14 }
  0xad   : > { %7055 = vmatpush3.bf16.msra.mxu0 %v7798_v28  ;;  %v8650_v28 = vadd.s32 8, %v8299_v2 }
  0xae   : > { %6496 = vmatprep.subr.bf16.mxu0 %v7803_v27  ;;  %v8666_v27 = vadd.s32 24, %v8299_v2 }
  0xaf   : > { %5507 = vmatmul.mubr.msk.bf16.gmra.mrb[16].mxu0 %vm8619_vm13, %v8545_v6  ;;  %7103 = vmatpush3.bf16.msra.mxu1 %v7802_v40  ;;  %v11307_v40 = vrot.slane %v8502_v43, 1 }
  0xb0   : > { %5631 = vmatmul.mubr.msk.bf16.gmra.mrb[16].mxu1 %vm8533_vm11, %v8526_v19  ;;  %1627 = vmatprep.mubr.bf16.mxu0 %v8549_v42 }
  0xb1   : > { %2093 = vmatprep.mubr.bf16.mxu1 %v8506_v44  ;;  %v11279_v44 = vrot.slane %v8346_v57, 1  ;;  %v8675_v57 = vadd.s32 40, %v8299_v2 }
  0xb3   : > { %v1133_v15 = vsel %vm11081_vm2, %v11279_v44, %v11278_v14  ;;  %v11280_v26 = vmov %v11279_v44  ;;  %v11283_v44 = vrot.slane %v8403_v32, 1  ;;  %v8709_v32 = vld [vmem:[%s8288_s21 + $0xb8] sm:$0xff] }
  0xb4   : > { %v1134_v35 = vsel %vm11081_vm2, %v11281_v25, %v11280_v26  ;;  %v8685_v26 = vld [vmem:[%s8288_s21 + $0xa8] sm:$0xff] }
  0xb5   : > { %v8672_v14 = vpack.c.bf16 %v1133_v15, %v1134_v35  ;;  %v1129_v25 = vsel %vm11081_vm2, %v11283_v44, %v11282_v24  ;;  %v11284_v15 = vmov %v11283_v44  ;;  %v11295_v44 = vrot.slane %v8432_v47, 1 }
  0xb6   : > { %v1130_v19 = vsel %vm11081_vm2, %v11285_v0, %v11284_v15  ;;  %v11290_v0 = vrot.slane %v8437_v49, 1  ;;  %v11296_v49 = vrot.slane %v8470_v62, 1  ;;  %v11297_v47 = vrot.slane %v8451_v60, 1 }
  0xb7   : > { %v8706_v51 = vpack.c.bf16 %v1129_v25, %v1130_v19  ;;  %v11291_v19 = vmov 0  ;;  %5511 = vmatmul.mubr.msk.bf16.gmra.mrb[20].mxu0 %vm8724_vm15, %v8601_v18 }
  0xb8   : > { %v1127_v15 = vsel %vm11081_vm2, %v11290_v0, %v11289_v7  ;;  %v11292_v19 = vsel %vm8724_vm15, 4294967295, %v11291_v19  ;;  %v11294_v35 = vmov %v11290_v0  ;;  %5635 = vmatmul.mubr.msk.bf16.gmra.mrb[20].mxu1 %vm8619_vm13, %v8545_v6  ;;  %v8745_v0 = vld [vmem:[%s8288_s21 + $0xc8] sm:$0xff]  ;;  %v11301_v6 = vrot.slane %v8490_v30, 1  ;;  %1635 = vmatprep.mubr.bf16.mxu0 %v8558_v55 }
  0xb9   : > { %11293 = vst [vmem:[#allocation33_spill] sm:$0xff] %v11292_v19  ;;  %v1128_v7 = vsel %vm11081_vm2, %v11295_v44, %v11294_v35  ;;  %v1125_v35 = vsel %vm11081_vm2, %v11297_v47, %v11296_v49  ;;  %v11298_v44 = vmov %v11297_v47  ;;  %2101 = vmatprep.mubr.bf16.mxu1 %v8549_v42  ;;  %v11302_v49 = vrot.slane %v8487_v29, 1  ;;  %v8795_v29 = vld [vmem:[#allocation6 + $0x200] sm:$0xff]  }
  0xba   : > { %v8748_v23 = vpack.c.bf16 %v1127_v15, %v1128_v7  ;;  %v1126_v8 = vsel %vm11081_vm2, %v11299_v54, %v11298_v44  ;;  %v8767_v7 = vadd.s32 88, %v8299_v2  ;;  %v8777_v54 = vld [vmem:[%s8288_s21 + $0xd0] sm:$0xff]  ;;  %v8786_v44 = vadd.s32 104, %v8299_v2  ;;  %7136 = vmatprep.subr.bf16.mxu1 %v8795_v29 }
  0xbb   : > { %v8764_v15 = vpack.c.bf16 %v1125_v35, %v1126_v8  ;;  %v1123_v60 = vsel %vm11081_vm2, %v11302_v49, %v11301_v6  ;;  %v11303_v47 = vmov %v11302_v49  ;;  %v11304_v8 = vrot.slane %v8470_v62, 1 }
  0xbc   : > { %11300 = vst [vmem:[#allocation34_spill] sm:$0xff] %v8767_v7  ;;  %11305 = vst [vmem:[#allocation35_spill] sm:$0xff] %v8786_v44  ;;  %v1096_v6 = vrot.slane %v8745_v0, 1  ;;  %v11310_v49 = vrot.slane %v8490_v30, 1  ;;  %v11316_v30 = vrot.slane %v8561_v50, 1  ;;  %v8969_v7 = vadd.s32 216, %v8299_v2 }
  0xbd   : > { %v1124_v35 = vsel %vm11081_vm2, %v11304_v8, %v11303_v47  ;;  %v11308_v47 = vrot.slane %v8493_v31, 1  ;;  %v11317_v31 = vrot.slane %v8517_v63, 1  ;;  %v897_v62 = vrot.slane %v8610_v11, 7 }
  0xbe   : > { %v8793_v25 = vpack.c.bf16 %v1123_v60, %v1124_v35  ;;  %v8812_v35 = vadd.s32 120, %v8299_v2 }
  0xbf   : > { %v1121_v8 = vsel %vm11081_vm2, %v11308_v47, %v11307_v40  ;;  %v11309_v42 = vmov %v11308_v47  ;;  %v1097_v40 = vrot.slane %v8777_v54, 1  ;;  %5515 = vmatmul.mubr.msk.bf16.gmra.mrb[24].mxu0 %vm8864_vm5, %v8612_v38 }
  0xc0   : > { %11306 = vst [vmem:[#allocation36_spill] sm:$0xff] %v8793_v25  ;;  %v1122_v60 = vsel %vm11081_vm2, %v11310_v49, %v11309_v42  ;;  %11311 = vst [vmem:[#allocation37_spill] sm:$0xff] %v8812_v35  ;;  %v1119_v42 = vsel %vm11081_vm2, %v11317_v31, %v11316_v30  ;;  %v11318_v49 = vmov %v11317_v31  ;;  %v8847_v30 = vadd.s32 136, %v8299_v2  ;;  %5639 = vmatmul.mubr.msk.bf16.gmra.mrb[24].mxu1 %vm8724_vm15, %v8601_v18 }
  0xc1   : > { %v8824_v47 = vpack.c.bf16 %v1121_v8, %v1122_v60  ;;  %v1120_v8 = vsel %vm11081_vm2, %v11319_v37, %v11318_v49  ;;  %v8842_v60 = vld [vmem:[%s8288_s21 + $0xe0] sm:$0xff]  ;;  %v11322_v31 = vrot.slane %v8595_v21, 1  ;;  %v11325_v35 = vrot.slane %v8561_v50, 1  ;;  %2109 = vmatprep.mubr.bf16.mxu1 %v8558_v55  ;;  %v8895_v55 = vld [vmem:[%s8288_s21 + $0xe8] sm:$0xff]  ;;  %1643 = vmatprep.mubr.bf16.mxu0 %v8605_v3 }
  0xc2   : > { %v8844_v16 = vpack.c.bf16 %v1119_v42, %v1120_v8  ;;  %11321 = vst [vmem:[#allocation40_spill] sm:$0xff] %v8847_v30  ;;  %v11326_v42 = vmov 0  ;;  %v8875_v8 = vadd.s32 152, %v8299_v2  ;;  %v11334_v18 = vrot.slane %v8595_v21, 1 }
  0xc3   : > { %11315 = vst [vmem:[#allocation38_spill] sm:$0xff] %v8824_v47  ;;  %v11323_v47 = vrot.slane %v8564_v52, 1  ;;  %v11327_v42 = vsel %vm8864_vm5, 4294967295, %v11326_v42  ;;  %v11352_v25 = vrot.slane %v8703_v5, 1 }
  0xc4   : > { %11320 = vst [vmem:[#allocation39_spill] sm:$0xff] %v8844_v16  ;;  %11328 = vst [vmem:[#allocation41_spill] sm:$0xff] %v11327_v42  ;;  %v11337_v16 = vrot.slane %v8703_v5, 1 }
  0xc5   : > { %v1117_v4 = vsel %vm11081_vm2, %v11323_v47, %v11322_v31  ;;  %v11324_v43 = vmov %v11323_v47  ;;  %v1099_v47 = vrot.slane %v8842_v60, 1  ;;  %11330 = vst [vmem:[#allocation43_spill] sm:$0xff] %v8875_v8  ;;  %v11332_v31 = vrot.slane %v8610_v11, 1 }
  0xc6   : > { %v1118_v37 = vsel %vm11081_vm2, %v11325_v35, %v11324_v43  ;;  %v11331_v35 = vrot.slane %v8647_v53, 1  ;;  %v11345_v8 = vrot.slane %v8709_v32, 1 }
  0xc7   : > { %v8872_v49 = vpack.c.bf16 %v1117_v4, %v1118_v37  ;;  %v11333_v19 = vmov %v11332_v31  ;;  %v8892_v37 = vadd.s32 168, %v8299_v2  ;;  %5519 = vmatmul.mubr.msk.bf16.gmra.mrb[28].mxu0 %vm8976_vm10, %v8626_v41 }
  0xc8   : > { %v1115_v43 = vsel %vm11081_vm2, %v11332_v31, %v11331_v35  ;;  %v1116_v4 = vsel %vm11081_vm2, %v11334_v18, %v11333_v19  ;;  %v11338_v35 = vrot.slane %v8685_v26, 1  ;;  %v11340_v18 = vrot.slane %v8647_v53, 1  ;;  %5643 = vmatmul.mubr.msk.bf16.gmra.mrb[28].mxu1 %vm8864_vm5, %v8612_v38  ;;  %1651 = vmatprep.mubr.bf16.mxu0 %v8630_v45 }
  0xc9   : > { %11329 = vst [vmem:[#allocation42_spill] sm:$0xff] %v8872_v49  ;;  %11335 = vst [vmem:[#allocation44_spill] sm:$0xff] %v8892_v37  ;;  %v8898_v49 = vpack.c.bf16 %v1115_v43, %v1116_v4  ;;  %v1100_v43 = vrot.slane %v8895_v55, 1  ;;  %v8917_v4 = vld [vmem:[%s8288_s21 + $0xf0] sm:$0xff]  ;;  %v1111_v24 = vsel %vm11081_vm2, %v11345_v8, %v1095_v59  ;;  %v11351_v37 = vmov %v11345_v8  ;;  %2117 = vmatprep.mubr.bf16.mxu1 %v8605_v3 }
  0xca   : > { %v1113_v31 = vsel %vm11081_vm2, %v11338_v35, %v11337_v16  ;;  %v11339_v30 = vmov %v11338_v35  ;;  %v11342_v16 = vand.u32 15, %v8330_v36  ;;  %v1112_v8 = vsel %vm11081_vm2, %v11352_v25, %v11351_v37 }
  0xcb   : > { %11336 = vst [vmem:[#allocation45_spill] sm:$0xff] %v8898_v49  ;;  %v1114_v19 = vsel %vm11081_vm2, %v11340_v18, %v11339_v30  ;;  %v1101_v30 = vrot.slane %v8917_v4, 1  ;;  %v8931_v18 = vadd.s32 184, %v8299_v2  ;;  %v8959_v44 = vpack.c.bf16 %v1111_v24, %v1112_v8 }
  0xcc   : > { %v8920_v49 = vpack.c.bf16 %v1113_v31, %v1114_v19  ;;  %vm8925_vm7 = vcmp.ne.s32.totalorder %v11342_v16, 0  ;;  %v11346_v31 = vrot.slane %v8561_v50, 7  ;;  %v11347_v19 = vrot.slane %v8517_v63, 7 }
  0xcd   : > { %v11348_v16 = vand.u32 15, %v8335_v46  ;;  %v8956_v50 = vadd.s32 200, %v8299_v2  ;;  %v1109_v46 = vsel %vm11081_vm2, %v1096_v6, %v1097_v40  ;;  %v1107_v25 = vsel %vm11081_vm2, %v1098_v34, %v1099_v47  ;;  %vm9034_vm14 = vmpackc.low %vm11086_vm3, %vm8925_vm7 }
  0xce   : > { %11341 = vst [vmem:[#allocation46_spill] sm:$0xff] %v8920_v49  ;;  %v926_v36 = vsel %vm11094_vm0, %v11347_v19, %v11346_v31  ;;  %v1110_v31 = vsel %vm11081_vm2, %v1095_v59, %v1096_v6  ;;  %v11353_v24 = vmov 0  ;;  %v896_v59 = vrot.slane %v8595_v21, 7 }
  0xcf   : > { %vm8945_vm8 = vcmp.ne.s32.totalorder %v11348_v16, 0  ;;  %v8966_v16 = vpack.c.bf16 %v1109_v46, %v1110_v31  ;;  %v11354_v24 = vsel %vm8976_vm10, 4294967295, %v11353_v24  ;;  %v1108_v6 = vsel %vm11081_vm2, %v1097_v40, %v1098_v34 }
  0xd0   : > { %11355 = vst [vmem:[#allocation47_spill] sm:$0xff] %v11354_v24  ;;  %v1105_v37 = vsel %vm11081_vm2, %v1100_v43, %v1101_v30  ;;  %v8991_v46 = vpack.c.bf16 %v1107_v25, %v1108_v6  ;;  %v8994_v31 = vadd.s32 232, %v8299_v2  ;;  %v1106_v19 = vsel %vm11081_vm2, %v1099_v47, %v1100_v43  ;;  %5647 = vmatmul.mubr.msk.bf16.gmra.mrb[32].mxu1 %vm8976_vm10, %v8626_v41  ;;  %vm9052_vm1 = vmpackc.low %vm11086_vm3, %vm8945_vm8 }
  0xd1   : > { %v8999_v63 = vadd.s32 248, %v8299_v2  ;;  %v1102_v40 = vrot.slane %v8349_v58, 1  ;;  %v898_v34 = vrot.slane %v8647_v53, 7  ;;  %v899_v25 = vrot.slane %v8685_v26, 7  ;;  %2125 = vmatprep.mubr.bf16.mxu1 %v8630_v45 }
  0xd2   : > { %v9007_v6 = vpack.c.bf16 %v1105_v37, %v1106_v19  ;;  %v11356_v3 = vrot.slane %v8343_v56, 1  ;;  %v9019_v38 = vpack.c.bf16 %v8643_v61, %v926_v36  ;;  %v11357_v19 = vand.u32 15, %v8338_v48 }
  0xd3   : > { %v1104_v43 = vsel %vm11081_vm2, %v1101_v30, %v1102_v40  ;;  %v900_v47 = vrot.slane %v8703_v5, 7  ;;  %v901_v30 = vrot.slane %v8709_v32, 7  ;;  %v11360_v56 = vmov 0 }
  0xd4   : > { %v1135_v42 = vsel %vm11081_vm2, %v1102_v40, %v11356_v3  ;;  %vm9023_vm12 = vcmp.ne.s32.totalorder %v11357_v19, 0  ;;  %v11361_v56 = vsel %vm9034_vm14, 4294967295, %v11360_v56  ;;  %v902_v3 = vrot.slane %v8730_v17, 7  ;;  %5523 = vmatmul.mubr.msk.bf16.gmra.mrb[32].mxu0 %vm9034_vm14, %v9019_v38 }
  0xd5   : > { %v9027_v8 = vpack.c.bf16 %v1135_v42, %v1104_v43  ;;  %11362 = vst [vmem:[#allocation48_spill] sm:$0xff] %v11361_v56  ;;  %v903_v48 = vrot.slane %v8745_v0, 7  ;;  %v904_v61 = vrot.slane %v8777_v54, 7  ;;  %v905_v42 = vrot.slane %v8821_v39, 7  ;;  %vm9083_vm8 = vmpackc.low %vm11086_vm3, %vm9023_vm12 }
  0xd6   : > { %v9047_v35 = vpack.c.bf16 %v8610_v11, %v8595_v21  ;;  %v11363_v36 = vmov 0  ;;  %v906_v40 = vrot.slane %v8842_v60, 7  ;;  %v923_v21 = vsel %vm11094_vm0, %v896_v59, %v897_v62 }
  0xd7   : > { %v11364_v36 = vsel %vm9052_vm1, 4294967295, %v11363_v36  ;;  %v11366_v11 = vrot.slane %v8564_v52, 7  ;;  %v11367_v19 = vand.u32 15, %v8473_v10  ;;  %v9078_v45 = vpack.c.bf16 %v8685_v26, %v8647_v53 }
  0xd8   : > { %11365 = vst [vmem:[#allocation49_spill] sm:$0xff] %v11364_v36  ;;  %1659 = vmatprep.mubr.bf16.mxu0 %v9047_v35  ;;  %5651 = vmatmul.mubr.msk.bf16.gmra.mrb[36].mxu1 %vm9034_vm14, %v9019_v38  ;;  %v11368_v52 = vmov 0  ;;  %v921_v10 = vsel %vm11094_vm0, %v898_v34, %v899_v25  ;;  %v922_v53 = vsel %vm11094_vm0, %v897_v62, %v898_v34  ;;  %v11371_v26 = vand.u32 15, %v8476_v13 }
  0xd9   : > { %v924_v49 = vsel %vm11094_vm0, %v11366_v11, %v896_v59  ;;  %vm7691_vm7 = vcmp.ne.s32.totalorder %v11367_v19, 0  ;;  %v11369_v52 = vsel %vm9083_vm8, 4294967295, %v11368_v52  ;;  %2133 = vmatprep.mubr.bf16.mxu1 %v9047_v35  ;;  %v9098_v59 = vpack.c.bf16 %v921_v10, %v922_v53  ;;  %v7899_v10 = vld [vmem:[%s8288_s21 + $0xf8] sm:$0xff] }
  0xda   : > { %v9071_v43 = vpack.c.bf16 %v923_v21, %v924_v49  ;;  %11370 = vst [vmem:[#allocation50_spill] sm:$0xff] %v11369_v52  ;;  %vm7692_vm12 = vcmp.ne.s32.totalorder %v11371_v26, 0  ;;  %v9105_v37 = vpack.c.bf16 %v8709_v32, %v8703_v5  ;;  %vm9108_vm2 = vmpackc.low %vm11086_vm3, %vm7691_vm7  ;;  %v11372_v21 = vmov 0 }
  0xdb   : > { %v11373_v21 = vsel %vm9108_vm2, 4294967295, %v11372_v21  ;;  %v919_v13 = vsel %vm11094_vm0, %v900_v47, %v901_v30  ;;  %v920_v5 = vsel %vm11094_vm0, %v899_v25, %v900_v47  ;;  %v11375_v32 = vand.u32 15, %v8574_v20  ;;  %vm9133_vm4 = vmpackc.low %vm11086_vm3, %vm7692_vm12 }
  0xdc   : > { %5527 = vmatmul.mubr.msk.bf16.gmra.mrb[36].mxu0 %vm9052_vm1, %v9071_v43  ;;  %11374 = vst [vmem:[#allocation51_spill] sm:$0xff] %v11373_v21  ;;  %v9123_v62 = vpack.c.bf16 %v919_v13, %v920_v5  ;;  %v9130_v34 = vpack.c.bf16 %v8745_v0, %v8730_v17  ;;  %v11376_v11 = vmov 0  ;;  %v917_v20 = vsel %vm11094_vm0, %v902_v3, %v903_v48 }
  0xdd   : > { %1667 = vmatprep.mubr.bf16.mxu0 %v9078_v45  ;;  %vm7693_vm7 = vcmp.ne.s32.totalorder %v11375_v32, 0  ;;  %v11377_v11 = vsel %vm9133_vm4, 4294967295, %v11376_v11  ;;  %v918_v17 = vsel %vm11094_vm0, %v901_v30, %v902_v3  ;;  %v9153_v25 = vpack.c.bf16 %v8821_v39, %v8777_v54 }
  0xde   : > { %11378 = vst [vmem:[#allocation52_spill] sm:$0xff] %v11377_v11  ;;  %v9146_v0 = vpack.c.bf16 %v917_v20, %v918_v17  ;;  %vm9156_vm12 = vmpackc.low %vm11086_vm3, %vm7693_vm7  ;;  %v11379_v47 = vmov 0  ;;  %v915_v30 = vsel %vm11094_vm0, %v904_v61, %v905_v42  ;;  %v916_v39 = vsel %vm11094_vm0, %v903_v48, %v904_v61 }
  0xdf   : > { %v11380_v47 = vsel %vm9156_vm12, 4294967295, %v11379_v47  ;;  %v11382_v54 = vand.u32 15, %v8599_v12  ;;  %v9171_v3 = vpack.c.bf16 %v915_v30, %v916_v39  ;;  %v9178_v49 = vpack.c.bf16 %v8895_v55, %v8842_v60  ;;  %v7814_v30 = vld [vmem:[#allocation6 + $0x208] sm:$0xff]  }
  0xe0   : > { %5655 = vmatmul.mubr.msk.bf16.gmra.mrb[40].mxu1 %vm9052_vm1, %v9071_v43  ;;  %11381 = vst [vmem:[#allocation53_spill] sm:$0xff] %v11380_v47  ;;  %v11383_v12 = vrot.slane %v8895_v55, 7  ;;  %v914_v61 = vsel %vm11094_vm0, %v905_v42, %v906_v40  ;;  %v11384_v60 = vmov 0  ;;  %v9203_v53 = vpack.c.bf16 %v7899_v10, %v8917_v4  ;;  %v7818_v10 = vld [vmem:[#allocation6 + $0x218] sm:$0xff]  }
  0xe1   : > { %2141 = vmatprep.mubr.bf16.mxu1 %v9078_v45  ;;  %vm7694_vm7 = vcmp.ne.s32.totalorder %v11382_v54, 0  ;;  %v908_v26 = vrot.slane %v8917_v4, 7  ;;  %v11387_v42 = vrot.slane %v8349_v58, 7  ;;  %v11389_v4 = vand.u32 15, %v8634_v1  ;;  %v7804_v54 = vld [vmem:[#allocation6 + $0x180] sm:$0xff]  }
  0xe2   : > { %v913_v48 = vsel %vm11094_vm0, %v906_v40, %v11383_v12  ;;  %v11388_v13 = vmov %v11383_v12  ;;  %v11390_v32 = vand.u32 15, %v8650_v28  ;;  %v11392_v17 = vmov 0 }
  0xe3   : > { %v9191_v19 = vpack.c.bf16 %v913_v48, %v914_v61  ;;  %v911_v40 = vsel %vm11094_vm0, %v908_v26, %v11387_v42  ;;  %v912_v5 = vsel %vm11094_vm0, %v11388_v13, %v908_v26  ;;  %v11395_v58 = vmov 0  ;;  %v7807_v61 = vld [vmem:[#allocation6 + $0x1d0] sm:$0xff]   ;;  %v7810_v13 = vld [vmem:[#allocation6 + $0x198] sm:$0xff]  }
  0xe4   : > { %5531 = vmatmul.mubr.msk.bf16.gmra.mrb[40].mxu0 %vm9083_vm8, %v9098_v59  ;;  %v9223_v20 = vpack.c.bf16 %v911_v40, %v912_v5  ;;  %v11398_v55 = vmov 0   ;;  %v11399_v1 = vand.u32 15, %v8666_v27  ;;  %v11400_v28 = vand.u32 15, %v8675_v57  ;;  %v7805_v27 = vld [vmem:[#allocation6 + $0x1c8] sm:$0xff]   ;;  %v7816_v57 = vld [vmem:[#allocation6 + $0x210] sm:$0xff]   ;;  %v7820_v40 = vld [vmem:[#allocation6 + $0x220] sm:$0xff]  }
  0xe5   : > { %1675 = vmatprep.mubr.bf16.mxu0 %v9105_v37  ;;  %v11401_v39 = vmov 0  ;;  %v11404_v12 = vmov 0  ;;  %v11407_v48 = vand.u32 15, %v8713_v22  ;;  %v11409_v26 = vmov 0  ;;  %v7808_v22 = vld [vmem:[#allocation6 + $0x190] sm:$0xff]   ;;  %v11415_v5 = vld [vmem:[#allocation34_spill] sm:$0xff] }
  0xe6   : > { %vm7698_vm0 = vcmp.ne.s32.totalorder %v11400_v28, 15  ;;  %v11412_v42 = vmov 0 }
  0xe8   : > { %5659 = vmatmul.mubr.msk.bf16.gmra.mrb[44].mxu1 %vm9083_vm8, %v9098_v59 }
  0xe9   : > { %2149 = vmatprep.mubr.bf16.mxu1 %v9105_v37 }
  0xec   : > { %5535 = vmatmul.mubr.msk.bf16.gmra.mrb[44].mxu0 %vm9108_vm2, %v9123_v62 }
  0xed   : > { %1683 = vmatprep.mubr.bf16.mxu0 %v9130_v34 }
  0xf0   : > { %5663 = vmatmul.mubr.msk.bf16.gmra.mrb[48].mxu1 %vm9108_vm2, %v9123_v62 }
  0xf1   : > { %2157 = vmatprep.mubr.bf16.mxu1 %v9130_v34 }
  0xf4   : > { %5539 = vmatmul.mubr.msk.bf16.gmra.mrb[48].mxu0 %vm9133_vm4, %v9146_v0 }
  0xf5   : > { %1691 = vmatprep.mubr.bf16.mxu0 %v9153_v25 }
  0xf8   : > { %5667 = vmatmul.mubr.msk.bf16.gmra.mrb[52].mxu1 %vm9133_vm4, %v9146_v0  ;;  %vm9194_vm4 = vmpackc.low %vm11086_vm3, %vm7694_vm7  ;;  %vm7695_vm7 = vcmp.ne.s32.totalorder %v11389_v4, 0  ;;  %vm7696_vm3 = vcmp.ne.s32.totalorder %v11390_v32, 15  ;;  %v11416_v4 = vand.u32 15, %v11415_v5  ;;  %v7811_v32 = vld [vmem:[#allocation6 + $0x1e0] sm:$0xff]   ;;  %v11429_v5 = vld [vmem:[#allocation40_spill] sm:$0xff] }
  0xf9   : > { %2165 = vmatprep.mubr.bf16.mxu1 %v9153_v25  ;;  %v11385_v60 = vsel %vm9194_vm4, 4294967295, %v11384_v60 }
  0xfa   : > { %11386 = vst [vmem:[#allocation54_spill] sm:$0xff] %v11385_v60 }
  0xfc   : > { %5543 = vmatmul.mubr.msk.bf16.gmra.mrb[52].mxu0 %vm9156_vm12, %v9171_v3 }
  0xfd   : > { %1699 = vmatprep.mubr.bf16.mxu0 %v9178_v49 }
 0x100   : > { %5671 = vmatmul.mubr.msk.bf16.gmra.mrb[56].mxu1 %vm9156_vm12, %v9171_v3  ;;  %vm11391_vm12 = vmmov 1  }
 0x101   : > { %2173 = vmatprep.mubr.bf16.mxu1 %v9178_v49  ;;  %vm9226_vm2 = vmpackc.low %vm11391_vm12, %vm7695_vm7  ;;  %vm7697_vm7 = vcmp.ne.s32.totalorder %v11399_v1, 15  ;;  %v11417_v1 = vld [vmem:[#allocation35_spill] sm:$0xff] }
 0x102   : > { %v11393_v17 = vsel %vm9226_vm2, 4294967295, %v11392_v17  ;;  %vm9234_vm8 = vmpackc.low %vm7696_vm3, %vm11391_vm12  ;;  %v11418_v28 = vand.u32 15, %v11417_v1  ;;  %v7821_v1 = vld [vmem:[#allocation6 + $0x1b0] sm:$0xff]  }
 0x103   : > { %11394 = vst [vmem:[#allocation55_spill] sm:$0xff] %v11393_v17  ;;  %v11396_v58 = vsel %vm9234_vm8, 4294967295, %v11395_v58  ;;  %vm9250_vm3 = vmpackc.low %vm7697_vm7, %vm11391_vm12 }
 0x104   : > { %5547 = vmatmul.mubr.msk.bf16.gmra.mrb[56].mxu0 %vm9194_vm4, %v9191_v19  ;;  %11397 = vst [vmem:[#allocation56_spill] sm:$0xff] %v11396_v58  ;;  %v11402_v39 = vsel %vm9250_vm3, 4294967295, %v11401_v39 }
 0x105   : > { %1707 = vmatprep.mubr.bf16.mxu0 %v9203_v53  ;;  %11403 = vst [vmem:[#allocation57_spill] sm:$0xff] %v11402_v39  ;;  %v7832_v39 = vld [vmem:[#allocation8 + $0xc0] sm:$0xff]  }
 0x108   : > { %5675 = vmatmul.mubr.msk.bf16.gmra.mrb[60].mxu1 %vm9194_vm4, %v9191_v19 }
 0x109   : > { %7104 = vmatprep.mubr.bf16.mxu1 %v11398_v55 }
 0x10c   : > { %5551 = vmatmul.mubr.msk.bf16.gmra.mrb[60].mxu0 %vm9226_vm2, %v9223_v20  ;;  %vm9258_vm2 = vmpackc.low %vm7698_vm0, %vm11391_vm12  ;;  %vm7699_vm0 = vcmp.ne.s32.totalorder %v11407_v48, 15  ;;  %v7815_v48 = vld [vmem:[#allocation6 + $0x1e8] sm:$0xff]  }
 0x10d   : > { %7056 = vmatprep.mubr.msk.bf16.mxu0 %vm9234_vm8, %v8672_v14  ;;  %v11405_v12 = vsel %vm9258_vm2, 4294967295, %v11404_v12 }
 0x10e   : > { %11406 = vst [vmem:[#allocation58_spill] sm:$0xff] %v11405_v12 }
 0x110   : > { %7105 = vmatmul.mubr.msk.bf16.vlgmr.msra.gmra.mrb[64].mxu1 %vm9234_vm8, %v8672_v14  ;;  %v7806_v14 = vld [vmem:[#allocation6 + $0x188] sm:$0xff]   ;;  %vm9277_vm8 = vmpackc.low %vm7699_vm0, %vm11391_vm12  ;;  %vm7701_vm0 = vcmp.ne.s32.totalorder %v11416_v4, 15  ;;  %v11430_v4 = vand.u32 15, %v11429_v5  ;;  %v11441_v5 = vld [vmem:[#allocation44_spill] sm:$0xff] }
 0x111   : > { %7108 = vmatprep.mubr.msk.bf16.mxu1 %vm9250_vm3, %v8405_v33  ;;  %7137 = vmatpush3.bf16.msra.mxu1 %v8795_v29  ;;  %v11408_v29 = vand.u32 15, %v8739_v9  ;;  %v11410_v26 = vsel %vm9277_vm8, 4294967295, %v11409_v26  ;;  %v7809_v9 = vld [vmem:[#allocation6 + $0x1d8] sm:$0xff]   ;;  %vm9303_vm1 = vmpackc.low %vm7701_vm0, %vm11391_vm12 }
 0x112   : > { %7138 = vmatprep.subr.bf16.mxu1 %v7814_v30  ;;  %11411 = vst [vmem:[#allocation59_spill] sm:$0xff] %v11410_v26 }
 0x113   : > { %vm7700_vm7 = vcmp.ne.s32.totalorder %v11408_v29, 15  ;;  %v11426_v29 = vld [vmem:[#allocation38_spill] sm:$0xff] }
 0x114   : > { %7057 = vmatmul.mubr.msk.bf16.vlgmr.msra.gmra.mrb[64].mxu0 %vm9250_vm3, %v8405_v33  ;;  %vm9285_vm4 = vmpackc.low %vm7700_vm7, %vm11391_vm12  ;;  %vm7702_vm7 = vcmp.ne.s32.totalorder %v11418_v28, 15  ;;  %v11434_v28 = vmov 0 }
 0x115   : > { %6497 = vmatpush3.bf16.msra.mxu0 %v7804_v54  ;;  %7060 = vmatprep.mubr.msk.bf16.mxu0 %vm9258_vm2, %v8706_v51  ;;  %v11413_v42 = vsel %vm9285_vm4, 4294967295, %v11412_v42  ;;  %v11419_v54 = vmov 0  ;;  %vm9311_vm14 = vmpackc.low %vm7702_vm7, %vm11391_vm12  ;;  %vm7704_vm7 = vcmp.ne.s32.totalorder %v11430_v4, 15  ;;  %v11442_v4 = vand.u32 15, %v11441_v5 }
 0x116   : > { %6498 = vmatprep.subr.bf16.mxu0 %v7805_v27  ;;  %7139 = vmatpush3.bf16.msra.mxu1 %v7814_v30  ;;  %11414 = vst [vmem:[#allocation60_spill] sm:$0xff] %v11413_v42  ;;  %v7822_v30 = vld [vmem:[#allocation6 + $0x228] sm:$0xff]   ;;  %v11420_v54 = vsel %vm9303_vm1, 4294967295, %v11419_v54  ;;  %v7813_v27 = vld [vmem:[#allocation6 + $0x1a0] sm:$0xff]   ;;  %vm9337_vm5 = vmpackc.low %vm7704_vm7, %vm11391_vm12  ;;  %v11461_v5 = vmov 0 }
 0x117   : > { %7140 = vmatprep.subr.bf16.mxu1 %v7816_v57  ;;  %11421 = vst [vmem:[#allocation34_spill] sm:$0xff] %v11420_v54  ;;  %v11435_v28 = vsel %vm9337_vm5, 4294967295, %v11434_v28  ;;  %vm7706_vm7 = vcmp.ne.s32.totalorder %v11442_v4, 15  ;;  %v11464_v4 = vmov 0 }
 0x118   : > { %7109 = vmatmul.mubr.msk.bf16.gmra.mrb[68].mxu1 %vm9258_vm2, %v8706_v51  ;;  %11436 = vst [vmem:[#allocation38_spill] sm:$0xff] %v11435_v28  ;;  %vm9363_vm13 = vmpackc.low %vm7706_vm7, %vm11391_vm12 }
 0x119   : > { %6499 = vmatpush3.bf16.msra.mxu0 %v7806_v14  ;;  %7112 = vmatprep.mubr.msk.bf16.mxu1 %vm9277_vm8, %v8748_v23  ;;  %v11425_v14 = vld [vmem:[#allocation36_spill] sm:$0xff] }
 0x11a   : > { %6500 = vmatprep.subr.bf16.mxu0 %v7807_v61  ;;  %7141 = vmatpush3.bf16.msra.mxu1 %v7816_v57  ;;  %v11422_v57 = vmov 0  ;;  %v7824_v61 = vld [vmem:[#allocation6 + $0x230] sm:$0xff]  }
 0x11b   : > { %7142 = vmatprep.subr.bf16.mxu1 %v7818_v10  ;;  %v11423_v57 = vsel %vm9311_vm14, 4294967295, %v11422_v57 }
 0x11c   : > { %7061 = vmatmul.mubr.msk.bf16.gmra.mrb[68].mxu0 %vm9277_vm8, %v8748_v23  ;;  %11424 = vst [vmem:[#allocation35_spill] sm:$0xff] %v11423_v57 }
 0x11d   : > { %7064 = vmatprep.mubr.msk.bf16.mxu0 %vm9285_vm4, %v8764_v15  ;;  %6501 = vmatpush3.bf16.msra.mxu0 %v7808_v22  ;;  %v11427_v22 = vld [vmem:[#allocation37_spill] sm:$0xff] }
 0x11e   : > { %6502 = vmatprep.subr.bf16.mxu0 %v7809_v9  ;;  %7143 = vmatpush3.bf16.msra.mxu1 %v7818_v10  ;;  %v7817_v10 = vld [vmem:[#allocation6 + $0x1a8] sm:$0xff]   ;;  %v11428_v9 = vand.u32 15, %v11427_v22  ;;  %v11439_v22 = vld [vmem:[#allocation43_spill] sm:$0xff] }
 0x11f   : > { %7144 = vmatprep.subr.bf16.mxu1 %v7820_v40 }
 0x120   : > { %7113 = vmatmul.mubr.msk.bf16.gmra.mrb[72].mxu1 %vm9285_vm4, %v8764_v15  ;;  %vm7703_vm0 = vcmp.ne.s32.totalorder %v11428_v9, 15  ;;  %v11440_v9 = vand.u32 15, %v11439_v22  ;;  %v11453_v22 = vmov 0 }
 0x121   : > { %6503 = vmatpush3.bf16.msra.mxu0 %v7810_v13  ;;  %7116 = vmatprep.mubr.msk.bf16.mxu1 %vm9303_vm1, %v11425_v14  ;;  %v7819_v13 = vld [vmem:[#allocation6 + $0x1f0] sm:$0xff]   ;;  %vm9329_vm10 = vmpackc.low %vm7703_vm0, %vm11391_vm12 }
 0x122   : > { %6504 = vmatprep.subr.bf16.mxu0 %v7811_v32  ;;  %7145 = vmatpush3.bf16.msra.mxu1 %v7820_v40  ;;  %v7826_v40 = vld [vmem:[#allocation6 + $0x238] sm:$0xff]   ;;  %v11431_v32 = vmov 0  ;;  %vm7705_vm0 = vcmp.ne.s32.totalorder %v11440_v9, 15  ;;  %v11456_v9 = vmov 0 }
 0x123   : > { %7146 = vmatprep.subr.bf16.mxu1 %v7822_v30  ;;  %v11432_v32 = vsel %vm9329_vm10, 4294967295, %v11431_v32  ;;  %vm9355_vm15 = vmpackc.low %vm7705_vm0, %vm11391_vm12 }
 0x124   : > { %7065 = vmatmul.mubr.msk.bf16.gmra.mrb[72].mxu0 %vm9303_vm1, %v11425_v14  ;;  %11433 = vst [vmem:[#allocation36_spill] sm:$0xff] %v11432_v32 }
 0x125   : > { %7068 = vmatprep.mubr.msk.bf16.mxu0 %vm9311_vm14, %v11426_v29  ;;  %6505 = vmatpush3.bf16.msra.mxu0 %v7813_v27  ;;  %v11437_v27 = vld [vmem:[#allocation39_spill] sm:$0xff] }
 0x126   : > { %6506 = vmatprep.subr.bf16.mxu0 %v7815_v48  ;;  %7147 = vmatpush3.bf16.msra.mxu1 %v7822_v30  ;;  %v7823_v30 = vld [vmem:[#allocation6 + $0x1f8] sm:$0xff]   ;;  %v11438_v48 = vld [vmem:[#allocation42_spill] sm:$0xff] }
 0x127   : > { %7148 = vmatprep.subr.bf16.mxu1 %v7824_v61 }
 0x128   : > { %7117 = vmatmul.mubr.msk.bf16.gmra.mrb[76].mxu1 %vm9311_vm14, %v11426_v29 }
 0x129   : > { %6507 = vmatpush3.bf16.msra.mxu0 %v7817_v10  ;;  %7120 = vmatprep.mubr.msk.bf16.mxu1 %vm9329_vm10, %v11437_v27  ;;  %v7825_v10 = vld [vmem:[#allocation6 + $0x1b8] sm:$0xff]  }
 0x12a   : > { %6508 = vmatprep.subr.bf16.mxu0 %v7819_v13  ;;  %7149 = vmatpush3.bf16.msra.mxu1 %v7824_v61  ;;  %v11443_v61 = vmov 0  ;;  %v11446_v13 = vmov 0 }
 0x12b   : > { %7150 = vmatprep.subr.bf16.mxu1 %v7826_v40  ;;  %v11444_v61 = vsel %vm9355_vm15, 4294967295, %v11443_v61  ;;  %v11447_v13 = vsel %vm9363_vm13, 4294967295, %v11446_v13 }
 0x12c   : > { %7069 = vmatmul.mubr.msk.bf16.gmra.mrb[76].mxu0 %vm9329_vm10, %v11437_v27  ;;  %11445 = vst [vmem:[#allocation37_spill] sm:$0xff] %v11444_v61  ;;  %11448 = vst [vmem:[#allocation40_spill] sm:$0xff] %v11447_v13 }
 0x12d   : > { %7072 = vmatprep.mubr.msk.bf16.mxu0 %vm9337_vm5, %v11438_v48  ;;  %6509 = vmatpush3.bf16.msra.mxu0 %v7821_v1  ;;  %v11449_v1 = vld [vmem:[#allocation45_spill] sm:$0xff] }
 0x12e   : > { %6510 = vmatprep.subr.bf16.mxu0 %v7823_v30  ;;  %7151 = vmatpush3.bf16.msra.mxu1 %v7826_v40  ;;  %v11450_v40 = vld [vmem:[#allocation46_spill] sm:$0xff]  ;;  %v11451_v30 = vand.u32 15, %v8931_v18  ;;  %v11459_v18 = vand.u32 15, %v8969_v7  ;;  %v11467_v7 = vand.u32 15, %v8999_v63  ;;  %v11472_v63 = vld [vmem:[#allocation16_spill] sm:$0xff] }
 0x130   : > { %7121 = vmatmul.mubr.msk.bf16.gmra.mrb[80].mxu1 %vm9337_vm5, %v11438_v48  ;;  %vm7707_vm0 = vcmp.ne.s32.totalorder %v11451_v30, 15  ;;  %v11471_v30 = vld [vmem:[#allocation15_spill] sm:$0xff] }
 0x131   : > { %6511 = vmatpush3.bf16.msra.mxu0 %v7825_v10  ;;  %7124 = vmatprep.mubr.msk.bf16.mxu1 %vm9355_vm15, %v11449_v1  ;;  %v11452_v10 = vand.u32 15, %v8956_v50  ;;  %vm9381_vm5 = vmpackc.low %vm7707_vm0, %vm11391_vm12  ;;  %vm7709_vm0 = vcmp.ne.s32.totalorder %v11459_v18, 15  ;;  %v11460_v50 = vand.u32 15, %v8994_v31  ;;  %v11468_v31 = vmov 0  ;;  %v11474_v18 = vld [vmem:[#allocation18_spill] sm:$0xff] }
 0x132   : > { %v11454_v22 = vsel %vm9381_vm5, 4294967295, %v11453_v22 }
 0x133   : > { %vm7708_vm7 = vcmp.ne.s32.totalorder %v11452_v10, 15  ;;  %11455 = vst [vmem:[#allocation39_spill] sm:$0xff] %v11454_v22 }
 0x134   : > { %7073 = vmatmul.mubr.msk.bf16.gmra.mrb[80].mxu0 %vm9355_vm15, %v11449_v1  ;;  %vm9389_vm15 = vmpackc.low %vm7708_vm7, %vm11391_vm12  ;;  %vm7710_vm7 = vcmp.ne.s32.totalorder %v11460_v50, 15  ;;  %v11477_v50 = vld [vmem:[#allocation21_spill] sm:$0xff] }
 0x135   : > { %7076 = vmatprep.mubr.msk.bf16.mxu0 %vm9363_vm13, %v11450_v40  ;;  %v11457_v9 = vsel %vm9389_vm15, 4294967295, %v11456_v9 }
 0x136   : > { %11458 = vst [vmem:[#allocation42_spill] sm:$0xff] %v11457_v9 }
 0x138   : > { %7125 = vmatmul.mubr.msk.bf16.gmra.mrb[84].mxu1 %vm9363_vm13, %v11450_v40  ;;  %vm9407_vm13 = vmpackc.low %vm7709_vm0, %vm11391_vm12  ;;  %vm7711_vm0 = vcmp.ne.s32.totalorder %v11467_v7, 15 }
 0x139   : > { %7128 = vmatprep.mubr.msk.bf16.mxu1 %vm9381_vm5, %v8959_v44  ;;  %v11462_v5 = vsel %vm9407_vm13, 4294967295, %v11461_v5 }
 0x13a   : > { %11463 = vst [vmem:[#allocation43_spill] sm:$0xff] %v11462_v5 }
 0x13c   : > { %7077 = vmatmul.mubr.msk.bf16.gmra.mrb[84].mxu0 %vm9381_vm5, %v8959_v44  ;;  %vm9415_vm5 = vmpackc.low %vm7710_vm7, %vm11391_vm12 }
 0x13d   : > { %7080 = vmatprep.mubr.msk.bf16.mxu0 %vm9389_vm15, %v8966_v16  ;;  %v11465_v4 = vsel %vm9415_vm5, 4294967295, %v11464_v4  ;;  %vm9431_vm7 = vmpackc.low %vm7711_vm0, %vm11391_vm12  ;;  %vm11481_vm12 = vnez %v11435_v28  ;;  %vm11482_vm0 = vnez %v11444_v61 }
 0x13e   : > { %11466 = vst [vmem:[#allocation44_spill] sm:$0xff] %v11465_v4  ;;  %v11469_v31 = vsel %vm9431_vm7, 4294967295, %v11468_v31 }
 0x13f   : > { %11470 = vst [vmem:[#allocation45_spill] sm:$0xff] %v11469_v31 }
 0x140   : > { %7129 = vmatmul.mubr.msk.bf16.gmra.mrb[88].mxu1 %vm9389_vm15, %v8966_v16 }
 0x141   : > { %7132 = vmatprep.mubr.msk.bf16.mxu1 %vm9407_vm13, %v8991_v46 }
 0x144   : > { %7081 = vmatmul.mubr.msk.bf16.gmra.mrb[88].mxu0 %vm9407_vm13, %v8991_v46 }
 0x145   : > { %7084 = vmatprep.mubr.msk.bf16.mxu0 %vm9415_vm5, %v9007_v6 }
 0x148   : > { %7133 = vmatmul.mubr.msk.bf16.gmra.mrb[92].mxu1 %vm9415_vm5, %v9007_v6 }
 0x149   : > { %7152 = vmatprep.mubr.msk.bf16.mxu1 %vm9250_vm3, %v8405_v33  ;;  %v11475_v33 = vld [vmem:[#allocation19_spill] sm:$0xff] }
 0x14c   : > { %7085 = vmatmul.mubr.msk.bf16.gmra.mrb[92].mxu0 %vm9431_vm7, %v9027_v8 }
 0x14d   : > { %2615 = vmatprep.mubr.bf16.mxu0 %v11471_v30 }
 0x150   : > { %7153 = vmatmul.mubr.msk.bf16.vlgmr.msra.gmra.mrb[64].mxu1 %vm9258_vm2, %v8706_v51 }
 0x151   : > { %7156 = vmatprep.mubr.msk.bf16.mxu1 %vm9277_vm8, %v8748_v23  ;;  %v11478_v23 = vld [vmem:[#allocation23_spill] sm:$0xff] }
 0x154   : > { %5739 = vmatmul.mubr.msk.bf16.vlgmr.msra.gmra.mrb[96].mxu0 %vm8410_vm6, %v11472_v63 }
 0x155   : > { %2623 = vmatprep.mubr.bf16.mxu0 %v11474_v18 }
 0x158   : > { %7157 = vmatmul.mubr.msk.bf16.gmra.mrb[68].mxu1 %vm9285_vm4, %v8764_v15 }
 0x159   : > { %7160 = vmatprep.mubr.msk.bf16.mxu1 %vm9303_vm1, %v11425_v14  ;;  %v11480_v14 = vld [vmem:[#allocation22_spill] sm:$0xff] }
 0x15c   : > { %5743 = vmatmul.mubr.msk.bf16.gmra.mrb[100].mxu0 %vm8454_vm9, %v11475_v33  ;;  %vm11487_vm9 = vnez %v11447_v13 }
 0x15d   : > { %2631 = vmatprep.mubr.bf16.mxu0 %v11477_v50 }
 0x160   : > { %7161 = vmatmul.mubr.msk.bf16.gmra.mrb[72].mxu1 %vm9311_vm14, %v11426_v29 }
 0x161   : > { %7164 = vmatprep.mubr.msk.bf16.mxu1 %vm9329_vm10, %v11437_v27 }
 0x162   : > { %v6240_v33 = vpop.f32.mrb[0].mxu0 }
 0x163   : > { %v6376_v7 = vpop.f32.mrb[0].mxu1  ;;  %v6241_v51 = vpop.f32.mrb[1].mxu0 }
 0x164   : > { %5747 = vmatmul.mubr.msk.bf16.gmra.mrb[104].mxu0 %vm8533_vm11, %v11478_v23  ;;  %v6377_v30 = vpop.f32.mrb[1].mxu1  ;;  %v6243_v29 = vpop.f32.mrb[2].mxu0  ;;  %v9482_v27 = vadd.f32 %v6241_v51, %v6240_v33 }
 0x165   : > { %2639 = vmatprep.mubr.bf16.mxu0 %v11480_v14  ;;  %v9475_v63 = vadd.f32 %v6377_v30, %v6376_v7  ;;  %v6379_v18 = vpop.f32.mrb[2].mxu1  ;;  %v6244_v23 = vpop.f32.mrb[3].mxu0  ;;  %v11483_v14 = vld [vmem:[#allocation25_spill] sm:$0xff]  ;;  %v11484_v30 = vld [vmem:[#allocation31_spill] sm:$0xff] }
 0x166   : > { %v6380_v50 = vpop.f32.mrb[3].mxu1  ;;  %v9487_v7 = vadd.f32 %v6244_v23, %v6243_v29  ;;  %vm11485_vm11 = vnez %v11484_v30  ;;  %v11489_v23 = vld [vmem:[#allocation28_spill] sm:$0xff] }
 0x167   : > { %v9477_v10 = vadd.f32 %v6380_v50, %v6379_v18  ;;  %v11486_v50 = vld [vmem:[#allocation26_spill] sm:$0xff] }
 0x168   : > { %7165 = vmatmul.mubr.msk.bf16.gmra.mrb[76].mxu1 %vm11481_vm12, %v11438_v48 }
 0x169   : > { %7168 = vmatprep.mubr.msk.bf16.mxu1 %vm11482_vm0, %v11449_v1 }
 0x16a   : > { %v6246_v51 = vpop.f32.mrb[4].mxu0 }
 0x16b   : > { %v6382_v18 = vpop.f32.mrb[4].mxu1  ;;  %v6247_v28 = vpop.f32.mrb[5].mxu0 }
 0x16c   : > { %5751 = vmatmul.mubr.msk.bf16.gmra.mrb[108].mxu0 %vm11485_vm11, %v11483_v14  ;;  %v6383_v15 = vpop.f32.mrb[5].mxu1  ;;  %v6249_v61 = vpop.f32.mrb[6].mxu0  ;;  %v9500_v1 = vadd.f32 %v6247_v28, %v6246_v51  ;;  %vm11488_vm11 = vnez %v11454_v22  ;;  %v11490_v14 = vld [vmem:[#allocation33_spill] sm:$0xff] }
 0x16d   : > { %2647 = vmatprep.mubr.bf16.mxu0 %v11486_v50  ;;  %v9493_v32 = vadd.f32 %v6383_v15, %v6382_v18  ;;  %v6385_v48 = vpop.f32.mrb[6].mxu1  ;;  %v6250_v29 = vpop.f32.mrb[7].mxu0  ;;  %vm11491_vm6 = vnez %v11490_v14  ;;  %v11492_v50 = vld [vmem:[#allocation27_spill] sm:$0xff] }
 0x16e   : > { %v6386_v33 = vpop.f32.mrb[7].mxu1  ;;  %v9505_v15 = vadd.f32 %v6250_v29, %v6249_v61 }
 0x16f   : > { %v9495_v57 = vadd.f32 %v6386_v33, %v6385_v48 }
 0x170   : > { %7169 = vmatmul.mubr.msk.bf16.gmra.mrb[80].mxu1 %vm11487_vm9, %v11450_v40 }
 0x171   : > { %7172 = vmatprep.mubr.msk.bf16.mxu1 %vm11488_vm11, %v8959_v44 }
 0x172   : > { %v6252_v28 = vpop.f32.mrb[8].mxu0 }
 0x173   : > { %v6388_v18 = vpop.f32.mrb[8].mxu1  ;;  %v6253_v30 = vpop.f32.mrb[9].mxu0 }
 0x174   : > { %5755 = vmatmul.mubr.msk.bf16.gmra.mrb[112].mxu0 %vm11491_vm6, %v11489_v23  ;;  %v6389_v48 = vpop.f32.mrb[9].mxu1  ;;  %v6255_v22 = vpop.f32.mrb[10].mxu0  ;;  %v9518_v44 = vadd.f32 %v6253_v30, %v6252_v28  ;;  %v11493_v23 = vld [vmem:[#allocation30_spill] sm:$0xff] }
 0x175   : > { %2655 = vmatprep.mubr.bf16.mxu0 %v11492_v50  ;;  %v9511_v33 = vadd.f32 %v6389_v48, %v6388_v18  ;;  %v6391_v40 = vpop.f32.mrb[10].mxu1  ;;  %v6256_v61 = vpop.f32.mrb[11].mxu0  ;;  %v11494_v18 = vld [vmem:[#allocation41_spill] sm:$0xff] }
 0x176   : > { %v6392_v51 = vpop.f32.mrb[11].mxu1  ;;  %v9523_v29 = vadd.f32 %v6256_v61, %v6255_v22  ;;  %vm11495_vm6 = vnez %v11494_v18  ;;  %v11496_v48 = vld [vmem:[#allocation29_spill] sm:$0xff] }
 0x177   : > { %v9513_v13 = vadd.f32 %v6392_v51, %v6391_v40 }
 0x178   : > { %7173 = vmatmul.mubr.msk.bf16.gmra.mrb[84].mxu1 %vm9389_vm15, %v8966_v16 }
 0x179   : > { %7176 = vmatprep.mubr.msk.bf16.mxu1 %vm9407_vm13, %v8991_v46 }
 0x17a   : > { %v6258_v30 = vpop.f32.mrb[12].mxu0 }
 0x17b   : > { %v6394_v50 = vpop.f32.mrb[12].mxu1  ;;  %v6259_v14 = vpop.f32.mrb[13].mxu0 }
 0x17c   : > { %5759 = vmatmul.mubr.msk.bf16.gmra.mrb[116].mxu0 %vm11495_vm6, %v11493_v23  ;;  %v6395_v40 = vpop.f32.mrb[13].mxu1  ;;  %v6261_v5 = vpop.f32.mrb[14].mxu0  ;;  %v9536_v46 = vadd.f32 %v6259_v14, %v6258_v30  ;;  %vm11497_vm6 = vnez %v11354_v24 }
 0x17d   : > { %2663 = vmatprep.mubr.bf16.mxu0 %v11496_v48  ;;  %v9529_v51 = vadd.f32 %v6395_v40, %v6394_v50  ;;  %v6397_v16 = vpop.f32.mrb[14].mxu1  ;;  %v6262_v22 = vpop.f32.mrb[15].mxu0  ;;  %v11498_v50 = vld [vmem:[#allocation32_spill] sm:$0xff] }
 0x17e   : > { %v6398_v28 = vpop.f32.mrb[15].mxu1  ;;  %v9541_v61 = vadd.f32 %v6262_v22, %v6261_v5 }
 0x17f   : > { %v9531_v9 = vadd.f32 %v6398_v28, %v6397_v16 }
 0x180   : > { %7177 = vmatmul.mubr.msk.bf16.gmra.mrb[88].mxu1 %vm9415_vm5, %v9007_v6 }
 0x181   : > { %7180 = vmatprep.mubr.msk.bf16.mxu1 %vm9431_vm7, %v9027_v8 }
 0x182   : > { %v6264_v14 = vpop.f32.mrb[16].mxu0 }
 0x183   : > { %v6400_v23 = vpop.f32.mrb[16].mxu1  ;;  %v6265_v30 = vpop.f32.mrb[17].mxu0 }
 0x184   : > { %5763 = vmatmul.mubr.msk.bf16.gmra.mrb[120].mxu0 %vm11497_vm6, %v8626_v41  ;;  %v6401_v48 = vpop.f32.mrb[17].mxu1  ;;  %v6267_v18 = vpop.f32.mrb[18].mxu0  ;;  %v9552_v8 = vadd.f32 %v6265_v30, %v6264_v14  ;;  %vm11499_vm6 = vnez %v11361_v56 }
 0x185   : > { %2671 = vmatprep.mubr.bf16.mxu0 %v11498_v50  ;;  %v9547_v40 = vadd.f32 %v6401_v48, %v6400_v23  ;;  %v6403_v6 = vpop.f32.mrb[18].mxu1  ;;  %v6268_v5 = vpop.f32.mrb[19].mxu0 }
 0x186   : > { %v6404_v16 = vpop.f32.mrb[19].mxu1  ;;  %v9554_v22 = vadd.f32 %v6268_v5, %v6267_v18 }
 0x187   : > { %v9549_v28 = vadd.f32 %v6404_v16, %v6403_v6 }
 0x188   : > { %7181 = vmatmul.mubr.bf16.gmra.mrb[92].mxu1 %v11398_v55 }
 0x18a   : > { %v6270_v6 = vpop.f32.mrb[20].mxu0 }
 0x18b   : > { %v6406_v41 = vpop.f32.mrb[20].mxu1  ;;  %v6271_v24 = vpop.f32.mrb[21].mxu0 }
 0x18c   : > { %5767 = vmatmul.mubr.msk.bf16.gmra.mrb[124].mxu0 %vm11499_vm6, %v9019_v38  ;;  %v6407_v23 = vpop.f32.mrb[21].mxu1  ;;  %v6273_v14 = vpop.f32.mrb[22].mxu0  ;;  %v9564_v30 = vadd.f32 %v6271_v24, %v6270_v6  ;;  %vm11500_vm6 = vnez %v11364_v36 }
 0x18d   : > { %2679 = vmatprep.mubr.bf16.mxu0 %v9047_v35  ;;  %v9560_v50 = vadd.f32 %v6407_v23, %v6406_v41  ;;  %v6409_v48 = vpop.f32.mrb[22].mxu1  ;;  %v6274_v18 = vpop.f32.mrb[23].mxu0 }
 0x18e   : > { %v6410_v16 = vpop.f32.mrb[23].mxu1  ;;  %v9566_v5 = vadd.f32 %v6274_v18, %v6273_v14 }
 0x18f   : > { %v9562_v31 = vadd.f32 %v6410_v16, %v6409_v48 }
 0x192   : > { %v6276_v56 = vpop.f32.mrb[24].mxu0 }
 0x193   : > { %v6412_v38 = vpop.f32.mrb[24].mxu1  ;;  %v6277_v16 = vpop.f32.mrb[25].mxu0 }
 0x194   : > { %5771 = vmatmul.mubr.msk.bf16.gmra.mrb[128].mxu0 %vm11500_vm6, %v9071_v43  ;;  %v6413_v35 = vpop.f32.mrb[25].mxu1  ;;  %v6279_v24 = vpop.f32.mrb[26].mxu0  ;;  %v9576_v6 = vadd.f32 %v6277_v16, %v6276_v56  ;;  %vm11501_vm6 = vnez %v11369_v52 }
 0x195   : > { %2687 = vmatprep.mubr.bf16.mxu0 %v9078_v45  ;;  %v9572_v41 = vadd.f32 %v6413_v35, %v6412_v38  ;;  %v6415_v23 = vpop.f32.mrb[26].mxu1  ;;  %v6280_v14 = vpop.f32.mrb[27].mxu0 }
 0x196   : > { %v6416_v48 = vpop.f32.mrb[27].mxu1  ;;  %v9578_v18 = vadd.f32 %v6280_v14, %v6279_v24 }
 0x197   : > { %v9574_v4 = vadd.f32 %v6416_v48, %v6415_v23 }
 0x19a   : > { %v6282_v36 = vpop.f32.mrb[28].mxu0 }
 0x19b   : > { %v6418_v45 = vpop.f32.mrb[28].mxu1  ;;  %v6283_v48 = vpop.f32.mrb[29].mxu0 }
 0x19c   : > { %5775 = vmatmul.mubr.msk.bf16.gmra.mrb[132].mxu0 %vm11501_vm6, %v9098_v59  ;;  %v6419_v43 = vpop.f32.mrb[29].mxu1  ;;  %v6285_v56 = vpop.f32.mrb[30].mxu0  ;;  %v9588_v16 = vadd.f32 %v6283_v48, %v6282_v36  ;;  %vm11502_vm6 = vnez %v11373_v21  ;;  %v7827_v36 = vld [vmem:[#allocation8 + $0x140] sm:$0xff]  }
 0x19d   : > { %2695 = vmatprep.mubr.bf16.mxu0 %v9105_v37  ;;  %v9584_v38 = vadd.f32 %v6419_v43, %v6418_v45  ;;  %v6421_v35 = vpop.f32.mrb[30].mxu1  ;;  %v6286_v24 = vpop.f32.mrb[31].mxu0  ;;  %7184 = vmatprep.subr.bf16.mxu1 %v7827_v36 }
 0x19e   : > { %v6422_v23 = vpop.f32.mrb[31].mxu1  ;;  %v9590_v14 = vadd.f32 %v6286_v24, %v6285_v56  ;;  %7185 = vmatpush3.bf16.msra.mxu1 %v7827_v36 }
 0x19f   : > { %v9586_v54 = vadd.f32 %v6422_v23, %v6421_v35 }
 0x1a3   : > { %v6424_v59 = vpop.f32.mrb[32].mxu1 }
 0x1a4   : > { %5779 = vmatmul.mubr.msk.bf16.gmra.mrb[136].mxu0 %vm11502_vm6, %v9123_v62  ;;  %v6425_v37 = vpop.f32.mrb[33].mxu1  ;;  %vm11503_vm6 = vnez %v11377_v11  ;;  %v7829_v11 = vld [vmem:[#allocation8 + $0x150] sm:$0xff]  }
 0x1a5   : > { %2703 = vmatprep.mubr.bf16.mxu0 %v9130_v34  ;;  %v9596_v45 = vadd.f32 %v6425_v37, %v6424_v59  ;;  %v6427_v43 = vpop.f32.mrb[34].mxu1  ;;  %v7828_v34 = vld [vmem:[#allocation8 + $0x148] sm:$0xff]  }
 0x1a6   : > { %v6428_v35 = vpop.f32.mrb[35].mxu1  ;;  %7186 = vmatprep.subr.bf16.mxu1 %v7828_v34 }
 0x1a7   : > { %v6288_v52 = vpop.f32.mrb[32].mxu0  ;;  %v9598_v42 = vadd.f32 %v6428_v35, %v6427_v43  ;;  %7187 = vmatpush3.bf16.msra.mxu1 %v7828_v34  ;;  %v7831_v34 = vld [vmem:[#allocation8 + $0x158] sm:$0xff]  }
 0x1a8   : > { %v6289_v23 = vpop.f32.mrb[33].mxu0  ;;  %7188 = vmatprep.subr.bf16.mxu1 %v7829_v11 }
 0x1a9   : > { %v9600_v48 = vadd.f32 %v6289_v23, %v6288_v52  ;;  %v6291_v56 = vpop.f32.mrb[34].mxu0 }
 0x1aa   : > { %v6292_v24 = vpop.f32.mrb[35].mxu0 }
 0x1ab   : > { %v9602_v21 = vadd.f32 %v6292_v24, %v6291_v56  ;;  %v6430_v62 = vpop.f32.mrb[36].mxu1  ;;  %7189 = vmatpush3.bf16.msra.mxu1 %v7829_v11 }
 0x1ac   : > { %5783 = vmatmul.mubr.msk.bf16.gmra.mrb[140].mxu0 %vm11503_vm6, %v9146_v0  ;;  %v6431_v59 = vpop.f32.mrb[37].mxu1  ;;  %vm11504_vm6 = vnez %v11380_v47  ;;  %7190 = vmatprep.subr.bf16.mxu1 %v7831_v34 }
 0x1ad   : > { %2711 = vmatprep.mubr.bf16.mxu0 %v9153_v25  ;;  %v9608_v37 = vadd.f32 %v6431_v59, %v6430_v62  ;;  %v6433_v43 = vpop.f32.mrb[38].mxu1 }
 0x1ae   : > { %v6434_v35 = vpop.f32.mrb[39].mxu1 }
 0x1af   : > { %v6294_v52 = vpop.f32.mrb[36].mxu0  ;;  %v9610_v56 = vadd.f32 %v6434_v35, %v6433_v43  ;;  %7191 = vmatpush3.bf16.msra.mxu1 %v7831_v34 }
 0x1b0   : > { %v6295_v23 = vpop.f32.mrb[37].mxu0 }
 0x1b1   : > { %v9612_v36 = vadd.f32 %v6295_v23, %v6294_v52  ;;  %v6297_v24 = vpop.f32.mrb[38].mxu0 }
 0x1b2   : > { %v6298_v0 = vpop.f32.mrb[39].mxu0 }
 0x1b3   : > { %v9614_v26 = vadd.f32 %v6298_v0, %v6297_v24  ;;  %v6436_v25 = vpop.f32.mrb[40].mxu1 }
 0x1b4   : > { %5787 = vmatmul.mubr.msk.bf16.gmra.mrb[144].mxu0 %vm11504_vm6, %v9171_v3  ;;  %v6437_v62 = vpop.f32.mrb[41].mxu1  ;;  %v7833_v3 = vld [vmem:[#allocation8 + $0x160] sm:$0xff]   ;;  %vm11507_vm6 = vnez %v11385_v60 }
 0x1b5   : > { %2719 = vmatprep.mubr.bf16.mxu0 %v9178_v49  ;;  %v9620_v59 = vadd.f32 %v6437_v62, %v6436_v25  ;;  %v6439_v43 = vpop.f32.mrb[42].mxu1  ;;  %7192 = vmatprep.subr.bf16.mxu1 %v7833_v3  ;;  %v7834_v62 = vld [vmem:[#allocation8 + $0x168] sm:$0xff]  }
 0x1b6   : > { %v6440_v35 = vpop.f32.mrb[43].mxu1  ;;  %7193 = vmatpush3.bf16.msra.mxu1 %v7833_v3  ;;  %v7835_v3 = vld [vmem:[#allocation8 + $0x170] sm:$0xff]  }
 0x1b7   : > { %v6300_v52 = vpop.f32.mrb[40].mxu0  ;;  %v9622_v24 = vadd.f32 %v6440_v35, %v6439_v43  ;;  %7194 = vmatprep.subr.bf16.mxu1 %v7834_v62 }
 0x1b8   : > { %v6301_v23 = vpop.f32.mrb[41].mxu0 }
 0x1b9   : > { %11505 = vst [vmem:[#allocation46_spill] sm:$0xff] %v9622_v24  ;;  %v9624_v0 = vadd.f32 %v6301_v23, %v6300_v52  ;;  %v6303_v47 = vpop.f32.mrb[42].mxu0 }
 0x1ba   : > { %v6304_v12 = vpop.f32.mrb[43].mxu0  ;;  %7195 = vmatpush3.bf16.msra.mxu1 %v7834_v62  ;;  %v7837_v62 = vld [vmem:[#allocation8 + $0x178] sm:$0xff]  }
 0x1bb   : > { %v9626_v11 = vadd.f32 %v6304_v12, %v6303_v47  ;;  %v6442_v49 = vpop.f32.mrb[44].mxu1  ;;  %v7830_v12 = vld [vmem:[#allocation8 + $0x100] sm:$0xff]   ;;  %7196 = vmatprep.subr.bf16.mxu1 %v7835_v3 }
 0x1bc   : > { %5791 = vmatmul.mubr.msk.bf16.gmra.mrb[148].mxu0 %vm11507_vm6, %v9191_v19  ;;  %v6443_v25 = vpop.f32.mrb[45].mxu1  ;;  %6632 = vmatprep.subr.bf16.mxu0 %v7830_v12  ;;  %vm11509_vm6 = vnez %v11393_v17 }
 0x1bd   : > { %11506 = vst [vmem:[#allocation15_spill] sm:$0xff] %v9626_v11  ;;  %2727 = vmatprep.mubr.bf16.mxu0 %v9203_v53  ;;  %v9632_v43 = vadd.f32 %v6443_v25, %v6442_v49  ;;  %v6445_v34 = vpop.f32.mrb[46].mxu1  ;;  %6633 = vmatpush3.bf16.msra.mxu0 %v7832_v39 }
 0x1be   : > { %v6446_v35 = vpop.f32.mrb[47].mxu1  ;;  %7197 = vmatpush3.bf16.msra.mxu1 %v7835_v3 }
 0x1bf   : > { %v6306_v52 = vpop.f32.mrb[44].mxu0  ;;  %v9634_v47 = vadd.f32 %v6446_v35, %v6445_v34  ;;  %7198 = vmatprep.subr.bf16.mxu1 %v7837_v62 }
 0x1c0   : > { %v6307_v23 = vpop.f32.mrb[45].mxu0 }
 0x1c1   : > { %11508 = vst [vmem:[#allocation16_spill] sm:$0xff] %v9634_v47  ;;  %v9636_v60 = vadd.f32 %v6307_v23, %v6306_v52  ;;  %v6309_v19 = vpop.f32.mrb[46].mxu0 }
 0x1c2   : > { %v6310_v58 = vpop.f32.mrb[47].mxu0  ;;  %7199 = vmatpush3.bf16.msra.mxu1 %v7837_v62 }
 0x1c3   : > { %v9638_v53 = vadd.f32 %v6310_v58, %v6309_v19  ;;  %v6448_v49 = vpop.f32.mrb[48].mxu1 }
 0x1c4   : > { %5795 = vmatmul.mubr.msk.bf16.gmra.mrb[152].mxu0 %vm11509_vm6, %v9223_v20  ;;  %v6449_v25 = vpop.f32.mrb[49].mxu1 }
 0x1c5   : > { %2735 = vmatprep.mubr.bf16.mxu0 %v11398_v55  ;;  %v9644_v34 = vadd.f32 %v6449_v25, %v6448_v49  ;;  %v6451_v52 = vpop.f32.mrb[50].mxu1  ;;  %v7836_v49 = vld [vmem:[#allocation8 + $0x108] sm:$0xff]  }
 0x1c6   : > { %v6452_v23 = vpop.f32.mrb[51].mxu1  ;;  %v7838_v25 = vld [vmem:[#allocation8 + $0xc8] sm:$0xff]   ;;  %6634 = vmatprep.subr.bf16.mxu0 %v7836_v49 }
 0x1c7   : > { %11510 = vst [vmem:[#allocation18_spill] sm:$0xff] %v9644_v34  ;;  %v6312_v35 = vpop.f32.mrb[48].mxu0  ;;  %v9646_v12 = vadd.f32 %v6452_v23, %v6451_v52  ;;  %6635 = vmatpush3.bf16.msra.mxu0 %v7838_v25 }
 0x1c8   : > { %v6313_v58 = vpop.f32.mrb[49].mxu0 }
 0x1c9   : > { %11511 = vst [vmem:[#allocation19_spill] sm:$0xff] %v9646_v12  ;;  %v9648_v39 = vadd.f32 %v6313_v58, %v6312_v35  ;;  %v6315_v19 = vpop.f32.mrb[50].mxu0 }
 0x1ca   : > { %v6316_v20 = vpop.f32.mrb[51].mxu0 }
 0x1cb   : > { %11512 = vst [vmem:[#allocation21_spill] sm:$0xff] %v9648_v39  ;;  %v9650_v17 = vadd.f32 %v6316_v20, %v6315_v19  ;;  %v6454_v3 = vpop.f32.mrb[52].mxu1 }
 0x1cc   : > { %2736 = vmatmul.mubr.bf16.gmra.mrb[156].mxu0 %v11398_v55  ;;  %v6455_v2 = vpop.f32.mrb[53].mxu1 }
 0x1cd   : > { %11513 = vst [vmem:[#allocation23_spill] sm:$0xff] %v9650_v17  ;;  %v9653_v34 = vadd.f32 %v6455_v2, %v6454_v3  ;;  %v6457_v24 = vpop.f32.mrb[54].mxu1 }
 0x1ce   : > { %v6458_v11 = vpop.f32.mrb[55].mxu1 }
 0x1cf   : > { %11514 = vst [vmem:[#allocation22_spill] sm:$0xff] %v9653_v34  ;;  %v6318_v47 = vpop.f32.mrb[52].mxu0  ;;  %v9655_v62 = vadd.f32 %v6458_v11, %v6457_v24 }
 0x1d0   : > { %v6319_v52 = vpop.f32.mrb[53].mxu0 }
 0x1d1   : > { %11515 = vst [vmem:[#allocation25_spill] sm:$0xff] %v9655_v62  ;;  %v9657_v35 = vadd.f32 %v6319_v52, %v6318_v47  ;;  %v6321_v23 = vpop.f32.mrb[54].mxu0 }
 0x1d2   : > { %v6322_v58 = vpop.f32.mrb[55].mxu0 }
 0x1d3   : > { %11516 = vst [vmem:[#allocation26_spill] sm:$0xff] %v9657_v35  ;;  %v9659_v19 = vadd.f32 %v6322_v58, %v6321_v23  ;;  %v6460_v20 = vpop.f32.mrb[56].mxu1  ;;  %v7839_v23 = vld [vmem:[#allocation8 + $0x110] sm:$0xff]  }
 0x1d4   : > { %v6461_v55 = vpop.f32.mrb[57].mxu1  ;;  %v7840_v58 = vld [vmem:[#allocation8 + $0xd0] sm:$0xff]   ;;  %6636 = vmatprep.subr.bf16.mxu0 %v7839_v23 }
 0x1d5   : > { %11517 = vst [vmem:[#allocation28_spill] sm:$0xff] %v9659_v19  ;;  %v9661_v12 = vadd.f32 %v6461_v55, %v6460_v20  ;;  %v6463_v2 = vpop.f32.mrb[58].mxu1  ;;  %6637 = vmatpush3.bf16.msra.mxu0 %v7840_v58 }
 0x1d6   : > { %v6464_v17 = vpop.f32.mrb[59].mxu1 }
 0x1d7   : > { %11518 = vst [vmem:[#allocation27_spill] sm:$0xff] %v9661_v12  ;;  %v6324_v3 = vpop.f32.mrb[56].mxu0  ;;  %v9663_v39 = vadd.f32 %v6464_v17, %v6463_v2 }
 0x1d8   : > { %v6325_v34 = vpop.f32.mrb[57].mxu0 }
 0x1d9   : > { %11519 = vst [vmem:[#allocation30_spill] sm:$0xff] %v9663_v39  ;;  %v9665_v49 = vadd.f32 %v6325_v34, %v6324_v3  ;;  %v6327_v24 = vpop.f32.mrb[58].mxu0 }
 0x1da   : > { %v6328_v11 = vpop.f32.mrb[59].mxu0 }
 0x1db   : > { %v9667_v47 = vadd.f32 %v6328_v11, %v6327_v24  ;;  %v6466_v25 = vpop.f32.mrb[60].mxu1 }
 0x1dc   : > { %v6467_v52 = vpop.f32.mrb[61].mxu1 }
 0x1dd   : > { %11520 = vst [vmem:[#allocation29_spill] sm:$0xff] %v9667_v47  ;;  %v9669_v62 = vadd.f32 %v6467_v52, %v6466_v25  ;;  %v6469_v55 = vpop.f32.mrb[62].mxu1 }
 0x1de   : > { %v6470_v12 = vpop.f32.mrb[63].mxu1 }
 0x1df   : > { %v6330_v20 = vpop.f32.mrb[60].mxu0  ;;  %v9671_v35 = vadd.f32 %v6470_v12, %v6469_v55 }
 0x1e0   : > { %v6331_v19 = vpop.f32.mrb[61].mxu0 }
 0x1e1   : > { %v9673_v17 = vadd.f32 %v6331_v19, %v6330_v20  ;;  %v6333_v34 = vpop.f32.mrb[62].mxu0  ;;  %v7841_v20 = vld [vmem:[#allocation8 + $0x118] sm:$0xff]  }
 0x1e2   : > { %v6334_v2 = vpop.f32.mrb[63].mxu0  ;;  %6638 = vmatprep.subr.bf16.mxu0 %v7841_v20 }
 0x1e3   : > { %v9675_v3 = vadd.f32 %v6334_v2, %v6333_v34 }
 0x1e7   : > { %v7058_v24 = vpop.f32.mrb[64].mxu0 }
 0x1e8   : > { %v1759_v11 = vadd.f32 %v7058_v24, %v9500_v1  ;;  %v1750_v39 = vpop.f32.mrb[65].mxu0 }
 0x1e9   : > { %v1751_v25 = vadd.f32 %v9482_v27, %v1750_v39  ;;  %v7059_v52 = vpop.f32.mrb[66].mxu0  ;;  %v7842_v27 = vld [vmem:[#allocation8 + $0xd8] sm:$0xff]  }
 0x1ea   : > { %v9680_v47 = vadd.f32 %v9493_v32, %v1759_v11  ;;  %v1762_v12 = vadd.f32 %v7059_v52, %v9505_v15  ;;  %v1753_v23 = vpop.f32.mrb[67].mxu0  ;;  %6639 = vmatpush3.bf16.msra.mxu0 %v7842_v27 }
 0x1eb   : > { %v9684_v19 = vadd.f32 %v9475_v63, %v1751_v25  ;;  %v1754_v58 = vadd.f32 %v9487_v7, %v1753_v23 }
 0x1ec   : > { %v9688_v55 = vadd.f32 %v9495_v57, %v1762_v12 }
 0x1ed   : > { %v9691_v1 = vadd.f32 %v9477_v10, %v1754_v58  ;;  %v7843_v58 = vld [vmem:[#allocation8 + $0x120] sm:$0xff]  }
 0x1ee   : > { %6640 = vmatprep.subr.bf16.mxu0 %v7843_v58 }
 0x1ef   : > { %v7062_v39 = vpop.f32.mrb[68].mxu0 }
 0x1f0   : > { %v1775_v32 = vadd.f32 %v7062_v39, %v9536_v46  ;;  %v1766_v34 = vpop.f32.mrb[69].mxu0 }
 0x1f1   : > { %v1767_v15 = vadd.f32 %v9518_v44, %v1766_v34  ;;  %v7063_v63 = vpop.f32.mrb[70].mxu0 }
 0x1f2   : > { %v9696_v2 = vadd.f32 %v9529_v51, %v1775_v32  ;;  %v1778_v57 = vadd.f32 %v7063_v63, %v9541_v61  ;;  %v1769_v7 = vpop.f32.mrb[71].mxu0 }
 0x1f3   : > { %v9700_v10 = vadd.f32 %v9511_v33, %v1767_v15  ;;  %v1770_v24 = vadd.f32 %v9523_v29, %v1769_v7  ;;  %v9741_v15 = vld [vmem:[#allocation8 + $0x80] sm:$0xff]  }
 0x1f4   : > { %v9704_v11 = vadd.f32 %v9531_v9, %v1778_v57  ;;  %7232 = vmatprep.subr.bf16.mxu1 %v9741_v15 }
 0x1f5   : > { %v9707_v46 = vadd.f32 %v9513_v13, %v1770_v24 }
 0x1f7   : > { %v7066_v25 = vpop.f32.mrb[72].mxu0 }
 0x1f8   : > { %v1791_v44 = vadd.f32 %v7066_v25, %v9564_v30  ;;  %v1782_v52 = vpop.f32.mrb[73].mxu0  ;;  %v7847_v25 = vld [vmem:[#allocation8 + $0x128] sm:$0xff]  }
 0x1f9   : > { %v1783_v51 = vadd.f32 %v9552_v8, %v1782_v52  ;;  %v7067_v12 = vpop.f32.mrb[74].mxu0  ;;  %v7844_v8 = vld [vmem:[#allocation8 + $0xe0] sm:$0xff]  }
 0x1fa   : > { %v9712_v61 = vadd.f32 %v9560_v50, %v1791_v44  ;;  %v1794_v33 = vadd.f32 %v7067_v12, %v9566_v5  ;;  %v1785_v23 = vpop.f32.mrb[75].mxu0  ;;  %6641 = vmatpush3.bf16.msra.mxu0 %v7844_v8  ;;  %v11521_v12 = vld [vmem:[#allocation15_spill] sm:$0xff] }
 0x1fb   : > { %v9716_v29 = vadd.f32 %v9547_v40, %v1783_v51  ;;  %v1786_v9 = vadd.f32 %v9554_v22, %v1785_v23  ;;  %6642 = vmatprep.subr.bf16.mxu0 %v7847_v25  ;;  %v11522_v23 = vld [vmem:[#allocation16_spill] sm:$0xff]  ;;  %v7852_v25 = vld [vmem:[#allocation8 + $0xf0] sm:$0xff]  }
 0x1fc   : > { %v9720_v13 = vadd.f32 %v9562_v31, %v1794_v33 }
 0x1fd   : > { %v9723_v30 = vadd.f32 %v9549_v28, %v1786_v9 }
 0x1ff   : > { %v7070_v20 = vpop.f32.mrb[76].mxu0 }
 0x200   : > { %v1807_v50 = vadd.f32 %v7070_v20, %v9588_v16  ;;  %v1798_v27 = vpop.f32.mrb[77].mxu0 }
 0x201   : > { %v1799_v5 = vadd.f32 %v9576_v6, %v1798_v27  ;;  %v7071_v40 = vpop.f32.mrb[78].mxu0 }
 0x202   : > { %v9728_v39 = vadd.f32 %v9584_v38, %v1807_v50  ;;  %v1810_v31 = vadd.f32 %v7071_v40, %v9590_v14  ;;  %v1801_v22 = vpop.f32.mrb[79].mxu0 }
 0x203   : > { %v9732_v28 = vadd.f32 %v9572_v41, %v1799_v5  ;;  %v1802_v32 = vadd.f32 %v9578_v18, %v1801_v22 }
 0x204   : > { %v9736_v34 = vadd.f32 %v9586_v54, %v1810_v31 }
 0x205   : > { %v9739_v16 = vadd.f32 %v9574_v4, %v1802_v32  ;;  %v11528_v32 = vld [vmem:[#allocation18_spill] sm:$0xff] }
 0x207   : > { %v7074_v6 = vpop.f32.mrb[80].mxu0 }
 0x208   : > { %v1823_v38 = vadd.f32 %v7074_v6, %v9612_v36  ;;  %v1814_v14 = vpop.f32.mrb[81].mxu0 }
 0x209   : > { %v1815_v63 = vadd.f32 %v9600_v48, %v1814_v14  ;;  %v7075_v41 = vpop.f32.mrb[82].mxu0  ;;  %v7848_v48 = vld [vmem:[#allocation8 + $0xe8] sm:$0xff]  }
 0x20a   : > { %v9747_v57 = vadd.f32 %v9608_v37, %v1823_v38  ;;  %v1826_v54 = vadd.f32 %v7075_v41, %v9614_v26  ;;  %v1817_v18 = vpop.f32.mrb[83].mxu0  ;;  %6643 = vmatpush3.bf16.msra.mxu0 %v7848_v48  ;;  %v11529_v38 = vld [vmem:[#allocation23_spill] sm:$0xff] }
 0x20b   : > { %v9751_v4 = vadd.f32 %v9596_v45, %v1815_v63  ;;  %v1818_v7 = vadd.f32 %v9602_v21, %v1817_v18  ;;  %v11530_v63 = vld [vmem:[#allocation25_spill] sm:$0xff] }
 0x20c   : > { %v9755_v24 = vadd.f32 %v9610_v56, %v1826_v54  ;;  %v11531_v54 = vld [vmem:[#allocation19_spill] sm:$0xff] }
 0x20d   : > { %v9758_v36 = vadd.f32 %v9598_v42, %v1818_v7  ;;  %v7851_v7 = vld [vmem:[#allocation8 + $0x130] sm:$0xff]  }
 0x20e   : > { %6644 = vmatprep.subr.bf16.mxu0 %v7851_v7 }
 0x20f   : > { %v7078_v44 = vpop.f32.mrb[84].mxu0  ;;  %6645 = vmatpush3.bf16.msra.mxu0 %v7852_v25 }
 0x210   : > { %v1839_v37 = vadd.f32 %v7078_v44, %v9636_v60  ;;  %v1830_v52 = vpop.f32.mrb[85].mxu0  ;;  %v11523_v60 = vld [vmem:[#allocation46_spill] sm:$0xff] }
 0x211   : > { %v1831_v26 = vadd.f32 %v9624_v0, %v1830_v52  ;;  %v7079_v45 = vpop.f32.mrb[86].mxu0  ;;  %v11524_v0 = vld [vmem:[#allocation26_spill] sm:$0xff] }
 0x212   : > { %v9763_v51 = vadd.f32 %v9632_v43, %v1839_v37  ;;  %v1842_v21 = vadd.f32 %v7079_v45, %v9638_v53  ;;  %v1833_v56 = vpop.f32.mrb[87].mxu0  ;;  %v11525_v43 = vld [vmem:[#allocation21_spill] sm:$0xff]  ;;  %v11526_v53 = vld [vmem:[#allocation22_spill] sm:$0xff] }
 0x213   : > { %v9767_v42 = vadd.f32 %v9620_v59, %v1831_v26  ;;  %v1834_v33 = vadd.f32 %v11521_v12, %v1833_v56  ;;  %v11527_v59 = vld [vmem:[#allocation28_spill] sm:$0xff]  ;;  %v11532_v12 = vld [vmem:[#allocation27_spill] sm:$0xff] }
 0x214   : > { %v9771_v9 = vadd.f32 %v11522_v23, %v1842_v21  ;;  %v11533_v23 = vld [vmem:[#allocation29_spill] sm:$0xff] }
 0x215   : > { %v9774_v58 = vadd.f32 %v11523_v60, %v1834_v33 }
 0x217   : > { %v7082_v8 = vpop.f32.mrb[88].mxu0 }
 0x218   : > { %v1855_v20 = vadd.f32 %v7082_v8, %v11524_v0  ;;  %v1846_v50 = vpop.f32.mrb[89].mxu0  ;;  %v11534_v0 = vld [vmem:[#allocation30_spill] sm:$0xff] }
 0x219   : > { %v1847_v27 = vadd.f32 %v11525_v43, %v1846_v50  ;;  %v7083_v5 = vpop.f32.mrb[90].mxu0 }
 0x21a   : > { %v9779_v40 = vadd.f32 %v11526_v53, %v1855_v20  ;;  %v1858_v31 = vadd.f32 %v7083_v5, %v11527_v59  ;;  %v1849_v22 = vpop.f32.mrb[91].mxu0 }
 0x21b   : > { %v9783_v6 = vadd.f32 %v11528_v32, %v1847_v27  ;;  %v1850_v14 = vadd.f32 %v11529_v38, %v1849_v22 }
 0x21c   : > { %v9787_v41 = vadd.f32 %v11530_v63, %v1858_v31  ;;  %v9820_v63 = vld [vmem:[%s11027_s3] ss:$0 sm:$0xff] }
 0x21d   : > { %v9790_v18 = vadd.f32 %v11531_v54, %v1850_v14 }
 0x21f   : > { %v7086_v48 = vpop.f32.mrb[92].mxu0 }
 0x220   : > { %v1871_v44 = vadd.f32 %v7086_v48, %v9673_v17  ;;  %v1862_v37 = vpop.f32.mrb[93].mxu0 }
 0x221   : > { %v1863_v52 = vadd.f32 %v9665_v49, %v1862_v37  ;;  %v7087_v26 = vpop.f32.mrb[94].mxu0 }
 0x222   : > { %v9795_v45 = vadd.f32 %v9669_v62, %v1871_v44  ;;  %v1874_v21 = vadd.f32 %v7087_v26, %v9675_v3  ;;  %v1865_v56 = vpop.f32.mrb[95].mxu0  ;;  %v7855_v44 = vld [vmem:[#allocation8 + $0x138] sm:$0xff]  }
 0x223   : > { %v9799_v33 = vadd.f32 %v11532_v12, %v1863_v52  ;;  %v1866_v60 = vadd.f32 %v11533_v23, %v1865_v56  ;;  %v7154_v17 = vpop.f32.mrb[64].mxu1  ;;  %v7856_v52 = vld [vmem:[#allocation8 + $0xf8] sm:$0xff]   ;;  %6646 = vmatprep.subr.bf16.mxu0 %v7855_v44  ;;  %v11536_v44 = vld [vmem:[#allocation13_spill] sm:$0xff] }
 0x224   : > { %v9803_v8 = vadd.f32 %v9671_v35, %v1874_v21  ;;  %v2778_v49 = vpop.f32.mrb[65].mxu1  ;;  %v9812_v35 = vld [vmem:[%s11026_s2] ss:$0 sm:$0xff]  ;;  %6647 = vmatpush3.bf16.msra.mxu0 %v7856_v52  ;;  %vm11537_vm6 = vcmp.lt.s32.totalorder %v11536_v44, 1  ;;  %vm11541_vm5 = vcmp.lt.s32.totalorder %v11536_v44, 1 }
 0x225   : > { %v9806_v20 = vadd.f32 %v11534_v0, %v1866_v60  ;;  %v7155_v50 = vpop.f32.mrb[66].mxu1 }
 0x226   : > { %v2781_v62 = vpop.f32.mrb[67].mxu1 }
 0x227   : > { %v6512_v43 = vpop.f32.mrb[96].mxu0 }
 0x228   : > { %v6513_v27 = vpop.f32.mrb[97].mxu0 }
 0x229   : > { %v6514_v5 = vadd.f32 %v6513_v27, %v6512_v43  ;;  %v6515_v3 = vpop.f32.mrb[98].mxu0 }
 0x22a   : > { %v6516_v53 = vpop.f32.mrb[99].mxu0 }
 0x22b   : > { %v7334_v59 = vadd.f32 %v6514_v5, %v9684_v19  ;;  %v6517_v31 = vadd.f32 %v6516_v53, %v6515_v3  ;;  %v9814_v22 = vpop.f32.mrb[68].mxu1  ;;  %v7859_v3 = vld [vmem:[#allocation8 + $0x40] sm:$0xff]  }
 0x22c   : > { %v2794_v14 = vpop.f32.mrb[69].mxu1  ;;  %6768 = vmatprep.subr.bf16.mxu0 %v7859_v3 }
 0x22d   : > { %v7335_v32 = vadd.f32 %v7334_v59, %v2778_v49  ;;  %v7342_v38 = vadd.f32 %v6517_v31, %v9691_v1  ;;  %v9822_v54 = vpop.f32.mrb[70].mxu1 }
 0x22e   : > { %v2797_v48 = vpop.f32.mrb[71].mxu1 }
 0x22f   : > { %v2944_v19 = vmul.f32 %v7335_v32, %v9812_v35  ;;  %v7343_v7 = vadd.f32 %v7342_v38, %v2781_v62  ;;  %v6518_v25 = vpop.f32.mrb[100].mxu0 }
 0x230   : > { %v6519_v37 = vpop.f32.mrb[101].mxu0 }
 0x231   : > { %v2983_v26 = vadd.f32 %v9820_v63, %v2944_v19  ;;  %v2945_v1 = vmul.f32 %v7343_v7, %v9812_v35  ;;  %v6520_v21 = vadd.f32 %v6519_v37, %v6518_v25  ;;  %v6521_v56 = vpop.f32.mrb[102].mxu0 }
 0x232   : > { %v6522_v12 = vpop.f32.mrb[103].mxu0 }
 0x233   : > { %v9827_v23 = vmax.f32 %v2983_v26, 0.0  ;;  %v2984_v60 = vadd.f32 %v9820_v63, %v2945_v1  ;;  %v7330_v0 = vadd.f32 %v6520_v21, %v9680_v47  ;;  %v6523_v49 = vadd.f32 %v6522_v12, %v6521_v56  ;;  %v9831_v43 = vpop.f32.mrb[72].mxu1 }
 0x234   : > { %v9833_v5 = vpop.f32.mrb[73].mxu1 }
 0x235   : > { %v3016_v62 = vmax.f32 %v2984_v60, 0.0  ;;  %v7331_v27 = vadd.f32 %v7330_v0, %v7154_v17  ;;  %v7338_v53 = vadd.f32 %v6523_v49, %v9688_v55  ;;  %v9836_v59 = vpop.f32.mrb[74].mxu1  ;;  %v11184_v31 = vrot.slane %v9827_v23, 7 }
 0x236   : > { %v9843_v7 = vpop.f32.mrb[75].mxu1  ;;  %v11185_v0 = vrot.slane %v9827_v23, 1 }
 0x237   : > { %v3080_v32 = vrot.slane %v3016_v62, 7  ;;  %v2946_v38 = vmul.f32 %v7331_v27, %v9812_v35  ;;  %v6524_v19 = vpop.f32.mrb[104].mxu0  ;;  %v9841_v47 = vpack.c.bf16 %v3016_v62, %v9827_v23  ;;  %v7339_v17 = vadd.f32 %v7338_v53, %v7155_v50 }
 0x238   : > { %v6525_v25 = vpop.f32.mrb[105].mxu0  ;;  %v3208_v1 = vrot.slane %v3016_v62, 1 }
 0x239   : > { %11535 = vst [vmem:[#allocation32_spill] sm:$0xff] %v9841_v47  ;;  %v9849_v55 = vsel %vm11537_vm6, %v11184_v31, %v3080_v32  ;;  %v2985_v37 = vadd.f32 %v9820_v63, %v2946_v38  ;;  %v6526_v52 = vadd.f32 %v6525_v25, %v6524_v19  ;;  %v6527_v26 = vpop.f32.mrb[106].mxu0  ;;  %3658 = vmatprep.mubr.bf16.mxu0 %v9841_v47  ;;  %vm11539_vm6 = vcmp.lt.s32.totalorder %v11536_v44, 7 }
 0x23a   : > { %11538 = vst [vmem:[#allocation15_spill] sm:$0xff] %v9849_v55  ;;  %v2947_v21 = vmul.f32 %v7339_v17, %v9812_v35  ;;  %v6528_v56 = vpop.f32.mrb[107].mxu0  ;;  %vm11540_vm7 = vmmov %vm11539_vm6  ;;  %v11544_v55 = vld [vmem:[#allocation56_spill] sm:$0xff] }
 0x23b   : > { %v3017_v12 = vmax.f32 %v2985_v37, 0.0  ;;  %v7350_v50 = vadd.f32 %v6526_v52, %v9700_v10  ;;  %v6529_v60 = vadd.f32 %v6528_v56, %v6527_v26  ;;  %v9857_v27 = vpop.f32.mrb[76].mxu1  ;;  %v3269_v10 = vsel %vm11539_vm6, %v11185_v0, %v3208_v1 }
 0x23c   : > { %v2986_v49 = vadd.f32 %v9820_v63, %v2947_v21  ;;  %v9860_v38 = vpop.f32.mrb[77].mxu1 }
 0x23d   : > { %v7351_v3 = vadd.f32 %v7350_v50, %v2794_v14  ;;  %v7358_v53 = vadd.f32 %v6529_v60, %v9707_v46  ;;  %v3209_v19 = vrot.slane %v3017_v12, 1  ;;  %v3081_v62 = vrot.slane %v3017_v12, 7  ;;  %v9862_v17 = vpop.f32.mrb[78].mxu1 }
 0x23e   : > { %v3018_v25 = vmax.f32 %v2986_v49, 0.0  ;;  %v9869_v21 = vpop.f32.mrb[79].mxu1 }
 0x23f   : > { %v2948_v37 = vmul.f32 %v7351_v3, %v9812_v35  ;;  %v7359_v52 = vadd.f32 %v7358_v53, %v2797_v48  ;;  %v6530_v26 = vpop.f32.mrb[108].mxu0  ;;  %v3268_v46 = vsel %vm11540_vm7, %v3208_v1, %v3209_v19  ;;  %v3140_v14 = vsel %vm11541_vm5, %v3080_v32, %v3081_v62 }
 0x240   : > { %v3210_v56 = vrot.slane %v3018_v25, 1  ;;  %v6531_v50 = vpop.f32.mrb[109].mxu0  ;;  %v9875_v60 = vpack.c.bf16 %v3268_v46, %v3269_v10  ;;  %v9877_v49 = vpack.c.bf16 %v3018_v25, %v3017_v12  ;;  %v3082_v31 = vrot.slane %v3018_v25, 7 }
 0x241   : > { %v2987_v0 = vadd.f32 %v9820_v63, %v2948_v37  ;;  %v2949_v48 = vmul.f32 %v7359_v52, %v9812_v35  ;;  %v6532_v3 = vadd.f32 %v6531_v50, %v6530_v26  ;;  %v6533_v53 = vpop.f32.mrb[110].mxu0  ;;  %vm11545_vm5 = vnez %v11544_v55 }
 0x242   : > { %11542 = vst [vmem:[#allocation16_spill] sm:$0xff] %v9875_v60  ;;  %11543 = vst [vmem:[#allocation46_spill] sm:$0xff] %v9877_v49  ;;  %v6534_v47 = vpop.f32.mrb[111].mxu0  ;;  %v3267_v1 = vsel %vm11539_vm6, %v3209_v19, %v3210_v56  ;;  %7200 = vmatprep.mubr.msk.bf16.mxu1 %vm11545_vm5, %v9875_v60  ;;  %vm11546_vm7 = vcmp.lt.s32.totalorder %v11536_v44, 1 }
 0x243   : > { %v3139_v32 = vsel %vm11546_vm7, %v3081_v62, %v3082_v31  ;;  %v3019_v12 = vmax.f32 %v2987_v0, 0.0  ;;  %v2988_v25 = vadd.f32 %v9820_v63, %v2949_v48  ;;  %v7346_v10 = vadd.f32 %v6532_v3, %v9696_v2  ;;  %v9890_v52 = vpop.f32.mrb[80].mxu1  ;;  %vm11551_vm5 = vmmov %vm11546_vm7 }
 0x244   : > { %v6535_v37 = vadd.f32 %v6534_v47, %v6533_v53  ;;  %v9892_v26 = vpack.c.bf16 %v3139_v32, %v3140_v14  ;;  %v9896_v60 = vpop.f32.mrb[81].mxu1 }
 0x245   : > { %v3211_v46 = vrot.slane %v3019_v12, 1  ;;  %v3020_v50 = vmax.f32 %v2988_v25, 0.0  ;;  %v7347_v19 = vadd.f32 %v7346_v10, %v9814_v22  ;;  %v9898_v49 = vpop.f32.mrb[82].mxu1  ;;  %v3083_v0 = vrot.slane %v3019_v12, 7 }
 0x246   : > { %11547 = vst [vmem:[#allocation26_spill] sm:$0xff] %v9892_v26  ;;  %v7354_v55 = vadd.f32 %v6535_v37, %v9704_v11  ;;  %v9904_v48 = vpop.f32.mrb[83].mxu1  ;;  %v7846_v11 = vld [vmem:[#allocation8 + $0x88] sm:$0xff]  }
 0x247   : > { %v3266_v62 = vsel %vm11539_vm6, %v3210_v56, %v3211_v46  ;;  %v2950_v2 = vmul.f32 %v7347_v19, %v9812_v35  ;;  %v6536_v14 = vpop.f32.mrb[112].mxu0  ;;  %v3212_v3 = vrot.slane %v3020_v50, 1  ;;  %v9908_v32 = vpack.c.bf16 %v3020_v50, %v3019_v12 }
 0x248   : > { %v7355_v47 = vadd.f32 %v7354_v55, %v9822_v54  ;;  %v6537_v53 = vpop.f32.mrb[113].mxu0  ;;  %v9906_v22 = vpack.c.bf16 %v3266_v62, %v3267_v1  ;;  %v3084_v25 = vrot.slane %v3020_v50, 7  ;;  %v3138_v10 = vsel %vm11546_vm7, %v3082_v31, %v3083_v0 }
 0x249   : > { %11549 = vst [vmem:[#allocation22_spill] sm:$0xff] %v9908_v32  ;;  %v2989_v56 = vadd.f32 %v9820_v63, %v2950_v2  ;;  %v6538_v19 = vadd.f32 %v6537_v53, %v6536_v14  ;;  %v6539_v54 = vpop.f32.mrb[114].mxu0  ;;  %v3265_v55 = vsel %vm11539_vm6, %v3211_v46, %v3212_v3  ;;  %v7849_v46 = vld [vmem:[#allocation8 + $0x90] sm:$0xff]   ;;  %v11638_v44 = vld [vmem:[#allocation46_spill] sm:$0xff] }
 0x24a   : > { %11548 = vst [vmem:[#allocation21_spill] sm:$0xff] %v9906_v22  ;;  %v2951_v37 = vmul.f32 %v7355_v47, %v9812_v35  ;;  %v6540_v26 = vpop.f32.mrb[115].mxu0  ;;  %7201 = vmatmul.mubr.msk.bf16.vlgmr.msra.gmra.mrb[96].mxu1 %vm9250_vm3, %v9906_v22  ;;  %v3137_v12 = vsel %vm11551_vm5, %v3083_v0, %v3084_v25  ;;  %vm11553_vm5 = vmmov %vm11539_vm6 }
 0x24b   : > { %v3021_v50 = vmax.f32 %v2989_v56, 0.0  ;;  %v7366_v62 = vadd.f32 %v6538_v19, %v9716_v29  ;;  %v6541_v2 = vadd.f32 %v6540_v26, %v6539_v54  ;;  %7233 = vmatpush3.bf16.msra.mxu1 %v9741_v15  ;;  %v9924_v47 = vpop.f32.mrb[84].mxu1  ;;  %v9926_v14 = vpack.c.bf16 %v3137_v12, %v3138_v10  ;;  %vm11556_vm6 = vmmov %vm11553_vm5 }
 0x24c   : > { %v2990_v31 = vadd.f32 %v9820_v63, %v2951_v37  ;;  %7234 = vmatprep.subr.bf16.mxu1 %v7846_v11  ;;  %v9930_v0 = vpop.f32.mrb[85].mxu1 }
 0x24d   : > { %11552 = vst [vmem:[#allocation28_spill] sm:$0xff] %v9926_v14  ;;  %v7367_v1 = vadd.f32 %v7366_v62, %v9833_v5  ;;  %v7374_v22 = vadd.f32 %v6541_v2, %v9723_v30  ;;  %v3213_v56 = vrot.slane %v3021_v50, 1  ;;  %v9932_v37 = vpop.f32.mrb[86].mxu1  ;;  %v3085_v29 = vrot.slane %v3021_v50, 7 }
 0x24e   : > { %v3022_v53 = vmax.f32 %v2990_v31, 0.0  ;;  %v9936_v54 = vpop.f32.mrb[87].mxu1  ;;  %v7850_v31 = vld [vmem:[#allocation8 + $0x98] sm:$0xff]  }
 0x24f   : > { %v2952_v26 = vmul.f32 %v7367_v1, %v9812_v35  ;;  %v7375_v15 = vadd.f32 %v7374_v22, %v9843_v7  ;;  %v6542_v19 = vpop.f32.mrb[116].mxu0  ;;  %v3264_v10 = vsel %vm11553_vm5, %v3212_v3, %v3213_v56  ;;  %7235 = vmatpush3.bf16.msra.mxu1 %v7846_v11  ;;  %v3136_v1 = vsel %vm11546_vm7, %v3084_v25, %v3085_v29  ;;  %vm11558_vm5 = vmmov %vm11546_vm7 }
 0x250   : > { %v3214_v12 = vrot.slane %v3022_v53, 1  ;;  %v6543_v5 = vpop.f32.mrb[117].mxu0  ;;  %v9940_v30 = vpack.c.bf16 %v3264_v10, %v3265_v55  ;;  %7236 = vmatprep.subr.bf16.mxu1 %v7849_v46  ;;  %v9942_v62 = vpack.c.bf16 %v3022_v53, %v3021_v50  ;;  %v3086_v2 = vrot.slane %v3022_v53, 7  ;;  %vm11560_vm7 = vmmov %vm11556_vm6 }
 0x251   : > { %v2991_v7 = vadd.f32 %v9820_v63, %v2952_v26  ;;  %v2953_v22 = vmul.f32 %v7375_v15, %v9812_v35  ;;  %v6544_v14 = vadd.f32 %v6543_v5, %v6542_v19  ;;  %v6545_v32 = vpop.f32.mrb[118].mxu0  ;;  %v7853_v19 = vld [vmem:[#allocation8 + $0xa0] sm:$0xff]  }
 0x252   : > { %11554 = vst [vmem:[#allocation18_spill] sm:$0xff] %v9940_v30  ;;  %11555 = vst [vmem:[#allocation23_spill] sm:$0xff] %v9942_v62  ;;  %v3263_v3 = vsel %vm11556_vm6, %v3213_v56, %v3214_v12  ;;  %v6546_v11 = vpop.f32.mrb[119].mxu0  ;;  %7204 = vmatprep.mubr.msk.bf16.mxu1 %vm9258_vm2, %v9940_v30  ;;  %v3135_v50 = vsel %vm11558_vm5, %v3085_v29, %v3086_v2 }
 0x253   : > { %v3023_v53 = vmax.f32 %v2991_v7, 0.0  ;;  %v2992_v25 = vadd.f32 %v9820_v63, %v2953_v22  ;;  %v7362_v26 = vadd.f32 %v6544_v14, %v9712_v61  ;;  %v6547_v10 = vadd.f32 %v6546_v11, %v6545_v32  ;;  %7237 = vmatpush3.bf16.msra.mxu1 %v7849_v46  ;;  %v9957_v15 = vpop.f32.mrb[88].mxu1  ;;  %vm11563_vm6 = vmmov %vm11558_vm5 }
 0x254   : > { %7238 = vmatprep.subr.bf16.mxu1 %v7850_v31  ;;  %v9959_v56 = vpack.c.bf16 %v3135_v50, %v3136_v1  ;;  %v9963_v30 = vpop.f32.mrb[89].mxu1  ;;  %v7854_v50 = vld [vmem:[#allocation8 + $0xa8] sm:$0xff]   ;;  %vm11564_vm5 = vmmov %vm11560_vm7 }
 0x255   : > { %v3024_v5 = vmax.f32 %v2992_v25, 0.0  ;;  %v7363_v62 = vadd.f32 %v7362_v26, %v9831_v43  ;;  %v7370_v55 = vadd.f32 %v6547_v10, %v9720_v13  ;;  %v3215_v29 = vrot.slane %v3023_v53, 1  ;;  %v9965_v7 = vpop.f32.mrb[90].mxu1 }
 0x256   : > { %11559 = vst [vmem:[#allocation25_spill] sm:$0xff] %v9959_v56  ;;  %v3087_v22 = vrot.slane %v3023_v53, 7  ;;  %v9969_v14 = vpop.f32.mrb[91].mxu1 }
 0x257   : > { %v2954_v61 = vmul.f32 %v7363_v62, %v9812_v35  ;;  %v7371_v32 = vadd.f32 %v7370_v55, %v9836_v59  ;;  %v6548_v46 = vpop.f32.mrb[120].mxu0  ;;  %v3262_v1 = vsel %vm11560_vm7, %v3214_v12, %v3215_v29  ;;  %v3216_v11 = vrot.slane %v3024_v5, 1  ;;  %7239 = vmatpush3.bf16.msra.mxu1 %v7850_v31  ;;  %vm11566_vm7 = vmmov %vm11563_vm6 }
 0x258   : > { %v6549_v43 = vpop.f32.mrb[121].mxu0  ;;  %v9973_v13 = vpack.c.bf16 %v3262_v1, %v3263_v3  ;;  %7240 = vmatprep.subr.bf16.mxu1 %v7853_v19  ;;  %v9975_v25 = vpack.c.bf16 %v3024_v5, %v3023_v53  ;;  %v3088_v26 = vrot.slane %v3024_v5, 7  ;;  %v3134_v62 = vsel %vm11563_vm6, %v3086_v2, %v3087_v22  ;;  %vm11568_vm6 = vmmov %vm11564_vm5 }
 0x259   : > { %v2993_v59 = vadd.f32 %v9820_v63, %v2954_v61  ;;  %v2955_v55 = vmul.f32 %v7371_v32, %v9812_v35  ;;  %v6550_v10 = vadd.f32 %v6549_v43, %v6548_v46  ;;  %v6551_v56 = vpop.f32.mrb[122].mxu0  ;;  %v3261_v12 = vsel %vm11564_vm5, %v3215_v29, %v3216_v11  ;;  %v7857_v46 = vld [vmem:[#allocation8 + $0xb0] sm:$0xff]   ;;  %vm11571_vm5 = vmmov %vm11566_vm7 }
 0x25a   : > { %11561 = vst [vmem:[#allocation19_spill] sm:$0xff] %v9973_v13  ;;  %11562 = vst [vmem:[#allocation27_spill] sm:$0xff] %v9975_v25  ;;  %v6552_v31 = vpop.f32.mrb[123].mxu0  ;;  %7205 = vmatmul.mubr.msk.bf16.gmra.mrb[100].mxu1 %vm9277_vm8, %v9973_v13  ;;  %v3133_v53 = vsel %vm11566_vm7, %v3087_v22, %v3088_v26 }
 0x25b   : > { %v3025_v5 = vmax.f32 %v2993_v59, 0.0  ;;  %v2994_v2 = vadd.f32 %v9820_v63, %v2955_v55  ;;  %v7382_v61 = vadd.f32 %v6550_v10, %v9732_v28  ;;  %v6553_v1 = vadd.f32 %v6552_v31, %v6551_v56  ;;  %7241 = vmatpush3.bf16.msra.mxu1 %v7853_v19  ;;  %v9990_v32 = vpop.f32.mrb[92].mxu1  ;;  %vm11572_vm7 = vmmov %vm11568_vm6 }
 0x25c   : > { %7242 = vmatprep.subr.bf16.mxu1 %v7854_v50  ;;  %v9992_v29 = vpack.c.bf16 %v3133_v53, %v3134_v62  ;;  %v9996_v13 = vpop.f32.mrb[93].mxu1  ;;  %v7858_v53 = vld [vmem:[#allocation8 + $0xb8] sm:$0xff]  }
 0x25d   : > { %v3026_v43 = vmax.f32 %v2994_v2, 0.0  ;;  %v7383_v25 = vadd.f32 %v7382_v61, %v9860_v38  ;;  %v7390_v3 = vadd.f32 %v6553_v1, %v9739_v16  ;;  %v3217_v22 = vrot.slane %v3025_v5, 1  ;;  %v9998_v59 = vpop.f32.mrb[94].mxu1 }
 0x25e   : > { %11567 = vst [vmem:[#allocation29_spill] sm:$0xff] %v9992_v29  ;;  %v3089_v55 = vrot.slane %v3025_v5, 7  ;;  %v10002_v10 = vpop.f32.mrb[95].mxu1 }
 0x25f   : > { %v2956_v28 = vmul.f32 %v7383_v25, %v9812_v35  ;;  %v7391_v19 = vadd.f32 %v7390_v3, %v9869_v21  ;;  %v6554_v56 = vpop.f32.mrb[124].mxu0  ;;  %v3260_v62 = vsel %vm11568_vm6, %v3216_v11, %v3217_v22  ;;  %v3218_v31 = vrot.slane %v3026_v43, 1  ;;  %7243 = vmatpush3.bf16.msra.mxu1 %v7854_v50  ;;  %vm11574_vm6 = vmmov %vm11571_vm5 }
 0x260   : > { %v6555_v38 = vpop.f32.mrb[125].mxu0  ;;  %v10006_v16 = vpack.c.bf16 %v3260_v62, %v3261_v12  ;;  %7244 = vmatprep.subr.bf16.mxu1 %v7857_v46  ;;  %v10008_v2 = vpack.c.bf16 %v3026_v43, %v3025_v5  ;;  %v3090_v61 = vrot.slane %v3026_v43, 7  ;;  %v3132_v25 = vsel %vm11571_vm5, %v3088_v26, %v3089_v55  ;;  %vm11575_vm5 = vmmov %vm11572_vm7 }
 0x261   : > { %v2995_v21 = vadd.f32 %v9820_v63, %v2956_v28  ;;  %v2957_v3 = vmul.f32 %v7391_v19, %v9812_v35  ;;  %v6556_v1 = vadd.f32 %v6555_v38, %v6554_v56  ;;  %v6557_v29 = vpop.f32.mrb[126].mxu0  ;;  %v3259_v11 = vsel %vm11572_vm7, %v3217_v22, %v3218_v31  ;;  %v7861_v19 = vld [vmem:[#allocation8 + $0x1c0] sm:$0xff]   ;;  %vm11576_vm7 = vmmov %vm11574_vm6 }
 0x262   : > { %11569 = vst [vmem:[#allocation30_spill] sm:$0xff] %v10006_v16  ;;  %11570 = vst [vmem:[#allocation13_spill] sm:$0xff] %v10008_v2  ;;  %v6558_v50 = vpop.f32.mrb[127].mxu0  ;;  %7208 = vmatprep.mubr.msk.bf16.mxu1 %vm9285_vm4, %v10006_v16  ;;  %v3131_v5 = vsel %vm11574_vm6, %v3089_v55, %v3090_v61 }
 0x263   : > { %v3027_v43 = vmax.f32 %v2995_v21, 0.0  ;;  %v2996_v26 = vadd.f32 %v9820_v63, %v2957_v3  ;;  %v7378_v28 = vadd.f32 %v6556_v1, %v9728_v39  ;;  %v6559_v62 = vadd.f32 %v6558_v50, %v6557_v29  ;;  %7245 = vmatpush3.bf16.msra.mxu1 %v7857_v46  ;;  %vm11577_vm6 = vmmov %vm11575_vm5 }
 0x264   : > { %7246 = vmatprep.subr.bf16.mxu1 %v7858_v53  ;;  %v10023_v56 = vpack.c.bf16 %v3131_v5, %v3132_v25 }
 0x265   : > { %v3028_v22 = vmax.f32 %v2996_v26, 0.0  ;;  %v7379_v38 = vadd.f32 %v7378_v28, %v9857_v27  ;;  %v7386_v2 = vadd.f32 %v6559_v62, %v9736_v34  ;;  %v3219_v12 = vrot.slane %v3027_v43, 1 }
 0x266   : > { %v3091_v16 = vrot.slane %v3027_v43, 7 }
 0x267   : > { %v2958_v55 = vmul.f32 %v7379_v38, %v9812_v35  ;;  %v7387_v21 = vadd.f32 %v7386_v2, %v9862_v17  ;;  %v6560_v3 = vpop.f32.mrb[128].mxu0  ;;  %v3258_v39 = vsel %vm11575_vm5, %v3218_v31, %v3219_v12  ;;  %v3220_v46 = vrot.slane %v3028_v22, 1  ;;  %7247 = vmatpush3.bf16.msra.mxu1 %v7858_v53  ;;  %vm11579_vm5 = vmmov %vm11576_vm7 }
 0x268   : > { %v6561_v29 = vpop.f32.mrb[129].mxu0  ;;  %v10031_v25 = vpack.c.bf16 %v3258_v39, %v3259_v11  ;;  %6904 = vmatprep.subr.bf16.mxu1 %v7861_v19  ;;  %v10033_v1 = vpack.c.bf16 %v3028_v22, %v3027_v43  ;;  %v3092_v27 = vrot.slane %v3028_v22, 7  ;;  %v3130_v34 = vsel %vm11576_vm7, %v3090_v61, %v3091_v16  ;;  %v11578_v11 = vld [vmem:[#allocation34_spill] sm:$0xff]  ;;  %vm11580_vm7 = vmmov %vm11577_vm6 }
 0x269   : > { %v2997_v50 = vadd.f32 %v9820_v63, %v2958_v55  ;;  %v2959_v17 = vmul.f32 %v7387_v21, %v9812_v35  ;;  %v6562_v2 = vadd.f32 %v6561_v29, %v6560_v3  ;;  %v6563_v5 = vpop.f32.mrb[130].mxu0  ;;  %v3257_v31 = vsel %vm11577_vm6, %v3219_v12, %v3220_v46  ;;  %vm11581_vm6 = vmmov %vm11579_vm5 }
 0x26a   : > { %v6564_v53 = vpop.f32.mrb[131].mxu0  ;;  %7209 = vmatmul.mubr.msk.bf16.gmra.mrb[104].mxu1 %vm9303_vm1, %v10031_v25  ;;  %v3129_v43 = vsel %vm11579_vm5, %v3091_v16, %v3092_v27  ;;  %vm11582_vm5 = vmmov %vm11580_vm7 }
 0x26b   : > { %v3029_v26 = vmax.f32 %v2997_v50, 0.0  ;;  %v2998_v61 = vadd.f32 %v9820_v63, %v2959_v17  ;;  %v7398_v28 = vadd.f32 %v6562_v2, %v9751_v4  ;;  %v6565_v62 = vadd.f32 %v6564_v53, %v6563_v5 }
 0x26c   : > { %v10048_v19 = vpack.c.bf16 %v3129_v43, %v3130_v34 }
 0x26d   : > { %v3030_v22 = vmax.f32 %v2998_v61, 0.0  ;;  %v7399_v38 = vadd.f32 %v7398_v28, %v9896_v60  ;;  %v7406_v12 = vadd.f32 %v6565_v62, %v9758_v36  ;;  %v3221_v55 = vrot.slane %v3029_v26, 1  ;;  %v11583_v61 = vld [vmem:[#allocation35_spill] sm:$0xff] }
 0x26e   : > { %v3093_v21 = vrot.slane %v3029_v26, 7 }
 0x26f   : > { %v2960_v3 = vmul.f32 %v7399_v38, %v9812_v35  ;;  %v7407_v39 = vadd.f32 %v7406_v12, %v9904_v48  ;;  %v6566_v16 = vpop.f32.mrb[132].mxu0  ;;  %v3256_v29 = vsel %vm11580_vm7, %v3220_v46, %v3221_v55  ;;  %v3222_v50 = vrot.slane %v3030_v22, 1  ;;  %vm11584_vm7 = vmmov %vm11581_vm6 }
 0x270   : > { %v6567_v4 = vpop.f32.mrb[133].mxu0  ;;  %v10056_v17 = vpack.c.bf16 %v3256_v29, %v3257_v31  ;;  %v10058_v34 = vpack.c.bf16 %v3030_v22, %v3029_v26  ;;  %v3094_v2 = vrot.slane %v3030_v22, 7  ;;  %v3128_v36 = vsel %vm11581_vm6, %v3092_v27, %v3093_v21  ;;  %vm11585_vm6 = vmmov %vm11582_vm5 }
 0x271   : > { %v2999_v60 = vadd.f32 %v9820_v63, %v2960_v3  ;;  %v2961_v5 = vmul.f32 %v7407_v39, %v9812_v35  ;;  %v6568_v53 = vadd.f32 %v6567_v4, %v6566_v16  ;;  %v6569_v48 = vpop.f32.mrb[134].mxu0  ;;  %v3255_v43 = vsel %vm11582_vm5, %v3221_v55, %v3222_v50  ;;  %vm11586_vm5 = vmmov %vm11584_vm7 }
 0x272   : > { %v6570_v46 = vpop.f32.mrb[135].mxu0  ;;  %7212 = vmatprep.mubr.msk.bf16.mxu1 %vm9311_vm14, %v10056_v17  ;;  %v3127_v31 = vsel %vm11584_vm7, %v3093_v21, %v3094_v2  ;;  %vm11587_vm7 = vmmov %vm11585_vm6 }
 0x273   : > { %v3031_v26 = vmax.f32 %v2999_v60, 0.0  ;;  %v3000_v27 = vadd.f32 %v9820_v63, %v2961_v5  ;;  %v7394_v28 = vadd.f32 %v6568_v53, %v9747_v57  ;;  %v6571_v62 = vadd.f32 %v6570_v46, %v6569_v48 }
 0x274   : > { %v10073_v22 = vpack.c.bf16 %v3127_v31, %v3128_v36 }
 0x275   : > { %v3032_v38 = vmax.f32 %v3000_v27, 0.0  ;;  %v7395_v12 = vadd.f32 %v7394_v28, %v9890_v52  ;;  %v7402_v55 = vadd.f32 %v6571_v62, %v9755_v24  ;;  %v3223_v3 = vrot.slane %v3031_v26, 1  ;;  %v11588_v27 = vld [vmem:[#allocation36_spill] sm:$0xff] }
 0x276   : > { %v3095_v39 = vrot.slane %v3031_v26, 7 }
 0x277   : > { %v2962_v16 = vmul.f32 %v7395_v12, %v9812_v35  ;;  %v7403_v29 = vadd.f32 %v7402_v55, %v9898_v49  ;;  %v6572_v21 = vpop.f32.mrb[136].mxu0  ;;  %v3254_v4 = vsel %vm11585_vm6, %v3222_v50, %v3223_v3  ;;  %v3224_v60 = vrot.slane %v3032_v38, 1  ;;  %vm11589_vm6 = vmmov %vm11586_vm5 }
 0x278   : > { %v6573_v57 = vpop.f32.mrb[137].mxu0  ;;  %v10081_v5 = vpack.c.bf16 %v3254_v4, %v3255_v43  ;;  %v10083_v36 = vpack.c.bf16 %v3032_v38, %v3031_v26  ;;  %v3096_v53 = vrot.slane %v3032_v38, 7  ;;  %v3126_v24 = vsel %vm11586_vm5, %v3094_v2, %v3095_v39  ;;  %vm11590_vm5 = vmmov %vm11587_vm7 }
 0x279   : > { %v3001_v52 = vadd.f32 %v9820_v63, %v2962_v16  ;;  %v2963_v48 = vmul.f32 %v7403_v29, %v9812_v35  ;;  %v6574_v46 = vadd.f32 %v6573_v57, %v6572_v21  ;;  %v6575_v49 = vpop.f32.mrb[138].mxu0  ;;  %v3253_v31 = vsel %vm11587_vm7, %v3223_v3, %v3224_v60  ;;  %vm11591_vm7 = vmmov %vm11589_vm6 }
 0x27a   : > { %v6576_v50 = vpop.f32.mrb[139].mxu0  ;;  %7213 = vmatmul.mubr.msk.bf16.gmra.mrb[108].mxu1 %vm9329_vm10, %v10081_v5  ;;  %v3125_v43 = vsel %vm11589_vm6, %v3095_v39, %v3096_v53  ;;  %vm11592_vm6 = vmmov %vm11590_vm5 }
 0x27b   : > { %v3033_v26 = vmax.f32 %v3001_v52, 0.0  ;;  %v3002_v2 = vadd.f32 %v9820_v63, %v2963_v48  ;;  %v7414_v28 = vadd.f32 %v6574_v46, %v9767_v42  ;;  %v6577_v62 = vadd.f32 %v6576_v50, %v6575_v49 }
 0x27c   : > { %v10098_v38 = vpack.c.bf16 %v3125_v43, %v3126_v24 }
 0x27d   : > { %v3034_v12 = vmax.f32 %v3002_v2, 0.0  ;;  %v7415_v55 = vadd.f32 %v7414_v28, %v9930_v0  ;;  %v7422_v3 = vadd.f32 %v6577_v62, %v9774_v58  ;;  %v3225_v16 = vrot.slane %v3033_v26, 1  ;;  %v11593_v2 = vld [vmem:[#allocation38_spill] sm:$0xff] }
 0x27e   : > { %v3097_v29 = vrot.slane %v3033_v26, 7 }
 0x27f   : > { %v2964_v21 = vmul.f32 %v7415_v55, %v9812_v35  ;;  %v7423_v4 = vadd.f32 %v7422_v3, %v9936_v54  ;;  %v6578_v39 = vpop.f32.mrb[140].mxu0  ;;  %v3252_v57 = vsel %vm11590_vm5, %v3224_v60, %v3225_v16  ;;  %v3226_v52 = vrot.slane %v3034_v12, 1  ;;  %vm11594_vm5 = vmmov %vm11591_vm7 }
 0x280   : > { %v6579_v42 = vpop.f32.mrb[141].mxu0  ;;  %v10106_v48 = vpack.c.bf16 %v3252_v57, %v3253_v31  ;;  %v10108_v24 = vpack.c.bf16 %v3034_v12, %v3033_v26  ;;  %v3098_v46 = vrot.slane %v3034_v12, 7  ;;  %v3124_v58 = vsel %vm11591_vm7, %v3096_v53, %v3097_v29  ;;  %vm11595_vm7 = vmmov %vm11592_vm6 }
 0x281   : > { %v3003_v0 = vadd.f32 %v9820_v63, %v2964_v21  ;;  %v2965_v49 = vmul.f32 %v7423_v4, %v9812_v35  ;;  %v6580_v50 = vadd.f32 %v6579_v42, %v6578_v39  ;;  %v6581_v54 = vpop.f32.mrb[142].mxu0  ;;  %v3251_v43 = vsel %vm11592_vm6, %v3225_v16, %v3226_v52  ;;  %vm11596_vm6 = vmmov %vm11594_vm5 }
 0x282   : > { %v6582_v60 = vpop.f32.mrb[143].mxu0  ;;  %7216 = vmatprep.mubr.msk.bf16.mxu1 %vm11481_vm12, %v10106_v48  ;;  %v3123_v31 = vsel %vm11594_vm5, %v3097_v29, %v3098_v46  ;;  %vm11597_vm5 = vmmov %vm11595_vm7 }
 0x283   : > { %v3035_v26 = vmax.f32 %v3003_v0, 0.0  ;;  %v3004_v53 = vadd.f32 %v9820_v63, %v2965_v49  ;;  %v7410_v28 = vadd.f32 %v6580_v50, %v9763_v51  ;;  %v6583_v62 = vadd.f32 %v6582_v60, %v6581_v54 }
 0x284   : > { %v10123_v12 = vpack.c.bf16 %v3123_v31, %v3124_v58 }
 0x285   : > { %v3036_v55 = vmax.f32 %v3004_v53, 0.0  ;;  %v7411_v3 = vadd.f32 %v7410_v28, %v9924_v47  ;;  %v7418_v16 = vadd.f32 %v6583_v62, %v9771_v9  ;;  %v3227_v21 = vrot.slane %v3035_v26, 1  ;;  %v11598_v53 = vld [vmem:[#allocation37_spill] sm:$0xff] }
 0x286   : > { %v3099_v4 = vrot.slane %v3035_v26, 7 }
 0x287   : > { %v2966_v39 = vmul.f32 %v7411_v3, %v9812_v35  ;;  %v7419_v57 = vadd.f32 %v7418_v16, %v9932_v37  ;;  %v6584_v29 = vpop.f32.mrb[144].mxu0  ;;  %v3250_v42 = vsel %vm11595_vm7, %v3226_v52, %v3227_v21  ;;  %v3228_v0 = vrot.slane %v3036_v55, 1  ;;  %vm11599_vm7 = vmmov %vm11596_vm6 }
 0x288   : > { %v6585_v51 = vpop.f32.mrb[145].mxu0  ;;  %v10131_v49 = vpack.c.bf16 %v3250_v42, %v3251_v43  ;;  %v10133_v58 = vpack.c.bf16 %v3036_v55, %v3035_v26  ;;  %v3100_v50 = vrot.slane %v3036_v55, 7  ;;  %v3122_v9 = vsel %vm11596_vm6, %v3098_v46, %v3099_v4  ;;  %vm11600_vm6 = vmmov %vm11597_vm5 }
 0x289   : > { %v3005_v47 = vadd.f32 %v9820_v63, %v2966_v39  ;;  %v2967_v54 = vmul.f32 %v7419_v57, %v9812_v35  ;;  %v6586_v60 = vadd.f32 %v6585_v51, %v6584_v29  ;;  %v6587_v37 = vpop.f32.mrb[146].mxu0  ;;  %v3249_v31 = vsel %vm11597_vm5, %v3227_v21, %v3228_v0  ;;  %vm11601_vm5 = vmmov %vm11599_vm7 }
 0x28a   : > { %v6588_v52 = vpop.f32.mrb[147].mxu0  ;;  %7217 = vmatmul.mubr.msk.bf16.gmra.mrb[112].mxu1 %vm11482_vm0, %v10131_v49  ;;  %v3121_v43 = vsel %vm11599_vm7, %v3099_v4, %v3100_v50  ;;  %vm11602_vm7 = vmmov %vm11600_vm6 }
 0x28b   : > { %v3037_v26 = vmax.f32 %v3005_v47, 0.0  ;;  %v3006_v46 = vadd.f32 %v9820_v63, %v2967_v54  ;;  %v7430_v28 = vadd.f32 %v6586_v60, %v9783_v6  ;;  %v6589_v62 = vadd.f32 %v6588_v52, %v6587_v37 }
 0x28c   : > { %v10148_v55 = vpack.c.bf16 %v3121_v43, %v3122_v9 }
 0x28d   : > { %v3038_v3 = vmax.f32 %v3006_v46, 0.0  ;;  %v7431_v16 = vadd.f32 %v7430_v28, %v9963_v30  ;;  %v7438_v21 = vadd.f32 %v6589_v62, %v9790_v18  ;;  %v3229_v39 = vrot.slane %v3037_v26, 1  ;;  %v11603_v46 = vld [vmem:[#allocation40_spill] sm:$0xff] }
 0x28e   : > { %v3101_v57 = vrot.slane %v3037_v26, 7 }
 0x28f   : > { %v2968_v29 = vmul.f32 %v7431_v16, %v9812_v35  ;;  %v7439_v42 = vadd.f32 %v7438_v21, %v9969_v14  ;;  %v6590_v4 = vpop.f32.mrb[148].mxu0  ;;  %v3248_v51 = vsel %vm11600_vm6, %v3228_v0, %v3229_v39  ;;  %v3230_v47 = vrot.slane %v3038_v3, 1  ;;  %vm11604_vm6 = vmmov %vm11601_vm5 }
 0x290   : > { %v6591_v6 = vpop.f32.mrb[149].mxu0  ;;  %v10156_v54 = vpack.c.bf16 %v3248_v51, %v3249_v31  ;;  %v10158_v9 = vpack.c.bf16 %v3038_v3, %v3037_v26  ;;  %v3102_v60 = vrot.slane %v3038_v3, 7  ;;  %v3120_v18 = vsel %vm11601_vm5, %v3100_v50, %v3101_v57  ;;  %vm11605_vm5 = vmmov %vm11602_vm7 }
 0x291   : > { %v3007_v30 = vadd.f32 %v9820_v63, %v2968_v29  ;;  %v2969_v37 = vmul.f32 %v7439_v42, %v9812_v35  ;;  %v6592_v52 = vadd.f32 %v6591_v6, %v6590_v4  ;;  %v6593_v14 = vpop.f32.mrb[150].mxu0  ;;  %v3247_v43 = vsel %vm11602_vm7, %v3229_v39, %v3230_v47  ;;  %vm11606_vm7 = vmmov %vm11604_vm6 }
 0x292   : > { %v6594_v0 = vpop.f32.mrb[151].mxu0  ;;  %7220 = vmatprep.mubr.msk.bf16.mxu1 %vm11487_vm9, %v10156_v54  ;;  %v3119_v31 = vsel %vm11604_vm6, %v3101_v57, %v3102_v60  ;;  %vm11607_vm6 = vmmov %vm11605_vm5 }
 0x293   : > { %v3039_v26 = vmax.f32 %v3007_v30, 0.0  ;;  %v3008_v50 = vadd.f32 %v9820_v63, %v2969_v37  ;;  %v7426_v28 = vadd.f32 %v6592_v52, %v9779_v40  ;;  %v6595_v62 = vadd.f32 %v6594_v0, %v6593_v14 }
 0x294   : > { %v10173_v3 = vpack.c.bf16 %v3119_v31, %v3120_v18 }
 0x295   : > { %v3040_v16 = vmax.f32 %v3008_v50, 0.0  ;;  %v7427_v21 = vadd.f32 %v7426_v28, %v9957_v15  ;;  %v7434_v39 = vadd.f32 %v6595_v62, %v9787_v41  ;;  %v3231_v29 = vrot.slane %v3039_v26, 1 }
 0x296   : > { %v3103_v42 = vrot.slane %v3039_v26, 7 }
 0x297   : > { %v2970_v4 = vmul.f32 %v7427_v21, %v9812_v35  ;;  %v7435_v51 = vadd.f32 %v7434_v39, %v9965_v7  ;;  %v6596_v57 = vpop.f32.mrb[152].mxu0  ;;  %v3246_v6 = vsel %vm11605_vm5, %v3230_v47, %v3231_v29  ;;  %v3232_v30 = vrot.slane %v3040_v16, 1  ;;  %vm11609_vm5 = vmmov %vm11606_vm7 }
 0x298   : > { %v6597_v40 = vpop.f32.mrb[153].mxu0  ;;  %v10181_v37 = vpack.c.bf16 %v3246_v6, %v3247_v43  ;;  %v10183_v18 = vpack.c.bf16 %v3040_v16, %v3039_v26  ;;  %v3104_v52 = vrot.slane %v3040_v16, 7  ;;  %v3118_v41 = vsel %vm11606_vm7, %v3102_v60, %v3103_v42  ;;  %vm11610_vm7 = vmmov %vm11607_vm6 }
 0x299   : > { %v3009_v15 = vadd.f32 %v9820_v63, %v2970_v4  ;;  %v2971_v14 = vmul.f32 %v7435_v51, %v9812_v35  ;;  %v6598_v0 = vadd.f32 %v6597_v40, %v6596_v57  ;;  %v6599_v7 = vpop.f32.mrb[154].mxu0  ;;  %v3245_v31 = vsel %vm11607_vm6, %v3231_v29, %v3232_v30  ;;  %vm11612_vm6 = vmmov %vm11609_vm5 }
 0x29a   : > { %v6600_v47 = vpop.f32.mrb[155].mxu0  ;;  %7221 = vmatmul.mubr.msk.bf16.gmra.mrb[116].mxu1 %vm11488_vm11, %v10181_v37  ;;  %v3117_v43 = vsel %vm11609_vm5, %v3103_v42, %v3104_v52  ;;  %vm11613_vm5 = vmmov %vm11610_vm7 }
 0x29b   : > { %v3041_v26 = vmax.f32 %v3009_v15, 0.0  ;;  %v3010_v60 = vadd.f32 %v9820_v63, %v2971_v14  ;;  %v7446_v28 = vadd.f32 %v6598_v0, %v9799_v33  ;;  %v6601_v62 = vadd.f32 %v6600_v47, %v6599_v7 }
 0x29c   : > { %v10198_v16 = vpack.c.bf16 %v3117_v43, %v3118_v41 }
 0x29d   : > { %v3042_v21 = vmax.f32 %v3010_v60, 0.0  ;;  %v7447_v39 = vadd.f32 %v7446_v28, %v9996_v13  ;;  %v7454_v29 = vadd.f32 %v6601_v62, %v9806_v20  ;;  %v3233_v4 = vrot.slane %v3041_v26, 1  ;;  %v11614_v60 = vld [vmem:[#allocation42_spill] sm:$0xff] }
 0x29e   : > { %v3105_v51 = vrot.slane %v3041_v26, 7 }
 0x29f   : > { %v2972_v57 = vmul.f32 %v7447_v39, %v9812_v35  ;;  %v7455_v6 = vadd.f32 %v7454_v29, %v10002_v10  ;;  %v6602_v42 = vpop.f32.mrb[156].mxu0  ;;  %v3244_v40 = vsel %vm11610_vm7, %v3232_v30, %v3233_v4  ;;  %v3234_v15 = vrot.slane %v3042_v21, 1  ;;  %vm11615_vm7 = vmmov %vm11612_vm6 }
 0x2a0   : > { %v6603_v33 = vpop.f32.mrb[157].mxu0  ;;  %v10206_v14 = vpack.c.bf16 %v3244_v40, %v3245_v31  ;;  %v10208_v41 = vpack.c.bf16 %v3042_v21, %v3041_v26  ;;  %v3106_v0 = vrot.slane %v3042_v21, 7  ;;  %v3116_v20 = vsel %vm11612_vm6, %v3104_v52, %v3105_v51  ;;  %vm11616_vm6 = vmmov %vm11613_vm5 }
 0x2a1   : > { %v3011_v13 = vadd.f32 %v9820_v63, %v2972_v57  ;;  %v2973_v7 = vmul.f32 %v7455_v6, %v9812_v35  ;;  %v6604_v47 = vadd.f32 %v6603_v33, %v6602_v42  ;;  %v6605_v10 = vpop.f32.mrb[158].mxu0  ;;  %v3243_v43 = vsel %vm11613_vm5, %v3233_v4, %v3234_v15  ;;  %vm11618_vm5 = vmmov %vm11615_vm7 }
 0x2a2   : > { %11611 = vst [vmem:[#allocation34_spill] sm:$0xff] %v10206_v14  ;;  %v6606_v30 = vpop.f32.mrb[159].mxu0  ;;  %7224 = vmatprep.mubr.msk.bf16.mxu1 %vm9389_vm15, %v10206_v14  ;;  %v3115_v31 = vsel %vm11615_vm7, %v3105_v51, %v3106_v0  ;;  %vm11619_vm7 = vmmov %vm11616_vm6 }
 0x2a3   : > { %v3043_v26 = vmax.f32 %v3011_v13, 0.0  ;;  %v3012_v52 = vadd.f32 %v9820_v63, %v2973_v7  ;;  %v7442_v28 = vadd.f32 %v6604_v47, %v9795_v45  ;;  %v6607_v62 = vadd.f32 %v6606_v30, %v6605_v10 }
 0x2a4   : > { %v10223_v21 = vpack.c.bf16 %v3115_v31, %v3116_v20 }
 0x2a5   : > { %v3044_v39 = vmax.f32 %v3012_v52, 0.0  ;;  %v7443_v29 = vadd.f32 %v7442_v28, %v9990_v32  ;;  %v7450_v4 = vadd.f32 %v6607_v62, %v9803_v8  ;;  %v3235_v57 = vrot.slane %v3043_v26, 1 }
 0x2a6   : > { %v3107_v6 = vrot.slane %v3043_v26, 7 }
 0x2a7   : > { %v2974_v42 = vmul.f32 %v7443_v29, %v9812_v35  ;;  %v7451_v40 = vadd.f32 %v7450_v4, %v9998_v59  ;;  %v3242_v51 = vsel %vm11616_vm6, %v3234_v15, %v3235_v57  ;;  %v3236_v33 = vrot.slane %v3044_v39, 1  ;;  %v11620_v59 = vld [vmem:[#allocation43_spill] sm:$0xff]  ;;  %vm11621_vm6 = vmmov %vm11618_vm5 }
 0x2a8   : > { %v10231_v13 = vpack.c.bf16 %v3242_v51, %v3243_v43  ;;  %v10233_v45 = vpack.c.bf16 %v3044_v39, %v3043_v26  ;;  %v3108_v20 = vrot.slane %v3044_v39, 7  ;;  %v3114_v32 = vsel %vm11618_vm5, %v3106_v0, %v3107_v6  ;;  %vm11622_vm5 = vmmov %vm11619_vm7 }
 0x2a9   : > { %v3013_v8 = vadd.f32 %v9820_v63, %v2974_v42  ;;  %v2975_v7 = vmul.f32 %v7451_v40, %v9812_v35  ;;  %v3241_v47 = vsel %vm11619_vm7, %v3235_v57, %v3236_v33  ;;  %vm11624_vm7 = vmmov %vm11621_vm6  ;;  %v11625_v4 = vrot.slane %v9827_v23, 7  ;;  %v7860_v40 = vld [vmem:[#allocation8] sm:$0xff]  }
 0x2aa   : > { %11617 = vst [vmem:[#allocation35_spill] sm:$0xff] %v10231_v13  ;;  %7225 = vmatmul.mubr.msk.bf16.gmra.mrb[120].mxu1 %vm9407_vm13, %v10231_v13  ;;  %v3113_v15 = vsel %vm11621_vm6, %v3107_v6, %v3108_v20  ;;  %vm11626_vm13 = vmmov %vm11622_vm5  ;;  %v11627_v6 = vrot.slane %v9827_v23, 1  ;;  %v11634_v23 = vld [vmem:[#allocation14_spill] sm:$0xff] }
 0x2ab   : > { %v3045_v10 = vmax.f32 %v3013_v8, 0.0  ;;  %v3014_v43 = vadd.f32 %v9820_v63, %v2975_v7  ;;  %v10247_v30 = vpack.c.bf16 %v3113_v15, %v3114_v32  ;;  %vm11628_vm15 = vmmov %vm11621_vm6  ;;  %v7865_v7 = vld [vmem:[#allocation8 + $0x48] sm:$0xff]   ;;  %v11636_v15 = vld [vmem:[#allocation45_spill] sm:$0xff] }
 0x2ad   : > { %v3046_v0 = vmax.f32 %v3014_v43, 0.0  ;;  %v3237_v31 = vrot.slane %v3045_v10, 1  ;;  %v3109_v26 = vrot.slane %v3045_v10, 7  ;;  %v11639_v43 = vmov 0  }
 0x2af   : > { %v3110_v52 = vrot.slane %v3046_v0, 7  ;;  %v3240_v35 = vsel %vm11622_vm5, %v3236_v33, %v3237_v31  ;;  %v3238_v28 = vrot.slane %v3046_v0, 1  ;;  %v10251_v62 = vpack.c.bf16 %v3046_v0, %v3045_v10  ;;  %v11629_v33 = vld [vmem:[#allocation44_spill] sm:$0xff]  ;;  %v7866_v10 = vld [vmem:[#allocation8 + $0x8] sm:$0xff]   ;;  %v7871_v0 = vld [vmem:[#allocation8 + $0x50] sm:$0xff]  }
 0x2b0   : > { %v10253_v39 = vpack.c.bf16 %v3240_v35, %v3241_v47  ;;  %v3112_v29 = vsel %vm11624_vm7, %v3108_v20, %v3109_v26  ;;  %vm11630_vm7 = vnez %v11629_v33  ;;  %v11631_v20 = vld [vmem:[#allocation15_spill] sm:$0xff]  ;;  %v7877_v35 = vld [vmem:[#allocation8 + $0x58] sm:$0xff]  }
 0x2b1   : > { %v3142_v63 = vsel %vm11621_vm6, %v3110_v52, %v11625_v4  ;;  %v3239_v57 = vsel %vm11626_vm13, %v3237_v31, %v3238_v28  ;;  %v3270_v42 = vsel %vm11622_vm5, %v3238_v28, %v11627_v6  ;;  %v3111_v51 = vsel %vm11628_vm15, %v3109_v26, %v3110_v52  ;;  %v7862_v31 = vld [vmem:[#allocation8 + $0x180] sm:$0xff]   ;;  %v7872_v26 = vld [vmem:[#allocation8 + $0x10] sm:$0xff]   ;;  %v7863_v52 = vld [vmem:[#allocation8 + $0x1c8] sm:$0xff]  }
 0x2b2   : > { %11623 = vst [vmem:[#allocation36_spill] sm:$0xff] %v10253_v39  ;;  %7228 = vmatprep.mubr.msk.bf16.mxu1 %vm11630_vm7, %v10253_v39  ;;  %v10273_v32 = vpack.c.bf16 %v11631_v20, %v3142_v63  ;;  %v10275_v8 = vpack.c.bf16 %v3270_v42, %v3239_v57  ;;  %v10277_v47 = vpack.c.bf16 %v3111_v51, %v3112_v29  ;;  %v11640_v28 = vld [vmem:[#allocation26_spill] sm:$0xff]  ;;  %v11641_v29 = vld [vmem:[#allocation17_spill] sm:$0xff]  ;;  %v11643_v4 = vld [vmem:[#allocation16_spill] sm:$0xff] }
 0x2b3   : > { %vm11635_vm13 = vnez %v11634_v23  ;;  %vm11637_vm6 = vnez %v11636_v15  ;;  %vm11642_vm15 = vnez %v11641_v29  ;;  %v11644_v63 = vld [vmem:[#allocation56_spill] sm:$0xff]  ;;  %v11646_v57 = vld [vmem:[#allocation22_spill] sm:$0xff]  ;;  %v11647_v6 = vld [vmem:[#allocation21_spill] sm:$0xff] }
 0x2b4   : > { %11632 = vst [vmem:[#allocation38_spill] sm:$0xff] %v10273_v32  ;;  %11633 = vst [vmem:[#allocation37_spill] sm:$0xff] %v10275_v8  ;;  %5859 = vmatmul.mubr.msk.bf16.vlgmr.msra.gmra.mrb[160].mxu0 %vm11635_vm13, %v10273_v32  ;;  %7229 = vmatmul.mubr.msk.bf16.gmra.mrb[124].mxu1 %vm11637_vm6, %v10275_v8  ;;  %vm11645_vm5 = vnez %v11644_v63  ;;  %v7878_v51 = vld [vmem:[#allocation8 + $0x18] sm:$0xff]   ;;  %v7867_v20 = vld [vmem:[#allocation8 + $0x1d0] sm:$0xff]  }
 0x2b5   : > { %3666 = vmatprep.mubr.bf16.mxu0 %v11638_v44  ;;  %6769 = vmatpush3.bf16.msra.mxu0 %v7860_v40  ;;  %v7864_v40 = vld [vmem:[#allocation8 + $0x188] sm:$0xff]   ;;  %v11649_v15 = vld [vmem:[#allocation28_spill] sm:$0xff]  ;;  %v7890_v23 = vld [vmem:[#allocation8 + $0x30] sm:$0xff]  }
 0x2b6   : > { %7248 = vmatprep.mubr.bf16.mxu1 %v11639_v43  ;;  %6770 = vmatprep.subr.bf16.mxu0 %v7865_v7  ;;  %v7883_v7 = vld [vmem:[#allocation8 + $0x60] sm:$0xff]   ;;  %v7886_v63 = vld [vmem:[#allocation8 + $0x68] sm:$0xff]   ;;  %v11650_v8 = vld [vmem:[#allocation20_spill] sm:$0xff] }
 0x2b7   : > { %v7875_v42 = vld [vmem:[#allocation8 + $0x1e8] sm:$0xff]   ;;  %v11657_v32 = vld [vmem:[#allocation25_spill] sm:$0xff]  ;;  %v11658_v43 = vld [vmem:[#allocation24_spill] sm:$0xff] }
 0x2b8   : > { %vm11659_vm6 = vnez %v11658_v43  ;;  %v7894_v33 = vld [vmem:[#allocation8 + $0x218] sm:$0xff]  }
 0x2b9   : > { %6771 = vmatpush3.bf16.msra.mxu0 %v7866_v10  ;;  %v7868_v10 = vld [vmem:[#allocation8 + $0x190] sm:$0xff]   ;;  %v11720_v43 = vld [vmem:[#allocation44_spill] sm:$0xff] }
 0x2ba   : > { %6772 = vmatprep.subr.bf16.mxu0 %v7871_v0  ;;  %v7884_v0 = vld [vmem:[#allocation8 + $0x20] sm:$0xff]  }
 0x2bc   : > { %5863 = vmatmul.mubr.msk.bf16.gmra.mrb[164].mxu0 %vm11642_vm15, %v11640_v28  ;;  %7249 = vmatmul.mubr.msk.bf16.vlgmr.msra.gmra.mrb[96].mxu1 %vm11645_vm5, %v11643_v4  ;;  %v7869_v4 = vld [vmem:[#allocation8 + $0x1d8] sm:$0xff]   ;;  %vm11651_vm5 = vnez %v11650_v8 }
 0x2bd   : > { %3674 = vmatprep.mubr.bf16.mxu0 %v11646_v57  ;;  %7252 = vmatprep.mubr.msk.bf16.mxu1 %vm9250_vm3, %v11647_v6  ;;  %v7874_v6 = vld [vmem:[#allocation8 + $0x1a0] sm:$0xff]  }
 0x2be   : > { %6905 = vmatpush3.bf16.msra.mxu1 %v7862_v31  ;;  %6773 = vmatpush3.bf16.msra.mxu0 %v7872_v26  ;;  %v11652_v31 = vld [vmem:[#allocation18_spill] sm:$0xff]  ;;  %v11654_v26 = vld [vmem:[#allocation23_spill] sm:$0xff] }
 0x2bf   : > { %6906 = vmatprep.subr.bf16.mxu1 %v7863_v52  ;;  %6774 = vmatprep.subr.bf16.mxu0 %v7877_v35  ;;  %v11655_v52 = vld [vmem:[#allocation19_spill] sm:$0xff] }
 0x2c0   : > { %v11664_v35 = vld [vmem:[#allocation31_spill] sm:$0xff] }
 0x2c2   : > { %6907 = vmatpush3.bf16.msra.mxu1 %v7864_v40  ;;  %6775 = vmatpush3.bf16.msra.mxu0 %v7878_v51  ;;  %v7870_v40 = vld [vmem:[#allocation8 + $0x198] sm:$0xff]   ;;  %v7887_v51 = vld [vmem:[#allocation8 + $0x28] sm:$0xff]  }
 0x2c3   : > { %6908 = vmatprep.subr.bf16.mxu1 %v7867_v20  ;;  %6776 = vmatprep.subr.bf16.mxu0 %v7883_v7  ;;  %v7873_v20 = vld [vmem:[#allocation8 + $0x1e0] sm:$0xff]   ;;  %v7889_v7 = vld [vmem:[#allocation8 + $0x70] sm:$0xff]  }
 0x2c4   : > { %5867 = vmatmul.mubr.msk.bf16.gmra.mrb[168].mxu0 %vm11651_vm5, %v11649_v15  ;;  %7253 = vmatmul.mubr.msk.bf16.gmra.mrb[100].mxu1 %vm9258_vm2, %v11652_v31  ;;  %v7892_v31 = vld [vmem:[#allocation8 + $0x78] sm:$0xff]  }
 0x2c5   : > { %3682 = vmatprep.mubr.bf16.mxu0 %v11654_v26  ;;  %7256 = vmatprep.mubr.msk.bf16.mxu1 %vm9277_vm8, %v11655_v52 }
 0x2c6   : > { %6909 = vmatpush3.bf16.msra.mxu1 %v7868_v10  ;;  %6777 = vmatpush3.bf16.msra.mxu0 %v7884_v0  ;;  %v11660_v10 = vld [vmem:[#allocation30_spill] sm:$0xff]  ;;  %v11662_v0 = vld [vmem:[#allocation27_spill] sm:$0xff] }
 0x2c7   : > { %6910 = vmatprep.subr.bf16.mxu1 %v7869_v4  ;;  %6778 = vmatprep.subr.bf16.mxu0 %v7886_v63  ;;  %v7876_v4 = vld [vmem:[#allocation8 + $0x1a8] sm:$0xff]   ;;  %v7893_v63 = vld [vmem:[#allocation8 + $0x38] sm:$0xff]  }
 0x2ca   : > { %6911 = vmatpush3.bf16.msra.mxu1 %v7870_v40  ;;  %6779 = vmatpush3.bf16.msra.mxu0 %v7887_v51  ;;  %v7879_v40 = vld [vmem:[#allocation8 + $0x1f0] sm:$0xff]  }
 0x2cb   : > { %6912 = vmatprep.subr.bf16.mxu1 %v7873_v20  ;;  %6780 = vmatprep.subr.bf16.mxu0 %v7889_v7  ;;  %v7880_v51 = vld [vmem:[#allocation8 + $0x1b0] sm:$0xff]   ;;  %v7881_v20 = vld [vmem:[#allocation8 + $0x1f8] sm:$0xff]   ;;  %v11663_v7 = vld [vmem:[#allocation29_spill] sm:$0xff] }
 0x2cc   : > { %5871 = vmatmul.mubr.msk.bf16.gmra.mrb[172].mxu0 %vm11659_vm6, %v11657_v32  ;;  %7257 = vmatmul.mubr.msk.bf16.gmra.mrb[104].mxu1 %vm9285_vm4, %v11660_v10  ;;  %vm11665_vm4 = vnez %v11664_v35 }
 0x2cd   : > { %3690 = vmatprep.mubr.bf16.mxu0 %v11662_v0  ;;  %7260 = vmatprep.mubr.msk.bf16.mxu1 %vm9303_vm1, %v10031_v25 }
 0x2ce   : > { %6913 = vmatpush3.bf16.msra.mxu1 %v7874_v6  ;;  %6781 = vmatpush3.bf16.msra.mxu0 %v7890_v23  ;;  %v11666_v6 = vld [vmem:[#allocation13_spill] sm:$0xff]  ;;  %v7882_v23 = vld [vmem:[#allocation8 + $0x1b8] sm:$0xff]  }
 0x2cf   : > { %6914 = vmatprep.subr.bf16.mxu1 %v7875_v42  ;;  %6782 = vmatprep.subr.bf16.mxu0 %v7892_v31  ;;  %v7885_v42 = vld [vmem:[#allocation8 + $0x200] sm:$0xff]  }
 0x2d0   : > { %v11667_v31 = vld [vmem:[#allocation33_spill] sm:$0xff] }
 0x2d1   : > { %vm11668_vm1 = vnez %v11667_v31 }
 0x2d2   : > { %6915 = vmatpush3.bf16.msra.mxu1 %v7876_v4  ;;  %6783 = vmatpush3.bf16.msra.mxu0 %v7893_v63  ;;  %v11669_v4 = vld [vmem:[#allocation41_spill] sm:$0xff]  ;;  %v11671_v63 = vld [vmem:[#allocation47_spill] sm:$0xff] }
 0x2d3   : > { %6916 = vmatprep.subr.bf16.mxu1 %v7879_v40  ;;  %v11675_v40 = vld [vmem:[#allocation48_spill] sm:$0xff] }
 0x2d4   : > { %5875 = vmatmul.mubr.msk.bf16.gmra.mrb[176].mxu0 %vm11665_vm4, %v11663_v7  ;;  %7261 = vmatmul.mubr.msk.bf16.gmra.mrb[108].mxu1 %vm9311_vm14, %v10056_v17  ;;  %vm11674_vm14 = vnez %v11620_v59  ;;  %v11681_v59 = vld [vmem:[#allocation51_spill] sm:$0xff] }
 0x2d5   : > { %3698 = vmatprep.mubr.bf16.mxu0 %v11666_v6  ;;  %7264 = vmatprep.mubr.msk.bf16.mxu1 %vm9329_vm10, %v10081_v5  ;;  %vm11670_vm10 = vnez %v11669_v4 }
 0x2d6   : > { %6917 = vmatpush3.bf16.msra.mxu1 %v7880_v51  ;;  %v7888_v51 = vld [vmem:[#allocation8 + $0x208] sm:$0xff]  }
 0x2d7   : > { %6918 = vmatprep.subr.bf16.mxu1 %v7881_v20  ;;  %v11677_v20 = vld [vmem:[#allocation49_spill] sm:$0xff] }
 0x2da   : > { %6919 = vmatpush3.bf16.msra.mxu1 %v7882_v23  ;;  %v7891_v23 = vld [vmem:[#allocation8 + $0x210] sm:$0xff]  }
 0x2db   : > { %7280 = vmatprep.subr.bf16.mxu1 %v7885_v42 }
 0x2dc   : > { %5879 = vmatmul.mubr.msk.bf16.gmra.mrb[180].mxu0 %vm11668_vm1, %v10023_v56  ;;  %7265 = vmatmul.mubr.msk.bf16.gmra.mrb[112].mxu1 %vm11481_vm12, %v10106_v48  ;;  %vm11672_vm12 = vnez %v11671_v63 }
 0x2dd   : > { %3706 = vmatprep.mubr.bf16.mxu0 %v10033_v1  ;;  %7268 = vmatprep.mubr.msk.bf16.mxu1 %vm11482_vm0, %v10131_v49  ;;  %vm11673_vm0 = vnez %v11614_v60  ;;  %v11692_v60 = vld [vmem:[#allocation32_spill] sm:$0xff] }
 0x2e4   : > { %5883 = vmatmul.mubr.msk.bf16.gmra.mrb[184].mxu0 %vm11670_vm10, %v10048_v19  ;;  %7269 = vmatmul.mubr.msk.bf16.gmra.mrb[116].mxu1 %vm11487_vm9, %v10156_v54  ;;  %vm11676_vm9 = vnez %v11675_v40 }
 0x2e5   : > { %3714 = vmatprep.mubr.bf16.mxu0 %v10058_v34  ;;  %7272 = vmatprep.mubr.msk.bf16.mxu1 %vm11488_vm11, %v10181_v37 }
 0x2ec   : > { %5887 = vmatmul.mubr.msk.bf16.gmra.mrb[188].mxu0 %vm11672_vm12, %v10073_v22  ;;  %7273 = vmatmul.mubr.msk.bf16.gmra.mrb[120].mxu1 %vm11673_vm0, %v10206_v14  ;;  %vm11678_vm0 = vnez %v11677_v20  ;;  %v11693_v14 = vld [vmem:[#allocation38_spill] sm:$0xff] }
 0x2ed   : > { %3722 = vmatprep.mubr.bf16.mxu0 %v10083_v36  ;;  %7276 = vmatprep.mubr.msk.bf16.mxu1 %vm11674_vm14, %v10231_v13  ;;  %vm11682_vm14 = vnez %v11681_v59  ;;  %v11683_v13 = vld [vmem:[#allocation52_spill] sm:$0xff] }
 0x2ee   : > { %vm11684_vm11 = vnez %v11683_v13 }
 0x2f4   : > { %5891 = vmatmul.mubr.msk.bf16.gmra.mrb[192].mxu0 %vm11676_vm9, %v10098_v38  ;;  %7277 = vmatmul.mubr.msk.bf16.gmra.mrb[124].mxu1 %vm11630_vm7, %v10253_v39  ;;  %v11679_v39 = vld [vmem:[#allocation50_spill] sm:$0xff] }
 0x2f5   : > { %3730 = vmatprep.mubr.bf16.mxu0 %v10108_v24  ;;  %4686 = vmatprep.mubr.bf16.mxu1 %v11638_v44  ;;  %vm11680_vm7 = vnez %v11679_v39 }
 0x2fc   : > { %5895 = vmatmul.mubr.msk.bf16.gmra.mrb[196].mxu0 %vm11678_vm0, %v10123_v12  ;;  %6107 = vmatmul.mubr.msk.bf16.vlgmr.msra.gmra.mrb[128].mxu1 %vm11642_vm15, %v11640_v28 }
 0x2fd   : > { %3738 = vmatprep.mubr.bf16.mxu0 %v10133_v58  ;;  %4694 = vmatprep.mubr.bf16.mxu1 %v11646_v57 }
 0x2fe   : > { %7281 = vmatpush3.bf16.msra.mxu1 %v7885_v42  ;;  %v7895_v42 = vld [vmem:[#allocation8 + $0x220] sm:$0xff]  }
 0x2ff   : > { %7282 = vmatprep.subr.bf16.mxu1 %v7888_v51 }
 0x302   : > { %7283 = vmatpush3.bf16.msra.mxu1 %v7888_v51  ;;  %v7896_v51 = vld [vmem:[#allocation8 + $0x228] sm:$0xff]  }
 0x303   : > { %7284 = vmatprep.subr.bf16.mxu1 %v7891_v23 }
 0x304   : > { %5899 = vmatmul.mubr.msk.bf16.gmra.mrb[200].mxu0 %vm11680_vm7, %v10148_v55  ;;  %6111 = vmatmul.mubr.msk.bf16.gmra.mrb[132].mxu1 %vm11651_vm5, %v11649_v15 }
 0x305   : > { %3746 = vmatprep.mubr.bf16.mxu0 %v10158_v9  ;;  %4702 = vmatprep.mubr.bf16.mxu1 %v11654_v26 }
 0x306   : > { %7285 = vmatpush3.bf16.msra.mxu1 %v7891_v23  ;;  %v7897_v23 = vld [vmem:[#allocation8 + $0x230] sm:$0xff]  }
 0x307   : > { %7286 = vmatprep.subr.bf16.mxu1 %v7894_v33 }
 0x30a   : > { %7287 = vmatpush3.bf16.msra.mxu1 %v7894_v33  ;;  %v7898_v33 = vld [vmem:[#allocation8 + $0x238] sm:$0xff]  }
 0x30b   : > { %7288 = vmatprep.subr.bf16.mxu1 %v7895_v42 }
 0x30c   : > { %5903 = vmatmul.mubr.msk.bf16.gmra.mrb[204].mxu0 %vm11682_vm14, %v10173_v3  ;;  %6115 = vmatmul.mubr.msk.bf16.gmra.mrb[136].mxu1 %vm11659_vm6, %v11657_v32 }
 0x30d   : > { %3754 = vmatprep.mubr.bf16.mxu0 %v10183_v18  ;;  %4710 = vmatprep.mubr.bf16.mxu1 %v11662_v0 }
 0x30e   : > { %7289 = vmatpush3.bf16.msra.mxu1 %v7895_v42  ;;  %v11685_v42 = vld [vmem:[#allocation53_spill] sm:$0xff] }
 0x30f   : > { %7290 = vmatprep.subr.bf16.mxu1 %v7896_v51  ;;  %vm11686_vm8 = vnez %v11685_v42 }
 0x312   : > { %7291 = vmatpush3.bf16.msra.mxu1 %v7896_v51  ;;  %v11687_v51 = vld [vmem:[#allocation54_spill] sm:$0xff] }
 0x313   : > { %7292 = vmatprep.subr.bf16.mxu1 %v7897_v23  ;;  %vm11688_vm2 = vnez %v11687_v51 }
 0x314   : > { %5907 = vmatmul.mubr.msk.bf16.gmra.mrb[208].mxu0 %vm11684_vm11, %v10198_v16  ;;  %6119 = vmatmul.mubr.msk.bf16.gmra.mrb[140].mxu1 %vm11665_vm4, %v11663_v7 }
 0x315   : > { %3762 = vmatprep.mubr.bf16.mxu0 %v10208_v41  ;;  %4718 = vmatprep.mubr.bf16.mxu1 %v11666_v6 }
 0x316   : > { %7293 = vmatpush3.bf16.msra.mxu1 %v7897_v23  ;;  %v11689_v23 = vld [vmem:[#allocation55_spill] sm:$0xff] }
 0x317   : > { %7294 = vmatprep.subr.bf16.mxu1 %v7898_v33  ;;  %vm11690_vm3 = vnez %v11689_v23 }
 0x31a   : > { %7295 = vmatpush3.bf16.msra.mxu1 %v7898_v33  ;;  %v11691_v33 = vmov 0  }
 0x31c   : > { %5911 = vmatmul.mubr.msk.bf16.gmra.mrb[212].mxu0 %vm11686_vm8, %v10223_v21  ;;  %6123 = vmatmul.mubr.msk.bf16.gmra.mrb[144].mxu1 %vm11668_vm1, %v10023_v56 }
 0x31d   : > { %3770 = vmatprep.mubr.bf16.mxu0 %v10233_v45  ;;  %4726 = vmatprep.mubr.bf16.mxu1 %v10033_v1 }
 0x324   : > { %5915 = vmatmul.mubr.msk.bf16.gmra.mrb[216].mxu0 %vm11688_vm2, %v10247_v30  ;;  %6127 = vmatmul.mubr.msk.bf16.gmra.mrb[148].mxu1 %vm11670_vm10, %v10048_v19 }
 0x325   : > { %3778 = vmatprep.mubr.bf16.mxu0 %v10251_v62  ;;  %4734 = vmatprep.mubr.bf16.mxu1 %v10058_v34 }
 0x32c   : > { %5919 = vmatmul.mubr.msk.bf16.gmra.mrb[220].mxu0 %vm11690_vm3, %v10277_v47  ;;  %6131 = vmatmul.mubr.msk.bf16.gmra.mrb[152].mxu1 %vm11672_vm12, %v10073_v22 }
 0x32d   : > { %4742 = vmatprep.mubr.bf16.mxu1 %v10083_v36  ;;  %4124 = vmatprep.mubr.bf16.mxu0 %v11691_v33 }
 0x334   : > { %4125 = vmatmul.mubr.bf16.vlgmr.msra.gmra.mrb[224].mxu0 %v11691_v33  ;;  %6135 = vmatmul.mubr.msk.bf16.gmra.mrb[156].mxu1 %vm11676_vm9, %v10098_v38 }
 0x335   : > { %4132 = vmatprep.mubr.bf16.mxu0 %v11692_v60  ;;  %4750 = vmatprep.mubr.bf16.mxu1 %v10108_v24 }
 0x33c   : > { %5987 = vmatmul.mubr.msk.bf16.gmra.mrb[228].mxu0 %vm11635_vm13, %v11693_v14  ;;  %6139 = vmatmul.mubr.msk.bf16.gmra.mrb[160].mxu1 %vm11678_vm0, %v10123_v12  ;;  %vm11709_vm13 = vnez %v11598_v53 }
 0x33d   : > { %4140 = vmatprep.mubr.bf16.mxu0 %v11638_v44  ;;  %4758 = vmatprep.mubr.bf16.mxu1 %v10133_v58 }
 0x344   : > { %5991 = vmatmul.mubr.msk.bf16.gmra.mrb[232].mxu0 %vm11642_vm15, %v11640_v28  ;;  %6143 = vmatmul.mubr.msk.bf16.gmra.mrb[164].mxu1 %vm11680_vm7, %v10148_v55  ;;  %v11723_v28 = vld [vmem:[#allocation45_spill] sm:$0xff] }
 0x345   : > { %4148 = vmatprep.mubr.bf16.mxu0 %v11646_v57  ;;  %4766 = vmatprep.mubr.bf16.mxu1 %v10158_v9 }
 0x34c   : > { %5995 = vmatmul.mubr.msk.bf16.gmra.mrb[236].mxu0 %vm11651_vm5, %v11649_v15  ;;  %6147 = vmatmul.mubr.msk.bf16.gmra.mrb[168].mxu1 %vm11682_vm14, %v10173_v3  ;;  %vm11724_vm5 = vnez %v11723_v28 }
 0x34d   : > { %4156 = vmatprep.mubr.bf16.mxu0 %v11654_v26  ;;  %4774 = vmatprep.mubr.bf16.mxu1 %v10183_v18 }
 0x354   : > { %5999 = vmatmul.mubr.msk.bf16.gmra.mrb[240].mxu0 %vm11659_vm6, %v11657_v32  ;;  %6151 = vmatmul.mubr.msk.bf16.gmra.mrb[172].mxu1 %vm11684_vm11, %v10198_v16 }
 0x355   : > { %4164 = vmatprep.mubr.bf16.mxu0 %v11662_v0  ;;  %4782 = vmatprep.mubr.bf16.mxu1 %v10208_v41 }
 0x35c   : > { %6003 = vmatmul.mubr.msk.bf16.gmra.mrb[244].mxu0 %vm11665_vm4, %v11663_v7  ;;  %6155 = vmatmul.mubr.msk.bf16.gmra.mrb[176].mxu1 %vm11686_vm8, %v10223_v21 }
 0x35d   : > { %4172 = vmatprep.mubr.bf16.mxu0 %v11666_v6  ;;  %4790 = vmatprep.mubr.bf16.mxu1 %v10233_v45 }
 0x364   : > { %6007 = vmatmul.mubr.msk.bf16.gmra.mrb[248].mxu0 %vm11668_vm1, %v10023_v56  ;;  %6159 = vmatmul.mubr.msk.bf16.gmra.mrb[180].mxu1 %vm11688_vm2, %v10247_v30  ;;  %v11695_v56 = vld [vmem:[#allocation21_spill] sm:$0xff] }
 0x365   : > { %4180 = vmatprep.mubr.bf16.mxu0 %v10033_v1  ;;  %4798 = vmatprep.mubr.bf16.mxu1 %v10251_v62  ;;  %v11696_v1 = vld [vmem:[#allocation57_spill] sm:$0xff] }
 0x366   : > { %vm11697_vm4 = vnez %v11696_v1 }
 0x36c   : > { %6011 = vmatmul.mubr.msk.bf16.gmra.mrb[252].mxu0 %vm11670_vm10, %v10048_v19  ;;  %6163 = vmatmul.mubr.msk.bf16.gmra.mrb[184].mxu1 %vm11690_vm3, %v10277_v47  ;;  %v11698_v19 = vld [vmem:[#allocation18_spill] sm:$0xff] }
 0x36d   : > { %4188 = vmatprep.mubr.bf16.mxu0 %v10058_v34  ;;  %4806 = vmatprep.mubr.bf16.mxu1 %v11691_v33  ;;  %v11699_v34 = vld [vmem:[#allocation58_spill] sm:$0xff] }
 0x36e   : > { %vm11700_vm10 = vnez %v11699_v34 }
 0x374   : > { %6015 = vmatmul.mubr.msk.bf16.gmra.mrb[0].mxu0 %vm11672_vm12, %v10073_v22  ;;  %4807 = vmatmul.mubr.bf16.gmra.mrb[188].mxu1 %v11691_v33  ;;  %v11701_v22 = vld [vmem:[#allocation59_spill] sm:$0xff]  ;;  %vm11706_vm12 = vnez %v11583_v61 }
 0x375   : > { %4196 = vmatprep.mubr.bf16.mxu0 %v10083_v36  ;;  %7296 = vmatprep.mubr.msk.bf16.mxu1 %vm11697_vm4, %v11695_v56  ;;  %vm11702_vm1 = vnez %v11701_v22  ;;  %v11703_v36 = vld [vmem:[#allocation60_spill] sm:$0xff] }
 0x376   : > { %vm11704_vm3 = vnez %v11703_v36 }
 0x37c   : > { %6019 = vmatmul.mubr.msk.bf16.gmra.mrb[4].mxu0 %vm11676_vm9, %v10098_v38  ;;  %7297 = vmatmul.mubr.msk.bf16.vlgmr.msra.gmra.mrb[96].mxu1 %vm11700_vm10, %v11698_v19  ;;  %vm11705_vm9 = vnez %v11578_v11 }
 0x37d   : > { %4204 = vmatprep.mubr.bf16.mxu0 %v10108_v24  ;;  %7300 = vmatprep.mubr.msk.bf16.mxu1 %vm11702_vm1, %v11655_v52 }
 0x384   : > { %6023 = vmatmul.mubr.msk.bf16.gmra.mrb[8].mxu0 %vm11678_vm0, %v10123_v12  ;;  %7301 = vmatmul.mubr.msk.bf16.gmra.mrb[100].mxu1 %vm11704_vm3, %v11660_v10  ;;  %vm11707_vm0 = vnez %v11588_v27 }
 0x385   : > { %4212 = vmatprep.mubr.bf16.mxu0 %v10133_v58  ;;  %7304 = vmatprep.mubr.msk.bf16.mxu1 %vm11705_vm9, %v10031_v25 }
 0x387   : > { %v6648_v38 = vpop.f32.mrb[160].mxu0 }
 0x388   : > { %v6649_v24 = vpop.f32.mrb[161].mxu0 }
 0x389   : > { %v10511_v50 = vadd.f32 %v6649_v24, %v6648_v38  ;;  %v6651_v14 = vpop.f32.mrb[162].mxu0 }
 0x38a   : > { %v6652_v60 = vpop.f32.mrb[163].mxu0 }
 0x38b   : > { %v10513_v62 = vadd.f32 %v6652_v60, %v6651_v14 }
 0x38c   : > { %6027 = vmatmul.mubr.msk.bf16.gmra.mrb[12].mxu0 %vm11680_vm7, %v10148_v55  ;;  %7305 = vmatmul.mubr.msk.bf16.gmra.mrb[104].mxu1 %vm11706_vm12, %v10056_v17  ;;  %vm11708_vm7 = vnez %v11593_v2 }
 0x38d   : > { %4220 = vmatprep.mubr.bf16.mxu0 %v10158_v9  ;;  %7308 = vmatprep.mubr.msk.bf16.mxu1 %vm11707_vm0, %v10081_v5 }
 0x38f   : > { %v6654_v25 = vpop.f32.mrb[164].mxu0 }
 0x390   : > { %v6655_v11 = vpop.f32.mrb[165].mxu0 }
 0x391   : > { %v10525_v12 = vadd.f32 %v6655_v11, %v6654_v25  ;;  %v6657_v58 = vpop.f32.mrb[166].mxu0 }
 0x392   : > { %v6658_v32 = vpop.f32.mrb[167].mxu0 }
 0x393   : > { %v10527_v8 = vadd.f32 %v6658_v32, %v6657_v58 }
 0x394   : > { %6031 = vmatmul.mubr.msk.bf16.gmra.mrb[16].mxu0 %vm11682_vm14, %v10173_v3  ;;  %7309 = vmatmul.mubr.msk.bf16.gmra.mrb[108].mxu1 %vm11708_vm7, %v10106_v48  ;;  %vm11710_vm14 = vnez %v11603_v46  ;;  %v11711_v48 = vld [vmem:[#allocation39_spill] sm:$0xff]  ;;  %v11713_v46 = vld [vmem:[#allocation34_spill] sm:$0xff] }
 0x395   : > { %4228 = vmatprep.mubr.bf16.mxu0 %v10183_v18  ;;  %7312 = vmatprep.mubr.msk.bf16.mxu1 %vm11709_vm13, %v10131_v49  ;;  %vm11712_vm6 = vnez %v11711_v48 }
 0x397   : > { %v6660_v17 = vpop.f32.mrb[168].mxu0 }
 0x398   : > { %v6661_v61 = vpop.f32.mrb[169].mxu0 }
 0x399   : > { %v10539_v5 = vadd.f32 %v6661_v61, %v6660_v17  ;;  %v6663_v27 = vpop.f32.mrb[170].mxu0 }
 0x39a   : > { %v6664_v55 = vpop.f32.mrb[171].mxu0 }
 0x39b   : > { %v10541_v9 = vadd.f32 %v6664_v55, %v6663_v27 }
 0x39c   : > { %6035 = vmatmul.mubr.msk.bf16.gmra.mrb[20].mxu0 %vm11684_vm11, %v10198_v16  ;;  %7313 = vmatmul.mubr.msk.bf16.gmra.mrb[112].mxu1 %vm11710_vm14, %v10156_v54  ;;  %v11714_v54 = vld [vmem:[#allocation42_spill] sm:$0xff]  ;;  %v11716_v16 = vld [vmem:[#allocation35_spill] sm:$0xff] }
 0x39d   : > { %4236 = vmatprep.mubr.bf16.mxu0 %v10208_v41  ;;  %7316 = vmatprep.mubr.msk.bf16.mxu1 %vm11712_vm6, %v10181_v37  ;;  %vm11715_vm11 = vnez %v11714_v54  ;;  %v11717_v37 = vld [vmem:[#allocation43_spill] sm:$0xff] }
 0x39e   : > { %vm11718_vm15 = vnez %v11717_v37 }
 0x39f   : > { %v6666_v2 = vpop.f32.mrb[172].mxu0 }
 0x3a0   : > { %v6667_v49 = vpop.f32.mrb[173].mxu0 }
 0x3a1   : > { %v10553_v53 = vadd.f32 %v6667_v49, %v6666_v2  ;;  %v6669_v3 = vpop.f32.mrb[174].mxu0 }
 0x3a2   : > { %v6670_v18 = vpop.f32.mrb[175].mxu0 }
 0x3a3   : > { %v10555_v59 = vadd.f32 %v6670_v18, %v6669_v3 }
 0x3a4   : > { %6039 = vmatmul.mubr.msk.bf16.gmra.mrb[24].mxu0 %vm11686_vm8, %v10223_v21  ;;  %7317 = vmatmul.mubr.msk.bf16.gmra.mrb[116].mxu1 %vm11715_vm11, %v11713_v46  ;;  %v11719_v21 = vld [vmem:[#allocation36_spill] sm:$0xff]  ;;  %vm11721_vm8 = vnez %v11720_v43 }
 0x3a5   : > { %4244 = vmatprep.mubr.bf16.mxu0 %v10233_v45  ;;  %7320 = vmatprep.mubr.msk.bf16.mxu1 %vm11718_vm15, %v11716_v16  ;;  %v11722_v45 = vld [vmem:[#allocation37_spill] sm:$0xff] }
 0x3a7   : > { %v6672_v41 = vpop.f32.mrb[176].mxu0 }
 0x3a8   : > { %v6673_v13 = vpop.f32.mrb[177].mxu0 }
 0x3a9   : > { %v10567_v39 = vadd.f32 %v6673_v13, %v6672_v41  ;;  %v6675_v47 = vpop.f32.mrb[178].mxu0 }
 0x3aa   : > { %v6676_v15 = vpop.f32.mrb[179].mxu0 }
 0x3ab   : > { %v10569_v44 = vadd.f32 %v6676_v15, %v6675_v47 }
 0x3ac   : > { %6043 = vmatmul.mubr.msk.bf16.gmra.mrb[28].mxu0 %vm11688_vm2, %v10247_v30  ;;  %7321 = vmatmul.mubr.msk.bf16.gmra.mrb[120].mxu1 %vm11721_vm8, %v11719_v21 }
 0x3ad   : > { %7324 = vmatprep.mubr.msk.bf16.mxu1 %vm11724_vm5, %v11722_v45 }
 0x3af   : > { %v6678_v29 = vpop.f32.mrb[180].mxu0 }
 0x3b0   : > { %v6679_v57 = vpop.f32.mrb[181].mxu0 }
 0x3b1   : > { %v10580_v26 = vadd.f32 %v6679_v57, %v6678_v29  ;;  %v6681_v52 = vpop.f32.mrb[182].mxu0 }
 0x3b2   : > { %v6682_v35 = vpop.f32.mrb[183].mxu0 }
 0x3b3   : > { %v10582_v10 = vadd.f32 %v6682_v35, %v6681_v52 }
 0x3b4   : > { %7325 = vmatmul.mubr.bf16.gmra.mrb[124].mxu1 %v11691_v33 }
 0x3b7   : > { %v6684_v0 = vpop.f32.mrb[184].mxu0 }
 0x3b8   : > { %v6685_v30 = vpop.f32.mrb[185].mxu0 }
 0x3b9   : > { %v10585_v7 = vadd.f32 %v6685_v30, %v6684_v0  ;;  %v6687_v6 = vpop.f32.mrb[186].mxu0 }
 0x3ba   : > { %v6688_v31 = vpop.f32.mrb[187].mxu0 }
 0x3bb   : > { %v10587_v4 = vadd.f32 %v6688_v31, %v6687_v6 }
 0x3bf   : > { %v6690_v63 = vpop.f32.mrb[188].mxu0 }
 0x3c0   : > { %v6691_v40 = vpop.f32.mrb[189].mxu0 }
 0x3c1   : > { %v10589_v20 = vadd.f32 %v6691_v40, %v6690_v63  ;;  %v6693_v42 = vpop.f32.mrb[190].mxu0 }
 0x3c2   : > { %v6694_v51 = vpop.f32.mrb[191].mxu0 }
 0x3c3   : > { %v10591_v23 = vadd.f32 %v6694_v51, %v6693_v42 }
 0x3c7   : > { %v6696_v56 = vpop.f32.mrb[192].mxu0 }
 0x3c8   : > { %v6697_v1 = vpop.f32.mrb[193].mxu0 }
 0x3c9   : > { %v10593_v19 = vadd.f32 %v6697_v1, %v6696_v56  ;;  %v6699_v33 = vpop.f32.mrb[194].mxu0 }
 0x3ca   : > { %v6700_v34 = vpop.f32.mrb[195].mxu0 }
 0x3cb   : > { %v10595_v22 = vadd.f32 %v6700_v34, %v6699_v33 }
 0x3cf   : > { %v6702_v36 = vpop.f32.mrb[196].mxu0  ;;  %v6920_v38 = vpop.f32.mrb[128].mxu1 }
 0x3d0   : > { %v6703_v24 = vpop.f32.mrb[197].mxu0  ;;  %v6921_v14 = vpop.f32.mrb[129].mxu1 }
 0x3d1   : > { %v10597_v60 = vadd.f32 %v6703_v24, %v6702_v36  ;;  %v10599_v25 = vadd.f32 %v6921_v14, %v6920_v38  ;;  %v6705_v11 = vpop.f32.mrb[198].mxu0  ;;  %v6923_v58 = vpop.f32.mrb[130].mxu1 }
 0x3d2   : > { %v6706_v32 = vpop.f32.mrb[199].mxu0  ;;  %v6924_v17 = vpop.f32.mrb[131].mxu1 }
 0x3d3   : > { %v10601_v61 = vadd.f32 %v6706_v32, %v6705_v11  ;;  %v10603_v27 = vadd.f32 %v6924_v17, %v6923_v58 }
 0x3d7   : > { %v6708_v55 = vpop.f32.mrb[200].mxu0  ;;  %v6926_v48 = vpop.f32.mrb[132].mxu1 }
 0x3d8   : > { %v6709_v2 = vpop.f32.mrb[201].mxu0  ;;  %v6927_v49 = vpop.f32.mrb[133].mxu1 }
 0x3d9   : > { %v10605_v3 = vadd.f32 %v6709_v2, %v6708_v55  ;;  %v10607_v18 = vadd.f32 %v6927_v49, %v6926_v48  ;;  %v6711_v46 = vpop.f32.mrb[202].mxu0  ;;  %v6929_v54 = vpop.f32.mrb[134].mxu1 }
 0x3da   : > { %v6712_v16 = vpop.f32.mrb[203].mxu0  ;;  %v6930_v37 = vpop.f32.mrb[135].mxu1 }
 0x3db   : > { %v10609_v41 = vadd.f32 %v6712_v16, %v6711_v46  ;;  %v10611_v13 = vadd.f32 %v6930_v37, %v6929_v54 }
 0x3df   : > { %v6714_v47 = vpop.f32.mrb[204].mxu0  ;;  %v6932_v15 = vpop.f32.mrb[136].mxu1 }
 0x3e0   : > { %v6715_v21 = vpop.f32.mrb[205].mxu0  ;;  %v6933_v43 = vpop.f32.mrb[137].mxu1 }
 0x3e1   : > { %v10613_v45 = vadd.f32 %v6715_v21, %v6714_v47  ;;  %v10615_v28 = vadd.f32 %v6933_v43, %v6932_v15  ;;  %v6717_v29 = vpop.f32.mrb[206].mxu0  ;;  %v6935_v57 = vpop.f32.mrb[138].mxu1 }
 0x3e2   : > { %v6718_v52 = vpop.f32.mrb[207].mxu0  ;;  %v6936_v35 = vpop.f32.mrb[139].mxu1 }
 0x3e3   : > { %v10617_v0 = vadd.f32 %v6718_v52, %v6717_v29  ;;  %v10619_v30 = vadd.f32 %v6936_v35, %v6935_v57 }
 0x3e7   : > { %v6720_v6 = vpop.f32.mrb[208].mxu0  ;;  %v6938_v31 = vpop.f32.mrb[140].mxu1 }
 0x3e8   : > { %v6721_v63 = vpop.f32.mrb[209].mxu0  ;;  %v6939_v40 = vpop.f32.mrb[141].mxu1 }
 0x3e9   : > { %v10621_v42 = vadd.f32 %v6721_v63, %v6720_v6  ;;  %v10623_v51 = vadd.f32 %v6939_v40, %v6938_v31  ;;  %v6723_v56 = vpop.f32.mrb[210].mxu0  ;;  %v6941_v1 = vpop.f32.mrb[142].mxu1 }
 0x3ea   : > { %v6724_v33 = vpop.f32.mrb[211].mxu0  ;;  %v6942_v34 = vpop.f32.mrb[143].mxu1 }
 0x3eb   : > { %v10625_v36 = vadd.f32 %v6724_v33, %v6723_v56  ;;  %v10627_v38 = vadd.f32 %v6942_v34, %v6941_v1 }
 0x3ef   : > { %v6726_v24 = vpop.f32.mrb[212].mxu0  ;;  %v6944_v14 = vpop.f32.mrb[144].mxu1 }
 0x3f0   : > { %v6727_v11 = vpop.f32.mrb[213].mxu0  ;;  %v6945_v58 = vpop.f32.mrb[145].mxu1 }
 0x3f1   : > { %v10629_v32 = vadd.f32 %v6727_v11, %v6726_v24  ;;  %v10631_v17 = vadd.f32 %v6945_v58, %v6944_v14  ;;  %v6729_v55 = vpop.f32.mrb[214].mxu0  ;;  %v6947_v48 = vpop.f32.mrb[146].mxu1 }
 0x3f2   : > { %v6730_v2 = vpop.f32.mrb[215].mxu0  ;;  %v6948_v49 = vpop.f32.mrb[147].mxu1 }
 0x3f3   : > { %v10633_v46 = vadd.f32 %v6730_v2, %v6729_v55  ;;  %v10635_v54 = vadd.f32 %v6948_v49, %v6947_v48 }
 0x3f7   : > { %v6732_v16 = vpop.f32.mrb[216].mxu0  ;;  %v6950_v37 = vpop.f32.mrb[148].mxu1 }
 0x3f8   : > { %v6733_v47 = vpop.f32.mrb[217].mxu0  ;;  %v6951_v15 = vpop.f32.mrb[149].mxu1 }
 0x3f9   : > { %v10637_v21 = vadd.f32 %v6733_v47, %v6732_v16  ;;  %v10639_v43 = vadd.f32 %v6951_v15, %v6950_v37  ;;  %v6735_v29 = vpop.f32.mrb[218].mxu0  ;;  %v6953_v57 = vpop.f32.mrb[150].mxu1 }
 0x3fa   : > { %v6736_v52 = vpop.f32.mrb[219].mxu0  ;;  %v6954_v35 = vpop.f32.mrb[151].mxu1 }
 0x3fb   : > { %v10641_v6 = vadd.f32 %v6736_v52, %v6735_v29  ;;  %v10643_v31 = vadd.f32 %v6954_v35, %v6953_v57 }
 0x3ff   : > { %v6738_v63 = vpop.f32.mrb[220].mxu0  ;;  %v6956_v40 = vpop.f32.mrb[152].mxu1 }
 0x400   : > { %v6739_v56 = vpop.f32.mrb[221].mxu0  ;;  %v6957_v1 = vpop.f32.mrb[153].mxu1 }
 0x401   : > { %v10645_v33 = vadd.f32 %v6739_v56, %v6738_v63  ;;  %v10647_v34 = vadd.f32 %v6957_v1, %v6956_v40  ;;  %v6741_v24 = vpop.f32.mrb[222].mxu0  ;;  %v6959_v14 = vpop.f32.mrb[154].mxu1 }
 0x402   : > { %v6742_v11 = vpop.f32.mrb[223].mxu0  ;;  %v6960_v58 = vpop.f32.mrb[155].mxu1 }
 0x403   : > { %v10649_v55 = vadd.f32 %v6742_v11, %v6741_v24  ;;  %v10651_v48 = vadd.f32 %v6960_v58, %v6959_v14 }
 0x405   : > { %11725 = vst [vmem:[#allocation40_spill] sm:$0xff] %v10649_v55 }
 0x407   : > { %v6784_v2 = vpop.f32.mrb[224].mxu0  ;;  %v6962_v49 = vpop.f32.mrb[156].mxu1 }
 0x408   : > { %v6785_v16 = vpop.f32.mrb[225].mxu0  ;;  %v6963_v37 = vpop.f32.mrb[157].mxu1 }
 0x409   : > { %v6786_v47 = vadd.f32 %v6785_v16, %v6784_v2  ;;  %v10653_v15 = vadd.f32 %v6963_v37, %v6962_v49  ;;  %v6787_v29 = vpop.f32.mrb[226].mxu0  ;;  %v6965_v57 = vpop.f32.mrb[158].mxu1 }
 0x40a   : > { %v6788_v52 = vpop.f32.mrb[227].mxu0  ;;  %v6966_v35 = vpop.f32.mrb[159].mxu1 }
 0x40b   : > { %v7459_v63 = vadd.f32 %v6786_v47, %v10511_v50  ;;  %v6789_v40 = vadd.f32 %v6788_v52, %v6787_v29  ;;  %v10656_v56 = vadd.f32 %v6966_v35, %v6965_v57 }
 0x40d   : > { %v7465_v1 = vadd.f32 %v6789_v40, %v10513_v62  ;;  %v10660_v24 = vadd.f32 %v7459_v63, %v10599_v25 }
 0x40f   : > { %v6790_v14 = vpop.f32.mrb[228].mxu0  ;;  %v6968_v11 = vpop.f32.mrb[160].mxu1  ;;  %v10663_v58 = vadd.f32 %v7465_v1, %v10603_v27 }
 0x410   : > { %v6791_v2 = vpop.f32.mrb[229].mxu0  ;;  %v6969_v49 = vpop.f32.mrb[161].mxu1 }
 0x411   : > { %v6792_v16 = vadd.f32 %v6791_v2, %v6790_v14  ;;  %v10665_v37 = vadd.f32 %v6969_v49, %v6968_v11  ;;  %v6793_v55 = vpop.f32.mrb[230].mxu0  ;;  %v6971_v50 = vpop.f32.mrb[162].mxu1 }
 0x412   : > { %v6794_v47 = vpop.f32.mrb[231].mxu0  ;;  %v6972_v29 = vpop.f32.mrb[163].mxu1 }
 0x413   : > { %v7456_v57 = vadd.f32 %v6792_v16, %v10525_v12  ;;  %v6795_v62 = vadd.f32 %v6794_v47, %v6793_v55  ;;  %v10668_v52 = vadd.f32 %v6972_v29, %v6971_v50 }
 0x415   : > { %v7462_v25 = vadd.f32 %v6795_v62, %v10527_v8  ;;  %v10672_v35 = vadd.f32 %v7456_v57, %v10607_v18 }
 0x417   : > { %v6796_v27 = vpop.f32.mrb[232].mxu0  ;;  %v6974_v63 = vpop.f32.mrb[164].mxu1  ;;  %v10675_v40 = vadd.f32 %v7462_v25, %v10611_v13 }
 0x418   : > { %v6797_v1 = vpop.f32.mrb[233].mxu0  ;;  %v6975_v14 = vpop.f32.mrb[165].mxu1 }
 0x419   : > { %v6798_v11 = vadd.f32 %v6797_v1, %v6796_v27  ;;  %v10677_v2 = vadd.f32 %v6975_v14, %v6974_v63  ;;  %v6799_v49 = vpop.f32.mrb[234].mxu0  ;;  %v6977_v12 = vpop.f32.mrb[166].mxu1 }
 0x41a   : > { %v6800_v55 = vpop.f32.mrb[235].mxu0  ;;  %v6978_v16 = vpop.f32.mrb[167].mxu1 }
 0x41b   : > { %v7471_v50 = vadd.f32 %v6798_v11, %v10539_v5  ;;  %v6801_v8 = vadd.f32 %v6800_v55, %v6799_v49  ;;  %v10680_v47 = vadd.f32 %v6978_v16, %v6977_v12 }
 0x41d   : > { %v7477_v18 = vadd.f32 %v6801_v8, %v10541_v9  ;;  %v10684_v29 = vadd.f32 %v7471_v50, %v10615_v28 }
 0x41f   : > { %v6802_v13 = vpop.f32.mrb[236].mxu0  ;;  %v6980_v57 = vpop.f32.mrb[168].mxu1  ;;  %v10687_v62 = vadd.f32 %v7477_v18, %v10619_v30 }
 0x420   : > { %v6803_v25 = vpop.f32.mrb[237].mxu0  ;;  %v6981_v27 = vpop.f32.mrb[169].mxu1 }
 0x421   : > { %v6804_v63 = vadd.f32 %v6803_v25, %v6802_v13  ;;  %v10689_v1 = vadd.f32 %v6981_v27, %v6980_v57  ;;  %v6805_v14 = vpop.f32.mrb[238].mxu0  ;;  %v6983_v5 = vpop.f32.mrb[170].mxu1 }
 0x422   : > { %v6806_v11 = vpop.f32.mrb[239].mxu0  ;;  %v6984_v49 = vpop.f32.mrb[171].mxu1 }
 0x423   : > { %v7468_v12 = vadd.f32 %v6804_v63, %v10553_v53  ;;  %v6807_v9 = vadd.f32 %v6806_v11, %v6805_v14  ;;  %v10692_v55 = vadd.f32 %v6984_v49, %v6983_v5 }
 0x425   : > { %v7474_v28 = vadd.f32 %v6807_v9, %v10555_v59  ;;  %v10696_v16 = vadd.f32 %v7468_v12, %v10623_v51 }
 0x427   : > { %v6808_v30 = vpop.f32.mrb[240].mxu0  ;;  %v6986_v50 = vpop.f32.mrb[172].mxu1  ;;  %v10699_v8 = vadd.f32 %v7474_v28, %v10627_v38 }
 0x428   : > { %v6809_v18 = vpop.f32.mrb[241].mxu0  ;;  %v6987_v13 = vpop.f32.mrb[173].mxu1 }
 0x429   : > { %v6810_v57 = vadd.f32 %v6809_v18, %v6808_v30  ;;  %v10701_v25 = vadd.f32 %v6987_v13, %v6986_v50  ;;  %v6811_v27 = vpop.f32.mrb[242].mxu0  ;;  %v6989_v53 = vpop.f32.mrb[174].mxu1 }
 0x42a   : > { %v6812_v63 = vpop.f32.mrb[243].mxu0  ;;  %v6990_v14 = vpop.f32.mrb[175].mxu1 }
 0x42b   : > { %v7483_v5 = vadd.f32 %v6810_v57, %v10567_v39  ;;  %v6813_v59 = vadd.f32 %v6812_v63, %v6811_v27  ;;  %v10704_v11 = vadd.f32 %v6990_v14, %v6989_v53 }
 0x42d   : > { %v7489_v51 = vadd.f32 %v6813_v59, %v10569_v44  ;;  %v10708_v49 = vadd.f32 %v7483_v5, %v10631_v17 }
 0x42f   : > { %v6814_v38 = vpop.f32.mrb[244].mxu0  ;;  %v6992_v12 = vpop.f32.mrb[176].mxu1  ;;  %v10711_v9 = vadd.f32 %v7489_v51, %v10635_v54 }
 0x430   : > { %v6815_v28 = vpop.f32.mrb[245].mxu0  ;;  %v6993_v30 = vpop.f32.mrb[177].mxu1 }
 0x431   : > { %v6816_v50 = vadd.f32 %v6815_v28, %v6814_v38  ;;  %v10713_v18 = vadd.f32 %v6993_v30, %v6992_v12  ;;  %v6817_v13 = vpop.f32.mrb[246].mxu0  ;;  %v6995_v39 = vpop.f32.mrb[178].mxu1 }
 0x432   : > { %v6818_v57 = vpop.f32.mrb[247].mxu0  ;;  %v6996_v27 = vpop.f32.mrb[179].mxu1 }
 0x433   : > { %v7480_v53 = vadd.f32 %v6816_v50, %v10580_v26  ;;  %v6819_v44 = vadd.f32 %v6818_v57, %v6817_v13  ;;  %v10716_v63 = vadd.f32 %v6996_v27, %v6995_v39 }
 0x435   : > { %v7486_v17 = vadd.f32 %v6819_v44, %v10582_v10  ;;  %v10720_v14 = vadd.f32 %v7480_v53, %v10639_v43 }
 0x437   : > { %v6820_v54 = vpop.f32.mrb[248].mxu0  ;;  %v6998_v5 = vpop.f32.mrb[180].mxu1  ;;  %v10723_v59 = vadd.f32 %v7486_v17, %v10643_v31 }
 0x438   : > { %v6821_v51 = vpop.f32.mrb[249].mxu0  ;;  %v6999_v38 = vpop.f32.mrb[181].mxu1 }
 0x439   : > { %v6822_v12 = vadd.f32 %v6821_v51, %v6820_v54  ;;  %v10725_v28 = vadd.f32 %v6999_v38, %v6998_v5  ;;  %v6823_v30 = vpop.f32.mrb[250].mxu0  ;;  %v7001_v26 = vpop.f32.mrb[182].mxu1 }
 0x43a   : > { %v6824_v50 = vpop.f32.mrb[251].mxu0  ;;  %v7002_v13 = vpop.f32.mrb[183].mxu1 }
 0x43b   : > { %v7495_v39 = vadd.f32 %v6822_v12, %v10585_v7  ;;  %v6825_v10 = vadd.f32 %v6824_v50, %v6823_v30  ;;  %v10728_v57 = vadd.f32 %v7002_v13, %v7001_v26 }
 0x43d   : > { %v7501_v43 = vadd.f32 %v6825_v10, %v10587_v4  ;;  %v10732_v27 = vadd.f32 %v7495_v39, %v10647_v34 }
 0x43f   : > { %v6826_v31 = vpop.f32.mrb[252].mxu0  ;;  %v7004_v53 = vpop.f32.mrb[184].mxu1  ;;  %v10735_v44 = vadd.f32 %v7501_v43, %v10651_v48 }
 0x440   : > { %v6827_v17 = vpop.f32.mrb[253].mxu0  ;;  %v7005_v54 = vpop.f32.mrb[185].mxu1 }
 0x441   : > { %v6828_v5 = vadd.f32 %v6827_v17, %v6826_v31  ;;  %v10737_v51 = vadd.f32 %v7005_v54, %v7004_v53  ;;  %v6829_v38 = vpop.f32.mrb[254].mxu0  ;;  %v7007_v7 = vpop.f32.mrb[186].mxu1 }
 0x442   : > { %v6830_v12 = vpop.f32.mrb[255].mxu0  ;;  %v7008_v30 = vpop.f32.mrb[187].mxu1 }
 0x443   : > { %v7492_v26 = vadd.f32 %v6828_v5, %v10589_v20  ;;  %v6831_v4 = vadd.f32 %v6830_v12, %v6829_v38  ;;  %v10740_v50 = vadd.f32 %v7008_v30, %v7007_v7 }
 0x445   : > { %v7498_v34 = vadd.f32 %v6831_v4, %v10591_v23  ;;  %v10744_v13 = vadd.f32 %v7492_v26, %v10653_v15  ;;  %v10761_v4 = vld [vmem:[%s11029_s5] ss:$0 sm:$0xff] }
 0x447   : > { %v6832_v48 = vpop.f32.mrb[0].mxu0  ;;  %v7010_v39 = vpop.f32.mrb[188].mxu1  ;;  %v10747_v10 = vadd.f32 %v7498_v34, %v10656_v56 }
 0x448   : > { %v6833_v43 = vpop.f32.mrb[1].mxu0  ;;  %v7011_v31 = vpop.f32.mrb[189].mxu1 }
 0x449   : > { %v6834_v53 = vadd.f32 %v6833_v43, %v6832_v48  ;;  %v10749_v17 = vadd.f32 %v7011_v31, %v7010_v39  ;;  %v6835_v54 = vpop.f32.mrb[2].mxu0  ;;  %v7013_v20 = vpop.f32.mrb[190].mxu1 }
 0x44a   : > { %v6836_v5 = vpop.f32.mrb[3].mxu0  ;;  %v7014_v38 = vpop.f32.mrb[191].mxu1 }
 0x44b   : > { %v7507_v7 = vadd.f32 %v6834_v53, %v10593_v19  ;;  %v6837_v23 = vadd.f32 %v6836_v5, %v6835_v54  ;;  %v10752_v12 = vadd.f32 %v7014_v38, %v7013_v20  ;;  %v5088_v5 = vld [vmem:[%s8288_s21 + $0x10] sm:$0xff] }
 0x44d   : > { %v7513_v15 = vadd.f32 %v6837_v23, %v10595_v22  ;;  %v10756_v30 = vadd.f32 %v7507_v7, %v10665_v37  ;;  %v10770_v22 = vld [vmem:[%s11030_s6] ss:$0 sm:$0xff] }
 0x44f   : > { %v6838_v56 = vpop.f32.mrb[4].mxu0  ;;  %v7298_v26 = vpop.f32.mrb[96].mxu1  ;;  %v10764_v34 = vadd.f32 %v7513_v15, %v10668_v52 }
 0x450   : > { %v7458_v19 = vadd.f32 %v10672_v35, %v7298_v26  ;;  %v6839_v48 = vpop.f32.mrb[5].mxu0  ;;  %v4849_v39 = vpop.f32.mrb[97].mxu1 }
 0x451   : > { %v6840_v37 = vadd.f32 %v6839_v48, %v6838_v56  ;;  %v7461_v43 = vadd.f32 %v10660_v24, %v4849_v39  ;;  %v6841_v31 = vpop.f32.mrb[6].mxu0  ;;  %v7299_v53 = vpop.f32.mrb[98].mxu1  ;;  %v5086_v56 = vld [vmem:[%s8288_s21] sm:$0xff]  ;;  %v5089_v48 = vld [vmem:[%s8288_s21 + $0x18] sm:$0xff] }
 0x452   : > { %v5017_v54 = vmul.f32 %v7458_v19, %v10761_v4  ;;  %v7464_v52 = vadd.f32 %v10675_v40, %v7299_v53  ;;  %v6842_v20 = vpop.f32.mrb[7].mxu0  ;;  %v4852_v35 = vpop.f32.mrb[99].mxu1 }
 0x453   : > { %v7504_v38 = vadd.f32 %v6840_v37, %v10597_v60  ;;  %v5015_v7 = vmul.f32 %v7461_v43, %v10761_v4  ;;  %v6843_v23 = vadd.f32 %v6842_v20, %v6841_v31  ;;  %v7467_v15 = vadd.f32 %v10663_v58, %v4852_v35  ;;  %v5087_v43 = vld [vmem:[%s8288_s21 + $0x8] sm:$0xff] }
 0x454   : > { %v5056_v24 = vadd.f32 %v10770_v22, %v5017_v54  ;;  %v5018_v26 = vmul.f32 %v7464_v52, %v10761_v4 }
 0x455   : > { %v5054_v19 = vadd.f32 %v10770_v22, %v5015_v7  ;;  %v7510_v40 = vadd.f32 %v6843_v23, %v10601_v61  ;;  %v5016_v39 = vmul.f32 %v7467_v15, %v10761_v4  ;;  %v10787_v53 = vadd.f32 %v7504_v38, %v10677_v2 }
 0x456   : > { %v5120_v60 = vadd.f32 %v5088_v5, %v5056_v24  ;;  %v5057_v37 = vadd.f32 %v10770_v22, %v5018_v26 }
 0x457   : > { %v5118_v58 = vadd.f32 %v5086_v56, %v5054_v19  ;;  %v5055_v31 = vadd.f32 %v10770_v22, %v5016_v39  ;;  %v6844_v54 = vpop.f32.mrb[8].mxu0  ;;  %v7302_v52 = vpop.f32.mrb[100].mxu1  ;;  %v10793_v20 = vadd.f32 %v7510_v40, %v10680_v47  ;;  %v5092_v39 = vld [vmem:[%s8288_s21 + $0x30] sm:$0xff] }
 0x458   : > { %v5152_v35 = vmax.f32 %v5120_v60, 0.0  ;;  %v5121_v61 = vadd.f32 %v5089_v48, %v5057_v37  ;;  %v7470_v7 = vadd.f32 %v10696_v16, %v7302_v52  ;;  %v6845_v23 = vpop.f32.mrb[9].mxu0  ;;  %v4865_v2 = vpop.f32.mrb[101].mxu1 }
 0x459   : > { %v5150_v5 = vmax.f32 %v5118_v58, 0.0  ;;  %v5119_v38 = vadd.f32 %v5087_v43, %v5055_v31  ;;  %v6846_v15 = vadd.f32 %v6845_v23, %v6844_v54  ;;  %v7473_v24 = vadd.f32 %v10684_v29, %v4865_v2  ;;  %v6847_v56 = vpop.f32.mrb[10].mxu0  ;;  %v7303_v26 = vpop.f32.mrb[102].mxu1  ;;  %v5090_v31 = vld [vmem:[%s8288_s21 + $0x20] sm:$0xff] }
 0x45a   : > { %5184 = vst [vmem:[%s10799_s12 + $0x10] sm:$0xff] %v5152_v35  ;;  %v5153_v47 = vmax.f32 %v5121_v61, 0.0  ;;  %v5021_v16 = vmul.f32 %v7470_v7, %v10761_v4  ;;  %v7476_v19 = vadd.f32 %v10699_v8, %v7303_v26  ;;  %v6848_v48 = vpop.f32.mrb[11].mxu0  ;;  %v4868_v40 = vpop.f32.mrb[103].mxu1  ;;  %v5093_v35 = vld [vmem:[%s8288_s21 + $0x38] sm:$0xff] }
 0x45b   : > { %5182 = vst [vmem:[%s10799_s12] sm:$0xff] %v5150_v5  ;;  %v5151_v29 = vmax.f32 %v5119_v38, 0.0  ;;  %v7519_v60 = vadd.f32 %v6846_v15, %v10605_v3  ;;  %v5019_v37 = vmul.f32 %v7473_v24, %v10761_v4  ;;  %v6849_v43 = vadd.f32 %v6848_v48, %v6847_v56  ;;  %v5091_v38 = vld [vmem:[%s8288_s21 + $0x28] sm:$0xff] }
 0x45c   : > { %5185 = vst [vmem:[%s10799_s12 + $0x18] sm:$0xff] %v5153_v47  ;;  %v5060_v58 = vadd.f32 %v10770_v22, %v5021_v16  ;;  %v5022_v54 = vmul.f32 %v7476_v19, %v10761_v4  ;;  %v7479_v8 = vadd.f32 %v10687_v62, %v4868_v40 }
 0x45d   : > { %5183 = vst [vmem:[%s10799_s12 + $0x8] sm:$0xff] %v5151_v29  ;;  %v5058_v52 = vadd.f32 %v10770_v22, %v5019_v37  ;;  %v7525_v61 = vadd.f32 %v6849_v43, %v10609_v41  ;;  %v10818_v3 = vadd.f32 %v7519_v60, %v10689_v1 }
 0x45e   : > { %v5124_v7 = vadd.f32 %v5092_v39, %v5060_v58  ;;  %v5061_v23 = vadd.f32 %v10770_v22, %v5022_v54  ;;  %v5020_v2 = vmul.f32 %v7479_v8, %v10761_v4 }
 0x45f   : > { %v5122_v5 = vadd.f32 %v5090_v31, %v5058_v52  ;;  %v6850_v15 = vpop.f32.mrb[12].mxu0  ;;  %v7306_v24 = vpop.f32.mrb[104].mxu1  ;;  %v10824_v62 = vadd.f32 %v7525_v61, %v10692_v55  ;;  %v5096_v31 = vld [vmem:[%s8288_s21 + $0x50] sm:$0xff] }
 0x460   : > { %v5156_v56 = vmax.f32 %v5124_v7, 0.0  ;;  %v5125_v26 = vadd.f32 %v5093_v35, %v5061_v23  ;;  %v5059_v41 = vadd.f32 %v10770_v22, %v5020_v2  ;;  %v7482_v1 = vadd.f32 %v10720_v14, %v7306_v24  ;;  %v6851_v47 = vpop.f32.mrb[13].mxu0  ;;  %v4881_v16 = vpop.f32.mrb[105].mxu1  ;;  %v5094_v7 = vld [vmem:[%s8288_s21 + $0x40] sm:$0xff]  ;;  %v5097_v2 = vld [vmem:[%s8288_s21 + $0x58] sm:$0xff]  ;;  %v5095_v24 = vld [vmem:[%s8288_s21 + $0x48] sm:$0xff] }
 0x461   : > { %v5154_v19 = vmax.f32 %v5122_v5, 0.0  ;;  %v6852_v48 = vadd.f32 %v6851_v47, %v6850_v15  ;;  %v7485_v40 = vadd.f32 %v10708_v49, %v4881_v16  ;;  %v6853_v29 = vpop.f32.mrb[14].mxu0  ;;  %v7307_v39 = vpop.f32.mrb[106].mxu1 }
 0x462   : > { %5188 = vst [vmem:[%s10799_s12 + $0x30] sm:$0xff] %v5156_v56  ;;  %v5157_v55 = vmax.f32 %v5125_v26, 0.0  ;;  %v5123_v60 = vadd.f32 %v5091_v38, %v5059_v41  ;;  %v5025_v37 = vmul.f32 %v7482_v1, %v10761_v4  ;;  %v7488_v43 = vadd.f32 %v10723_v59, %v7307_v39  ;;  %v6854_v14 = vpop.f32.mrb[15].mxu0  ;;  %v4884_v58 = vpop.f32.mrb[107].mxu1 }
 0x463   : > { %5186 = vst [vmem:[%s10799_s12 + $0x20] sm:$0xff] %v5154_v19  ;;  %v7516_v54 = vadd.f32 %v6852_v48, %v10613_v45  ;;  %v5023_v49 = vmul.f32 %v7485_v40, %v10761_v4  ;;  %v6855_v8 = vadd.f32 %v6854_v14, %v6853_v29  ;;  %v7491_v52 = vadd.f32 %v10711_v9, %v4884_v58 }
 0x464   : > { %5189 = vst [vmem:[%s10799_s12 + $0x38] sm:$0xff] %v5157_v55  ;;  %v5155_v35 = vmax.f32 %v5123_v60, 0.0  ;;  %v5064_v61 = vadd.f32 %v10770_v22, %v5025_v37  ;;  %v5026_v59 = vmul.f32 %v7488_v43, %v10761_v4 }
 0x465   : > { %v5062_v23 = vadd.f32 %v10770_v22, %v5023_v49  ;;  %v7522_v5 = vadd.f32 %v6855_v8, %v10617_v0  ;;  %v5024_v45 = vmul.f32 %v7491_v52, %v10761_v4  ;;  %v10846_v38 = vadd.f32 %v7516_v54, %v10701_v25  ;;  %v5100_v54 = vld [vmem:[%s8288_s21 + $0x70] sm:$0xff] }
 0x466   : > { %5187 = vst [vmem:[%s10799_s12 + $0x28] sm:$0xff] %v5155_v35  ;;  %v5128_v15 = vadd.f32 %v5096_v31, %v5064_v61  ;;  %v5065_v9 = vadd.f32 %v10770_v22, %v5026_v59  ;;  %v5098_v35 = vld [vmem:[%s8288_s21 + $0x60] sm:$0xff]  ;;  %v5101_v59 = vld [vmem:[%s8288_s21 + $0x78] sm:$0xff] }
 0x467   : > { %v5126_v56 = vadd.f32 %v5094_v7, %v5062_v23  ;;  %v5063_v26 = vadd.f32 %v10770_v22, %v5024_v45  ;;  %v6856_v41 = vpop.f32.mrb[16].mxu0  ;;  %v7310_v1 = vpop.f32.mrb[108].mxu1  ;;  %v10853_v47 = vadd.f32 %v7522_v5, %v10704_v11 }
 0x468   : > { %v5160_v0 = vmax.f32 %v5128_v15, 0.0  ;;  %v5129_v16 = vadd.f32 %v5097_v2, %v5065_v9  ;;  %v7494_v25 = vadd.f32 %v10744_v13, %v7310_v1  ;;  %v6857_v19 = vpop.f32.mrb[17].mxu0  ;;  %v4897_v48 = vpop.f32.mrb[109].mxu1  ;;  %v5099_v9 = vld [vmem:[%s8288_s21 + $0x68] sm:$0xff] }
 0x469   : > { %v5158_v40 = vmax.f32 %v5126_v56, 0.0  ;;  %v5127_v29 = vadd.f32 %v5095_v24, %v5063_v26  ;;  %v6858_v39 = vadd.f32 %v6857_v19, %v6856_v41  ;;  %v7497_v55 = vadd.f32 %v10732_v27, %v4897_v48  ;;  %v6859_v60 = vpop.f32.mrb[18].mxu0  ;;  %v7311_v37 = vpop.f32.mrb[110].mxu1 }
 0x46a   : > { %5192 = vst [vmem:[%s10799_s12 + $0x50] sm:$0xff] %v5160_v0  ;;  %v5161_v11 = vmax.f32 %v5129_v16, 0.0  ;;  %v5029_v43 = vmul.f32 %v7494_v25, %v10761_v4  ;;  %v7500_v14 = vadd.f32 %v10747_v10, %v7311_v37  ;;  %v6860_v13 = vpop.f32.mrb[19].mxu0  ;;  %v4900_v58 = vpop.f32.mrb[111].mxu1  ;;  %v5104_v37 = vld [vmem:[%s8288_s21 + $0x90] sm:$0xff] }
 0x46b   : > { %5190 = vst [vmem:[%s10799_s12 + $0x40] sm:$0xff] %v5158_v40  ;;  %v5159_v31 = vmax.f32 %v5127_v29, 0.0  ;;  %v7531_v49 = vadd.f32 %v6858_v39, %v10621_v42  ;;  %v5027_v27 = vmul.f32 %v7497_v55, %v10761_v4  ;;  %v6861_v8 = vadd.f32 %v6860_v13, %v6859_v60 }
 0x46c   : > { %5193 = vst [vmem:[%s10799_s12 + $0x58] sm:$0xff] %v5161_v11  ;;  %v5068_v52 = vadd.f32 %v10770_v22, %v5029_v43  ;;  %v5030_v61 = vmul.f32 %v7500_v14, %v10761_v4  ;;  %v7503_v10 = vadd.f32 %v10735_v44, %v4900_v58 }
 0x46d   : > { %5191 = vst [vmem:[%s10799_s12 + $0x48] sm:$0xff] %v5159_v31  ;;  %v5066_v7 = vadd.f32 %v10770_v22, %v5027_v27  ;;  %v7537_v23 = vadd.f32 %v6861_v8, %v10625_v36  ;;  %v10874_v42 = vadd.f32 %v7531_v49, %v10713_v18  ;;  %v5102_v31 = vld [vmem:[%s8288_s21 + $0x80] sm:$0xff]  ;;  %v5105_v49 = vld [vmem:[%s8288_s21 + $0x98] sm:$0xff] }
 0x46e   : > { %v5132_v2 = vadd.f32 %v5100_v54, %v5068_v52  ;;  %v5069_v5 = vadd.f32 %v10770_v22, %v5030_v61  ;;  %v5028_v45 = vmul.f32 %v7503_v10, %v10761_v4 }
 0x46f   : > { %v5130_v15 = vadd.f32 %v5098_v35, %v5066_v7  ;;  %v6862_v24 = vpop.f32.mrb[20].mxu0  ;;  %v7314_v56 = vpop.f32.mrb[112].mxu1  ;;  %v10880_v44 = vadd.f32 %v7537_v23, %v10716_v63  ;;  %v5103_v35 = vld [vmem:[%s8288_s21 + $0x88] sm:$0xff] }
 0x470   : > { %v5164_v26 = vmax.f32 %v5132_v2, 0.0  ;;  %v5133_v41 = vadd.f32 %v5101_v59, %v5069_v5  ;;  %v5067_v36 = vadd.f32 %v10770_v22, %v5028_v45  ;;  %v7506_v18 = vadd.f32 %v10787_v53, %v7314_v56  ;;  %v6863_v1 = vpop.f32.mrb[21].mxu0  ;;  %v4913_v0 = vpop.f32.mrb[113].mxu1 }
 0x471   : > { %v5162_v16 = vmax.f32 %v5130_v15, 0.0  ;;  %v6864_v25 = vadd.f32 %v6863_v1, %v6862_v24  ;;  %v7509_v19 = vadd.f32 %v10756_v30, %v4913_v0  ;;  %v6865_v48 = vpop.f32.mrb[22].mxu0  ;;  %v7315_v40 = vpop.f32.mrb[114].mxu1 }
 0x472   : > { %5196 = vst [vmem:[%s10799_s12 + $0x70] sm:$0xff] %v5164_v26  ;;  %v5165_v63 = vmax.f32 %v5133_v41, 0.0  ;;  %v5131_v29 = vadd.f32 %v5099_v9, %v5067_v36  ;;  %v5033_v39 = vmul.f32 %v7506_v18, %v10761_v4  ;;  %v7512_v55 = vadd.f32 %v10793_v20, %v7315_v40  ;;  %v6866_v53 = vpop.f32.mrb[23].mxu0  ;;  %v4916_v60 = vpop.f32.mrb[115].mxu1  ;;  %v5106_v40 = vld [vmem:[%s8288_s21 + $0xa0] sm:$0xff] }
 0x473   : > { %5194 = vst [vmem:[%s10799_s12 + $0x60] sm:$0xff] %v5162_v16  ;;  %v7528_v11 = vadd.f32 %v6864_v25, %v10629_v32  ;;  %v5031_v30 = vmul.f32 %v7509_v19, %v10761_v4  ;;  %v6867_v43 = vadd.f32 %v6866_v53, %v6865_v48  ;;  %v7515_v14 = vadd.f32 %v10764_v34, %v4916_v60  ;;  %v5108_v16 = vld [vmem:[%s8288_s21 + $0xb0] sm:$0xff] }
 0x474   : > { %5197 = vst [vmem:[%s10799_s12 + $0x78] sm:$0xff] %v5165_v63  ;;  %v5163_v13 = vmax.f32 %v5131_v29, 0.0  ;;  %v5072_v58 = vadd.f32 %v10770_v22, %v5033_v39  ;;  %v5034_v20 = vmul.f32 %v7512_v55, %v10761_v4  ;;  %v5109_v39 = vld [vmem:[%s8288_s21 + $0xb8] sm:$0xff] }
 0x475   : > { %v5070_v54 = vadd.f32 %v10770_v22, %v5031_v30  ;;  %v7534_v27 = vadd.f32 %v6867_v43, %v10633_v46  ;;  %v5032_v32 = vmul.f32 %v7515_v14, %v10761_v4  ;;  %v7529_v8 = vadd.f32 %v7528_v11, %v10725_v28  ;;  %v5107_v30 = vld [vmem:[%s8288_s21 + $0xa8] sm:$0xff] }
 0x476   : > { %5195 = vst [vmem:[%s10799_s12 + $0x68] sm:$0xff] %v5163_v13  ;;  %v5136_v52 = vadd.f32 %v5104_v37, %v5072_v58  ;;  %v5073_v34 = vadd.f32 %v10770_v22, %v5034_v20 }
 0x477   : > { %v5134_v61 = vadd.f32 %v5102_v31, %v5070_v54  ;;  %v5071_v10 = vadd.f32 %v10770_v22, %v5032_v32  ;;  %v6868_v7 = vpop.f32.mrb[24].mxu0  ;;  %v7318_v59 = vpop.f32.mrb[116].mxu1  ;;  %v7535_v23 = vadd.f32 %v7534_v27, %v10728_v57 }
 0x478   : > { %v5168_v2 = vmax.f32 %v5136_v52, 0.0  ;;  %v5137_v5 = vadd.f32 %v5105_v49, %v5073_v34  ;;  %v7518_v46 = vadd.f32 %v10846_v38, %v7318_v59  ;;  %v6869_v45 = vpop.f32.mrb[25].mxu0  ;;  %v4929_v28 = vpop.f32.mrb[117].mxu1 }
 0x479   : > { %v5166_v15 = vmax.f32 %v5134_v61, 0.0  ;;  %v5135_v9 = vadd.f32 %v5103_v35, %v5071_v10  ;;  %v6870_v24 = vadd.f32 %v6869_v45, %v6868_v7  ;;  %v7521_v56 = vadd.f32 %v10818_v3, %v4929_v28  ;;  %v6871_v26 = vpop.f32.mrb[26].mxu0  ;;  %v7319_v41 = vpop.f32.mrb[118].mxu1  ;;  %v5112_v7 = vld [vmem:[%s8288_s21 + $0xd0] sm:$0xff]  ;;  %v5110_v28 = vld [vmem:[%s8288_s21 + $0xc0] sm:$0xff] }
 0x47a   : > { %5200 = vst [vmem:[%s10799_s12 + $0x90] sm:$0xff] %v5168_v2  ;;  %v5169_v36 = vmax.f32 %v5137_v5, 0.0  ;;  %v5037_v57 = vmul.f32 %v7518_v46, %v10761_v4  ;;  %v7524_v18 = vadd.f32 %v10853_v47, %v7319_v41  ;;  %v6872_v38 = vpop.f32.mrb[27].mxu0  ;;  %v4932_v1 = vpop.f32.mrb[119].mxu1 }
 0x47b   : > { %5198 = vst [vmem:[%s10799_s12 + $0x80] sm:$0xff] %v5166_v15  ;;  %v5167_v0 = vmax.f32 %v5135_v9, 0.0  ;;  %v7543_v25 = vadd.f32 %v6870_v24, %v10637_v21  ;;  %v5035_v3 = vmul.f32 %v7521_v56, %v10761_v4  ;;  %v6873_v19 = vadd.f32 %v6872_v38, %v6871_v26  ;;  %v5113_v9 = vld [vmem:[%s8288_s21 + $0xd8] sm:$0xff] }
 0x47c   : > { %5201 = vst [vmem:[%s10799_s12 + $0x98] sm:$0xff] %v5169_v36  ;;  %v5076_v48 = vadd.f32 %v10770_v22, %v5037_v57  ;;  %v5038_v63 = vmul.f32 %v7524_v18, %v10761_v4  ;;  %v7527_v47 = vadd.f32 %v10824_v62, %v4932_v1  ;;  %v11726_v24 = vld [vmem:[#allocation40_spill] sm:$0xff]  ;;  %v5111_v36 = vld [vmem:[%s8288_s21 + $0xc8] sm:$0xff] }
 0x47d   : > { %5199 = vst [vmem:[%s10799_s12 + $0x88] sm:$0xff] %v5167_v0  ;;  %v5074_v29 = vadd.f32 %v10770_v22, %v5035_v3  ;;  %v7549_v55 = vadd.f32 %v6873_v19, %v10641_v6  ;;  %v7544_v21 = vadd.f32 %v7543_v25, %v10737_v51 }
 0x47e   : > { %v5140_v53 = vadd.f32 %v5108_v16, %v5076_v48  ;;  %v5077_v60 = vadd.f32 %v10770_v22, %v5038_v63  ;;  %v5036_v37 = vmul.f32 %v7527_v47, %v10761_v4 }
 0x47f   : > { %v5138_v11 = vadd.f32 %v5106_v40, %v5074_v29  ;;  %v6874_v43 = vpop.f32.mrb[28].mxu0  ;;  %v7322_v14 = vpop.f32.mrb[120].mxu1  ;;  %v7550_v62 = vadd.f32 %v7549_v55, %v10740_v50  ;;  %v5116_v55 = vld [vmem:[%s8288_s21 + $0xf0] sm:$0xff] }
 0x480   : > { %v5172_v13 = vmax.f32 %v5140_v53, 0.0  ;;  %v5141_v58 = vadd.f32 %v5109_v39, %v5077_v60  ;;  %v5075_v31 = vadd.f32 %v10770_v22, %v5036_v37  ;;  %v7530_v6 = vadd.f32 %v7529_v8, %v7322_v14  ;;  %v6875_v51 = vpop.f32.mrb[29].mxu0  ;;  %v4945_v20 = vpop.f32.mrb[121].mxu1  ;;  %v5114_v37 = vld [vmem:[%s8288_s21 + $0xe0] sm:$0xff] }
 0x481   : > { %v5170_v54 = vmax.f32 %v5138_v11, 0.0  ;;  %v6876_v49 = vadd.f32 %v6875_v51, %v6874_v43  ;;  %v7533_v27 = vadd.f32 %v10874_v42, %v4945_v20  ;;  %v6877_v32 = vpop.f32.mrb[30].mxu0  ;;  %v7323_v52 = vpop.f32.mrb[122].mxu1  ;;  %v5117_v43 = vld [vmem:[%s8288_s21 + $0xf8] sm:$0xff] }
 0x482   : > { %5204 = vst [vmem:[%s10799_s12 + $0xb0] sm:$0xff] %v5172_v13  ;;  %v5173_v34 = vmax.f32 %v5141_v58, 0.0  ;;  %v5139_v50 = vadd.f32 %v5107_v30, %v5075_v31  ;;  %v5041_v35 = vmul.f32 %v7530_v6, %v10761_v4  ;;  %v7536_v61 = vadd.f32 %v7535_v23, %v7323_v52  ;;  %v6878_v10 = vpop.f32.mrb[31].mxu0  ;;  %v4948_v8 = vpop.f32.mrb[123].mxu1  ;;  %v5115_v31 = vld [vmem:[%s8288_s21 + $0xe8] sm:$0xff]  ;;  %s7986_s21 = scalar_lea.vmem %s10977_s29, 4096 }
 0x483   : > { %5202 = vst [vmem:[%s10799_s12 + $0xa0] sm:$0xff] %v5170_v54  ;;  %v7540_v59 = vadd.f32 %v6876_v49, %v10645_v33  ;;  %v5039_v42 = vmul.f32 %v7533_v27, %v10761_v4  ;;  %v6879_v2 = vadd.f32 %v6878_v10, %v6877_v32  ;;  %v7539_v5 = vadd.f32 %v10880_v44, %v4948_v8  ;;  %p7987_p11 = scmp.ne.s32.totalorder %s10977_s29, %s7986_s21  ;;  %p7994_p9 = scmp.lt.s32.totalorder %s7992_s22, %s7986_s21 }
 0x484   : > { %5205 = vst [vmem:[%s10799_s12 + $0xb8] sm:$0xff] %v5173_v34  ;;  %v5171_v46 = vmax.f32 %v5139_v50, 0.0  ;;  %v5080_v45 = vadd.f32 %v10770_v22, %v5041_v35  ;;  %v5042_v23 = vmul.f32 %v7536_v61, %v10761_v4 }
 0x485   : > { %v5078_v15 = vadd.f32 %v10770_v22, %v5039_v42  ;;  %v7546_v56 = vadd.f32 %v6879_v2, %v11726_v24  ;;  %v5040_v33 = vmul.f32 %v7539_v5, %v10761_v4  ;;  %v7541_v26 = vadd.f32 %v7540_v59, %v10749_v17  ;;  %p7988_p1 = pnand %p7987_p11, %p11727_p0  ;;  %p7995_p12 = por %p7994_p9, %p7993_p7 }
 0x486   : > { %5203 = vst [vmem:[%s10799_s12 + $0xa8] sm:$0xff] %v5171_v46  ;;  %v5144_v41 = vadd.f32 %v5112_v7, %v5080_v45  ;;  %v5081_v44 = vadd.f32 %v10770_v22, %v5042_v23 }
 0x487   : > { %v5142_v57 = vadd.f32 %v5110_v28, %v5078_v15  ;;  %v5079_v18 = vadd.f32 %v10770_v22, %v5040_v33  ;;  %v7326_v38 = vpop.f32.mrb[124].mxu1  ;;  %v7547_v1 = vadd.f32 %v7546_v56, %v10752_v12  ;;  %p7989_p3 = pneg %p7988_p1 }
 0x488   : > { %v5176_v0 = vmax.f32 %v5144_v41, 0.0  ;;  %v5145_v16 = vadd.f32 %v5113_v9, %v5081_v44  ;;  %v7542_v25 = vadd.f32 %v7541_v26, %v7326_v38  ;;  %v4961_v3 = vpop.f32.mrb[125].mxu1 }
 0x489   : > { %v5174_v17 = vmax.f32 %v5142_v57, 0.0  ;;  %v5143_v19 = vadd.f32 %v5111_v36, %v5079_v18  ;;  %v7545_v48 = vadd.f32 %v7544_v21, %v4961_v3  ;;  %v7327_v40 = vpop.f32.mrb[126].mxu1  ;;  %p7996_p2 = pnand %p7995_p12, %p7989_p3 }
 0x48a   : > { %5208 = vst [vmem:[%s10799_s12 + $0xd0] sm:$0xff] %v5176_v0  ;;  %v5177_v63 = vmax.f32 %v5145_v16, 0.0  ;;  %v5045_v47 = vmul.f32 %v7542_v25, %v10761_v4  ;;  %v7548_v29 = vadd.f32 %v7547_v1, %v7327_v40  ;;  %v4964_v39 = vpop.f32.mrb[127].mxu1 }
 0x48b   : > { %5206 = vst [vmem:[%s10799_s12 + $0xc0] sm:$0xff] %v5174_v17  ;;  %v5175_v12 = vmax.f32 %v5143_v19, 0.0  ;;  %v5043_v53 = vmul.f32 %v7545_v48, %v10761_v4  ;;  %v7551_v60 = vadd.f32 %v7550_v62, %v4964_v39 }
 0x48c   : > { %5209 = vst [vmem:[%s10799_s12 + $0xd8] sm:$0xff] %v5177_v63  ;;  %v5084_v21 = vadd.f32 %v10770_v22, %v5045_v47  ;;  %v5046_v11 = vmul.f32 %v7548_v29, %v10761_v4 }
 0x48d   : > { %5207 = vst [vmem:[%s10799_s12 + $0xc8] sm:$0xff] %v5175_v12  ;;  %v5082_v30 = vadd.f32 %v10770_v22, %v5043_v53  ;;  %v5044_v14 = vmul.f32 %v7551_v60, %v10761_v4 }
 0x48e   : > { %v5148_v13 = vadd.f32 %v5116_v55, %v5084_v21  ;;  %v5085_v58 = vadd.f32 %v10770_v22, %v5046_v11 }
 0x48f   : > { %v5146_v62 = vadd.f32 %v5114_v37, %v5082_v30  ;;  %v5083_v6 = vadd.f32 %v10770_v22, %v5044_v14 }
 0x490   : > { %v5180_v51 = vmax.f32 %v5148_v13, 0.0  ;;  %v5149_v20 = vadd.f32 %v5117_v43, %v5085_v58 }
 0x491   : > { %v5178_v54 = vmax.f32 %v5146_v62, 0.0  ;;  %v5147_v49 = vadd.f32 %v5115_v31, %v5083_v6 }
 0x492   : > { %5212 = vst [vmem:[%s10799_s12 + $0xf0] sm:$0xff] %v5180_v51  ;;  %v5181_v4 = vmax.f32 %v5149_v20, 0.0 }
 0x493   : > { %5210 = vst [vmem:[%s10799_s12 + $0xe0] sm:$0xff] %v5178_v54  ;;  %v5179_v22 = vmax.f32 %v5147_v49, 0.0 }
 0x494   : > { %5213 = vst [vmem:[%s10799_s12 + $0xf8] sm:$0xff] %v5181_v4 }
 0x495   : > { %5211 = vst [vmem:[%s10799_s12 + $0xe8] sm:$0xff] %v5179_v22 }
 0x496   : > { %7999 = shalt.err (!%p7996_p2)
}
 0x497   : > { %s8000_s10 = scalar_lea.hbm %s10975_s9, 4096  ;;  %s8004_s12 = scalar_lea.hbm %s11031_s7, 8192 }
 0x498   : > { %p8001_p13 = scmp.ne.s32.totalorder %s10975_s9, %s8000_s10  ;;  %p8005_p4 = scmp.lt.u32.totalorder %s10975_s9, %s11031_s7 }
 0x499   : > { %p8006_p5 = scmp.lt.u32.totalorder %s8004_s12, %s8000_s10  ;;  %p8008_p11 = scmp.lt.u32.totalorder %s8000_s10, %s10975_s9 }
 0x49a   : > { %p8002_p6 = pnand %p8001_p13, %p11727_p0 }
 0x49b   : > { %p8007_p8 = por %p8006_p5, %p8005_p4 }
 0x49c   : > { %p8003_p10 = pneg %p8002_p6 }
 0x49d   : > { %p8009_p1 = por %p8008_p11, %p8007_p8 }
 0x49f   : > { %p8010_p3 = pnand %p8009_p1, %p8003_p10 }
 0x4a1   : > { %8013 = shalt.err (!%p8010_p3)
}
 0x4a2   : > { %s8068_s30 = smov 128   ;;  %s8069_s21 = smov 8  }
 0x4a3   : > { %7658 = dma.vmem_to_hbm [thread:$0]  (%p11727_p0), %s10977_s29, 4096, %s10975_s9, %s5215_s28, %s8068_s30, %s8068_s30, %s8069_s21  }
 0x4a4 PF: > { %s5243_s20 = sand.u32 1, %s8044_s24   ;;  %p11728_p7 = scmp.ne.s32.totalorder %s11231_s8, 0 }
 0x4a5   : > { %p11729_p9 = scmp.ge.s32.totalorder %s8056_s27, 2  ;;  %s5244_s11 = scalar_lea.sflag [#allocation5], %s5243_s20 }
 0x4a7   : > { %p7672_p12 = pnand %p11729_p9, %p11728_p7 }
 0x4a9   : > { %8039 = dma.done.wait (!%p7672_p12), %s5244_s11, 4096  }
 0x4aa   : > { %8041 = vsyncadd (!%p7672_p12), %s5244_s11, 4294963200  ;;  %p21_p2 = scmp.ge.s32.totalorder %s8220_s13, 4   ;;  %s11730_s24 = smov %s8048_s25 }
 0x4ab   : > { %s11731_s25 = smov %s8052_s26  ;;  %s11732_s26 = smov %s8236_s17 }
 0x4ac   : > { %s11733_s27 = smov %s8220_s13  ;;  %23 = sbr.rel (!%p21_p2) target bundleno = 6 (0x6), region = 101 }
 0x4b3   :  { %5249 = vsyncpa [#allocation4], 1 }
 0x4b4   :  { %5251 = vsyncpa [#allocation4 + $0x1], 1 }
 0x4b5   :  { %5252 = vsyncpa [#allocation7], 1 }
 0x4b6   :  { %5253 = vsyncpa [#allocation5], 1 }
 0x4b7   :  { %5255 = vsyncpa [#allocation5 + $0x1], 1 }

</bundles_post_ra>
